<compile_context>
chip_gen: v5e
topology: v5e:2x2
jax: 0.10.0
libtpu: 0.0.40
codegen_flags: <defaults>
</compile_context>

<pallas_src>
import functools

import jax
import jax.numpy as jnp
from jax.experimental import pallas as pl
from jax.experimental.pallas import tpu as pltpu


def _round_up(x, m):
    return ((x + m - 1) // m) * m


def _pick_row_tile(n):
    """Largest row tile in {512,256,128} dividing n, preferring >=2 row tiles
    (so the 'parallel' row axis can shard across v7x's two TensorCores)."""
    for t in (512, 256, 128):
        if n % t == 0 and n // t >= 2:
            return t
    for t in (512, 256, 128):
        if n % t == 0:
            return t
    raise ValueError("N must be a multiple of 128")  # TODO(synk): pad/mask ragged N


def _propagate_tiles(n, wp):
    """(tm, tk, vmem_limit_bytes) for the propagation kernel."""
    tm = _pick_row_tile(n)
    budget = 48 << 20                      # conservative vs v7x's 64 MiB physical VMEM
    tk = 128
    for t in (4096, 2048, 1024, 512, 256, 128):
        if n % t == 0 and n >= t:
            need = 2 * tm * t * 2 + 2 * n * wp * 2 + 2 * tm * wp * 4
            if need <= budget:
                tk = t
                break
    need = 2 * tm * tk * 2 + 2 * n * wp * 2 + 2 * tm * wp * 4
    return tm, tk, need + (16 << 20)


# ----------------------------------------------------------------------------
# Kernel 1: fused dense graph propagation  out = G @ X
#   G: [N, N]  bf16 (streamed tiles -> MXU directly, no f32 widen)
#   X: [N, Wp] bf16, VMEM-resident (Wp = 2*D padded to a multiple of 128)
#   out: [N, Wp] f32 (lane-dense, accumulated in place across the k axis)
# ----------------------------------------------------------------------------
def _propagate_kernel(g_ref, x_ref, o_ref, *, tk):
    k = pl.program_id(1)

    @pl.when(k == 0)
    def _():
        o_ref[...] = jnp.zeros_like(o_ref)

    start = pl.multiple_of(k * tk, tk)
    x_blk = x_ref[pl.ds(start, tk), :]                       # (tk, Wp) bf16
    o_ref[...] += jnp.dot(g_ref[...], x_blk,                 # bf16 x bf16 -> f32 acc
                          preferred_element_type=jnp.float32)


def graph_propagate(G_bf16, X_bf16):
    N, Wp = X_bf16.shape
    assert G_bf16.shape == (N, N)
    assert N % 128 == 0 and Wp % 128 == 0
    tm, tk, vmem_limit = _propagate_tiles(N, Wp)
    kernel = functools.partial(_propagate_kernel, tk=tk)
    return pl.pallas_call(
        kernel,
        out_shape=jax.ShapeDtypeStruct((N, Wp), jnp.float32),
        grid_spec=pltpu.PrefetchScalarGridSpec(
            num_scalar_prefetch=0,
            grid=(N // tm, N // tk),
            in_specs=[
                pl.BlockSpec((tm, tk), lambda i, k: (i, k)),   # G: streamed bf16 tiles
                pl.BlockSpec((N, Wp), lambda i, k: (0, 0)),    # X: bf16, VMEM-resident
            ],
            out_specs=pl.BlockSpec((tm, Wp), lambda i, k: (i, 0)),
        ),
        compiler_params=pltpu.CompilerParams(
            dimension_semantics=("parallel", "arbitrary"),
            vmem_limit_bytes=int(vmem_limit)),
    )(G_bf16, X_bf16)


# ----------------------------------------------------------------------------
# Kernel 2: fused per-layer transform of computer2(), operating on the fused
# lane-padded state S = [e1 | e2 | 0] (width Wp).
#   h'   = GRUCell(e2, h0)                       (two accumulating gate dots)
#   side = L2norm(LeakyReLU((e2*h') @ W_gc + b_gc + e2, 0.2))
#   out  = [bf16(e1) | bf16(side) | 0]           (ready for graph_propagate)
# All gate values live in the 128-lane slot [D:2D) of their 128-lane group, so
# every slice in the kernel is at a 128-lane boundary.
# ----------------------------------------------------------------------------
def _gru_layer_kernel(s_ref, h_ref, wxg_ref, whg_ref, bg_ref, wgc_ref, bgc_ref,
                      o_ref, *, d, wp, neg_slope):
    s = s_ref[...]                                           # (tm, Wp) f32: [e1|e2|0]
    h = h_ref[...]                                           # (tm, Wp) f32: [0 |h |0]

    # Two accumulating dots (no in-kernel concatenate); zero-embedded weights select
    # the e2 / h lanes implicitly.
    gates = (jnp.dot(s, wxg_ref[...], preferred_element_type=jnp.float32)
             + jnp.dot(h, whg_ref[...], preferred_element_type=jnp.float32)
             + bg_ref[...])                                  # (tm, 4*Wp)

    r = jax.nn.sigmoid(gates[:, 0 * wp:1 * wp])
    z = jax.nn.sigmoid(gates[:, 1 * wp:2 * wp])
    n = jnp.tanh(gates[:, 2 * wp:3 * wp] + r * gates[:, 3 * wp:4 * wp])
    h_new = (1.0 - z) * n + z * h            # valid in lanes [d:2d), exactly 0 elsewhere

    xh = s * h_new                           # e2*h' in [d:2d); 0 elsewhere
    side = jnp.dot(xh, wgc_ref[...], preferred_element_type=jnp.float32) + bgc_ref[...]
    pre = side + s                           # [0:d)=e1, [d:2d)=side+e2, pad=0
    act = jnp.where(pre >= 0.0, pre, neg_slope * pre)

    lane = jax.lax.broadcasted_iota(jnp.int32, (1, wp), 1)
    slot1 = jnp.logical_and(lane >= d, lane < 2 * d)
    act1 = jnp.where(slot1, act, 0.0)
    ssq = jnp.sum(act1 * act1, axis=1, keepdims=True)
    # F.normalize(p=2, dim=1): x / max(||x||, 1e-12) == x * rsqrt(max(||x||^2, 1e-24))
    side_n = act1 * jax.lax.rsqrt(jnp.maximum(ssq, 1e-24))

    e1 = jnp.where(lane < d, s, 0.0)         # e1 pass-through for computer1's stream
    o_ref[...] = (side_n + e1).astype(o_ref.dtype)


def gru_transform_layer(S, H0_pad, W_xg, W_hg, b_g, W_gc_pad, b_gc_pad, *,
                        d, neg_slope=0.2):
    N, Wp = S.shape
    tm = _pick_row_tile(N)
    row = pl.BlockSpec((tm, Wp), lambda i: (i, 0))
    full = lambda shp: pl.BlockSpec(shp, lambda i: (0, 0))
    kernel = functools.partial(_gru_layer_kernel, d=d, wp=Wp, neg_slope=neg_slope)
    return pl.pallas_call(
        kernel,
        out_shape=jax.ShapeDtypeStruct((N, Wp), jnp.bfloat16),
        grid_spec=pltpu.PrefetchScalarGridSpec(
            num_scalar_prefetch=0,
            grid=(N // tm,),
            in_specs=[row, row,
                      full((Wp, 4 * Wp)), full((Wp, 4 * Wp)), full((1, 4 * Wp)),
                      full((Wp, Wp)), full((1, Wp))],
            out_specs=row,
        ),
        compiler_params=pltpu.CompilerParams(dimension_semantics=("parallel",)),
    )(S, H0_pad, W_xg, W_hg, b_g, W_gc_pad, b_gc_pad)


def _prep_padded_gru_weights(W_ih, W_hh, b_ih, b_hh, D, Wp):
    """Zero-embed nn.GRU (gate order r, z, n) weights into (Wp, 4*Wp) matrices.
    The x-path weights live in rows [D:2D) (where e2 sits in the fused state);
    the h-path weights live in rows [D:2D) of the padded H0. Each gate group is
    Wp lanes wide with the valid lanes at [D:2D) (128-lane-aligned slices)."""
    Gw = 4 * Wp
    sl = slice(D, 2 * D)
    W_xg = jnp.zeros((Wp, Gw), jnp.float32)
    W_hg = jnp.zeros((Wp, Gw), jnp.float32)
    b_g = jnp.zeros((1, Gw), jnp.float32)
    W_xg = W_xg.at[sl, 0 * Wp + D:0 * Wp + 2 * D].set(W_ih[0:D].T)          # r (x)
    W_xg = W_xg.at[sl, 1 * Wp + D:1 * Wp + 2 * D].set(W_ih[D:2 * D].T)      # z (x)
    W_xg = W_xg.at[sl, 2 * Wp + D:2 * Wp + 2 * D].set(W_ih[2 * D:3 * D].T)  # n (x)
    W_hg = W_hg.at[sl, 0 * Wp + D:0 * Wp + 2 * D].set(W_hh[0:D].T)          # r (h)
    W_hg = W_hg.at[sl, 1 * Wp + D:1 * Wp + 2 * D].set(W_hh[D:2 * D].T)      # z (h)
    W_hg = W_hg.at[sl, 3 * Wp + D:3 * Wp + 2 * D].set(W_hh[2 * D:3 * D].T)  # n (h)
    b_g = b_g.at[0, 0 * Wp + D:0 * Wp + 2 * D].set(b_ih[0:D] + b_hh[0:D])
    b_g = b_g.at[0, 1 * Wp + D:1 * Wp + 2 * D].set(b_ih[D:2 * D] + b_hh[D:2 * D])
    b_g = b_g.at[0, 2 * Wp + D:2 * Wp + 2 * D].set(b_ih[2 * D:3 * D])
    b_g = b_g.at[0, 3 * Wp + D:3 * Wp + 2 * D].set(b_hh[2 * D:3 * D])
    return W_xg, W_hg, b_g


def _prep_padded_layer_weights(W_gc, b_gc, h0, D, Wp, N):
    W_gc_pad = jnp.zeros((Wp, Wp), jnp.float32).at[D:2 * D, D:2 * D].set(W_gc)
    b_gc_pad = jnp.zeros((1, Wp), jnp.float32).at[0, D:2 * D].set(b_gc.reshape(D))
    H0_pad = jnp.zeros((N, Wp), jnp.float32).at[:, D:2 * D].set(h0[0])
    return W_gc_pad, b_gc_pad, H0_pad


# ----------------------------------------------------------------------------
# Kernel 3: scalar-prefetch row gather + beta combine + scoring
#   gamma[b] = sum_d (u1[users[b]] + beta*u2[users[b]]) * (i1[items[b]] + beta*i2[items[b]])
# users/items are prefetched into SMEM; only the B needed rows of the four tables
# are DMA'd (no full-table traffic, no one-hot matmul).
# ----------------------------------------------------------------------------
def _score_kernel(uidx_ref, iidx_ref, u1_ref, u2_ref, i1_ref, i2_ref, o_ref, *, beta):
    del uidx_ref, iidx_ref                               # only used by the index maps
    u = u1_ref[...] + beta * u2_ref[...]                 # (1, 1, D) gathered user row
    it = i1_ref[...] + beta * i2_ref[...]                # (1, 1, D) gathered item row
    o_ref[...] = jnp.sum(u * it, axis=-1, keepdims=True)


def score_gather(users, items, u1, u2, i1, i2, *, beta):
    B = users.shape[0]
    num_users, D = u1.shape
    num_items = i1.shape[0]
    u1r = u1.reshape(num_users, 1, D)
    u2r = u2.reshape(num_users, 1, D)
    i1r = i1.reshape(num_items, 1, D)
    i2r = i2.reshape(num_items, 1, D)
    kernel = functools.partial(_score_kernel, beta=beta)
    row_u = pl.BlockSpec((1, 1, D), lambda b, u, it: (u[b], 0, 0))
    row_i = pl.BlockSpec((1, 1, D), lambda b, u, it: (it[b], 0, 0))
    out = pl.pallas_call(
        kernel,
        out_shape=jax.ShapeDtypeStruct((B, 1, 1), jnp.float32),
        grid_spec=pltpu.PrefetchScalarGridSpec(
            num_scalar_prefetch=2,
            grid=(B,),
            in_specs=[row_u, row_u, row_i, row_i],
            out_specs=pl.BlockSpec((1, 1, 1), lambda b, u, it: (b, 0, 0)),
        ),
        compiler_params=pltpu.CompilerParams(dimension_semantics=("arbitrary",)),
    )(users.astype(jnp.int32), items.astype(jnp.int32), u1r, u2r, i1r, i2r)
    return out.reshape(B)


# ----------------------------------------------------------------------------
# Model glue (plain JAX): computer1 + computer2 in a fused lane-padded state,
# one G stream per layer, then scoring.
# ----------------------------------------------------------------------------
def computer_both(user_emb, item_emb, G_bf16, gru_params, layer_params,
                  n_layers, num_users):
    D = user_emb.shape[1]
    N = user_emb.shape[0] + item_emb.shape[0]
    Wp = max(128, _round_up(2 * D, 128))

    all_emb = jnp.concatenate([user_emb, item_emb], axis=0)           # (N, D)
    pad = jnp.zeros((N, Wp - 2 * D), jnp.float32)
    S = jnp.concatenate([all_emb, all_emb, pad], axis=1)              # [e1 | e2 | 0]
    acc = S                                                           # fused accumulator

    W_ih, W_hh, b_ih, b_hh = gru_params
    W_xg, W_hg, b_g = _prep_padded_gru_weights(W_ih, W_hh, b_ih, b_hh, D, Wp)

    for k in range(n_layers):
        W_gc, b_gc, h0 = layer_params[k]
        W_gc_pad, b_gc_pad, H0_pad = _prep_padded_layer_weights(W_gc, b_gc, h0, D, Wp, N)
        X = gru_transform_layer(S, H0_pad, W_xg, W_hg, b_g, W_gc_pad, b_gc_pad, d=D)
        S = graph_propagate(G_bf16, X)                                # one G stream/layer
        acc = acc + S

    light1 = acc[:, :D] / float(n_layers + 1)    # mean over layers (computer1)
    light2 = acc[:, D:2 * D]                     # sum over layers  (computer2)
    return (light1[:num_users], light1[num_users:],
            light2[:num_users], light2[num_users:])


def lightgcn_forward(users, items, user_emb, item_emb, G_bf16,
                     gru_params, layer_params, n_layers, num_users, beta):
    # NOTE: original forward() unpacks computer1()'s 3-tuple into 2 names (a bug in
    # the source); we implement the intended semantics (users, items).
    u1, i1, u2, i2 = computer_both(user_emb, item_emb, G_bf16, gru_params,
                                   layer_params, n_layers, num_users)
    return score_gather(users, items, u1, u2, i1, i2, beta=beta)


# ----------------------------------------------------------------------------
# Pure-JAX reference (self-verification).  It applies the same bf16 quantization
# of G and of the per-layer propagate operand that the kernels use, so the check
# validates kernel correctness rather than the deliberate bf16 precision choice.
# (bf16 rounding near a representable boundary can still flip by one bf16 ulp
# between the two independently computed pre-rounding values; tolerance 2e-3
# covers that, see header.)
# ----------------------------------------------------------------------------
def _ref_forward(users, items, user_emb, item_emb, Gq,
                 gru_params, layer_params, n_layers, num_users, beta):
    hp = jax.lax.Precision.HIGHEST
    W_ih, W_hh, b_ih, b_hh = gru_params
    D = user_emb.shape[1]

    def q(x):  # kernels stream the propagate operand in bf16
        return x.astype(jnp.bfloat16).astype(jnp.float32)

    all_emb = jnp.concatenate([user_emb, item_emb], axis=0)

    e = all_emb
    embs1 = [e]
    for _ in range(n_layers):
        e = jnp.dot(Gq, q(e), precision=hp)
        embs1.append(e)
    light1 = jnp.mean(jnp.stack(embs1, axis=1), axis=1)
    u1, i1 = light1[:num_users], light1[num_users:]

    e = all_emb
    embs2 = [e]
    for k in range(n_layers):
        W_gc, b_gc, h0 = layer_params[k]
        h = h0[0]
        gx = jnp.dot(e, W_ih.T, precision=hp) + b_ih
        gh = jnp.dot(h, W_hh.T, precision=hp) + b_hh
        r = jax.nn.sigmoid(gx[:, :D] + gh[:, :D])
        z = jax.nn.sigmoid(gx[:, D:2 * D] + gh[:, D:2 * D])
        n = jnp.tanh(gx[:, 2 * D:] + r * gh[:, 2 * D:])
        h_new = (1.0 - z) * n + z * h
        side = jnp.dot(e * h_new, W_gc, precision=hp) + b_gc
        pre = side + e
        act = jnp.where(pre >= 0, pre, 0.2 * pre)
        norm = jnp.sqrt(jnp.sum(act * act, axis=1, keepdims=True))
        e = jnp.dot(Gq, q(act / jnp.maximum(norm, 1e-12)), precision=hp)
        embs2.append(e)
    light2 = jnp.sum(jnp.stack(embs2, axis=1), axis=1)
    u2, i2 = light2[:num_users], light2[num_users:]

    ue = u1[users] + beta * u2[users]
    ie = i1[items] + beta * i2[items]
    return jnp.sum(ue * ie, axis=1)


# ----------------------------------------------------------------------------
# Main
# ----------------------------------------------------------------------------
def _xavier_uniform(key, shape):
    fan_in, fan_out = shape[-1], shape[-2] if len(shape) >= 2 else shape[-1]
    bound = (6.0 / (fan_in + fan_out)) ** 0.5
    return jax.random.uniform(key, shape, jnp.float32, -bound, bound)


if __name__ == "__main__":
    key = jax.random.PRNGKey(0)
    num_users, num_items, D, n_layers = 48, 80, 32, 2
    N = num_users + num_items        # 128
    beta = 0.001
    B = 8                            # batch of (user, item) pairs

    keys = jax.random.split(key, 12)

    # Embedding tables (nn.init.normal_(std=0.1))
    user_emb = 0.1 * jax.random.normal(keys[0], (num_users, D), jnp.float32)
    item_emb = 0.1 * jax.random.normal(keys[1], (num_items, D), jnp.float32)

    # Dense symmetric normalized bipartite adjacency (stands in for getSparseGraph()).
    R = (jax.random.uniform(keys[2], (num_users, num_items)) < 0.15).astype(jnp.float32)
    A = jnp.zeros((N, N), jnp.float32)
    A = A.at[:num_users, num_users:].set(R)
    A = A.at[num_users:, :num_users].set(R.T)
    deg = jnp.sum(A, axis=1)
    d_inv = jnp.where(deg > 0, 1.0 / jnp.sqrt(jnp.maximum(deg, 1e-12)), 0.0)
    G = d_inv[:, None] * A * d_inv[None, :]
    G_bf16 = G.astype(jnp.bfloat16)                 # streamed in bf16 by the kernel
    Gq = G_bf16.astype(jnp.float32)                 # reference uses the same values

    # nn.GRU(latent_dim, latent_dim, num_layers=1) parameters (gate order r,z,n).
    s = 1.0 / (D ** 0.5)
    W_ih = jax.random.uniform(keys[3], (3 * D, D), jnp.float32, -s, s)
    W_hh = jax.random.uniform(keys[4], (3 * D, D), jnp.float32, -s, s)
    b_ih = jax.random.uniform(keys[5], (3 * D,), jnp.float32, -s, s)
    b_hh = jax.random.uniform(keys[6], (3 * D,), jnp.float32, -s, s)
    gru_params = (W_ih, W_hh, b_ih, b_hh)

    # Per-layer weight_dict: W_gc_k (D,D), b_gc_k (1,D), h_k (1,N,D).
    layer_params = []
    for k in range(n_layers):
        kk = jax.random.split(keys[7 + k], 3)
        layer_params.append((_xavier_uniform(kk[0], (D, D)),
                             _xavier_uniform(kk[1], (1, D)),
                             _xavier_uniform(kk[2], (1, N, D))))

    users = jax.random.randint(keys[10], (B,), 0, num_users, jnp.int32)
    items = jax.random.randint(keys[11], (B,), 0, num_items, jnp.int32)

    gamma = lightgcn_forward(users, items, user_emb, item_emb, G_bf16,
                             gru_params, layer_params, n_layers, num_users, beta)
    gamma = jax.block_until_ready(gamma)

    ref = _ref_forward(users, items, user_emb, item_emb, Gq,
                       gru_params, layer_params, n_layers, num_users, beta)
    ref = jax.block_until_ready(ref)

    assert gamma.shape == (B,)
    assert jnp.allclose(gamma, ref, rtol=2e-3, atol=2e-3), (gamma, ref)
    print("KERNEL_OK")
</pallas_src>

<mosaic_0001>
module attributes {stable_mosaic.version = 11 : i64} {
  func.func @_gru_layer_kernel(%arg0: i32, %arg1: memref<128x128xf32, #tpu.memory_space<vmem>>, %arg2: memref<128x128xf32, #tpu.memory_space<vmem>>, %arg3: memref<128x512xf32, #tpu.memory_space<vmem>>, %arg4: memref<128x512xf32, #tpu.memory_space<vmem>>, %arg5: memref<1x512xf32, #tpu.memory_space<vmem>>, %arg6: memref<128x128xf32, #tpu.memory_space<vmem>>, %arg7: memref<1x128xf32, #tpu.memory_space<vmem>>, %arg8: memref<128x128xbf16, #tpu.memory_space<vmem>>) attributes {dimension_semantics = [#tpu.dimension_semantics<parallel>], iteration_bounds = array<i64: 1>, scalar_prefetch = 0 : i64, scratch_operands = 0 : i64, tpu.core_type = #tpu.core_type<tc>, window_params = [{transform_indices = @transform_0, window_bounds = array<i64: 128, 128>}, {transform_indices = @transform_1, window_bounds = array<i64: 128, 128>}, {pipeline_mode = #tpu.pipeline_mode<synchronous>, transform_indices = @transform_2, window_bounds = array<i64: 128, 512>}, {pipeline_mode = #tpu.pipeline_mode<synchronous>, transform_indices = @transform_3, window_bounds = array<i64: 128, 512>}, {pipeline_mode = #tpu.pipeline_mode<synchronous>, transform_indices = @transform_4, window_bounds = array<i64: 1, 512>}, {pipeline_mode = #tpu.pipeline_mode<synchronous>, transform_indices = @transform_5, window_bounds = array<i64: 128, 128>}, {pipeline_mode = #tpu.pipeline_mode<synchronous>, transform_indices = @transform_6, window_bounds = array<i64: 1, 128>}, {transform_indices = @transform_7, window_bounds = array<i64: 128, 128>}]} {
    %c0 = arith.constant 0 : index
    %c0_0 = arith.constant 0 : index
    %0 = vector.load %arg1[%c0, %c0_0] : memref<128x128xf32, #tpu.memory_space<vmem>>, vector<128x128xf32>
    %c0_1 = arith.constant 0 : index
    %c0_2 = arith.constant 0 : index
    %1 = vector.load %arg2[%c0_1, %c0_2] : memref<128x128xf32, #tpu.memory_space<vmem>>, vector<128x128xf32>
    %c0_3 = arith.constant 0 : index
    %c0_4 = arith.constant 0 : index
    %2 = vector.load %arg3[%c0_3, %c0_4] : memref<128x512xf32, #tpu.memory_space<vmem>>, vector<128x512xf32>
    %cst = arith.constant dense<0.000000e+00> : vector<128x512xf32>
    %3 = tpu.matmul %0, %2, %cst {dimension_numbers = #tpu.dot_dimension_numbers<[1], [0], [0], [1], [0, 0, 1, 1], [], []>} : vector<128x128xf32>, vector<128x512xf32>, vector<128x512xf32> -> vector<128x512xf32>
    %c0_5 = arith.constant 0 : index
    %c0_6 = arith.constant 0 : index
    %4 = vector.load %arg4[%c0_5, %c0_6] : memref<128x512xf32, #tpu.memory_space<vmem>>, vector<128x512xf32>
    %cst_7 = arith.constant dense<0.000000e+00> : vector<128x512xf32>
    %5 = tpu.matmul %1, %4, %cst_7 {dimension_numbers = #tpu.dot_dimension_numbers<[1], [0], [0], [1], [0, 0, 1, 1], [], []>} : vector<128x128xf32>, vector<128x512xf32>, vector<128x512xf32> -> vector<128x512xf32>
    %6 = arith.addf %3, %5 : vector<128x512xf32>
    %c0_8 = arith.constant 0 : index
    %c0_9 = arith.constant 0 : index
    %7 = vector.load %arg5[%c0_8, %c0_9] : memref<1x512xf32, #tpu.memory_space<vmem>>, vector<1x512xf32>
    %8 = vector.broadcast %7 : vector<1x512xf32> to vector<128x512xf32>
    %9 = arith.addf %6, %8 : vector<128x512xf32>
    %10 = vector.extract_strided_slice %9 {offsets = [0, 0], sizes = [128, 128], strides = [1, 1]} : vector<128x512xf32> to vector<128x128xf32>
    %11 = arith.negf %10 : vector<128x128xf32>
    %12 = math.exp %11 : vector<128x128xf32>
    %cst_10 = arith.constant 1.000000e+00 : f32
    %13 = vector.broadcast %cst_10 : f32 to vector<128x128xf32>
    %14 = arith.addf %13, %12 : vector<128x128xf32>
    %15 = arith.divf %13, %14 : vector<128x128xf32>
    %16 = vector.extract_strided_slice %9 {offsets = [0, 128], sizes = [128, 128], strides = [1, 1]} : vector<128x512xf32> to vector<128x128xf32>
    %17 = arith.negf %16 : vector<128x128xf32>
    %18 = math.exp %17 : vector<128x128xf32>
    %cst_11 = arith.constant 1.000000e+00 : f32
    %19 = vector.broadcast %cst_11 : f32 to vector<128x128xf32>
    %20 = arith.addf %19, %18 : vector<128x128xf32>
    %21 = arith.divf %19, %20 : vector<128x128xf32>
    %22 = vector.extract_strided_slice %9 {offsets = [0, 256], sizes = [128, 128], strides = [1, 1]} : vector<128x512xf32> to vector<128x128xf32>
    %23 = vector.extract_strided_slice %9 {offsets = [0, 384], sizes = [128, 128], strides = [1, 1]} : vector<128x512xf32> to vector<128x128xf32>
    %24 = arith.mulf %15, %23 : vector<128x128xf32>
    %25 = arith.addf %22, %24 : vector<128x128xf32>
    %26 = math.tanh %25 : vector<128x128xf32>
    %cst_12 = arith.constant 1.000000e+00 : f32
    %27 = vector.broadcast %cst_12 : f32 to vector<128x128xf32>
    %28 = arith.subf %27, %21 : vector<128x128xf32>
    %29 = arith.mulf %28, %26 : vector<128x128xf32>
    %30 = arith.mulf %21, %1 : vector<128x128xf32>
    %31 = arith.addf %29, %30 : vector<128x128xf32>
    %32 = arith.mulf %0, %31 : vector<128x128xf32>
    %c0_13 = arith.constant 0 : index
    %c0_14 = arith.constant 0 : index
    %33 = vector.load %arg6[%c0_13, %c0_14] : memref<128x128xf32, #tpu.memory_space<vmem>>, vector<128x128xf32>
    %cst_15 = arith.constant dense<0.000000e+00> : vector<128x128xf32>
    %34 = tpu.matmul %32, %33, %cst_15 {dimension_numbers = #tpu.dot_dimension_numbers<[1], [0], [0], [1], [0, 0, 1, 1], [], []>} : vector<128x128xf32>, vector<128x128xf32>, vector<128x128xf32> -> vector<128x128xf32>
    %c0_16 = arith.constant 0 : index
    %c0_17 = arith.constant 0 : index
    %35 = vector.load %arg7[%c0_16, %c0_17] : memref<1x128xf32, #tpu.memory_space<vmem>>, vector<1x128xf32>
    %36 = vector.broadcast %35 : vector<1x128xf32> to vector<128x128xf32>
    %37 = arith.addf %34, %36 : vector<128x128xf32>
    %38 = arith.addf %37, %0 : vector<128x128xf32>
    %cst_18 = arith.constant 0.000000e+00 : f32
    %39 = vector.broadcast %cst_18 : f32 to vector<128x128xf32>
    %40 = arith.cmpf oge, %38, %39 : vector<128x128xf32>
    %cst_19 = arith.constant 2.000000e-01 : f32
    %41 = vector.broadcast %cst_19 : f32 to vector<128x128xf32>
    %42 = arith.mulf %41, %38 : vector<128x128xf32>
    %43 = arith.select %40, %38, %42 : vector<128x128xi1>, vector<128x128xf32>
    %44 = tpu.iota {dimensions = array<i32: 1>} : vector<1x128xi32>
    %c32_i32 = arith.constant 32 : i32
    %45 = vector.broadcast %c32_i32 : i32 to vector<1x128xi32>
    %46 = arith.cmpi sge, %44, %45 : vector<1x128xi32>
    %c64_i32 = arith.constant 64 : i32
    %47 = vector.broadcast %c64_i32 : i32 to vector<1x128xi32>
    %48 = arith.cmpi slt, %44, %47 : vector<1x128xi32>
    %49 = arith.andi %46, %48 : vector<1x128xi1>
    %cst_20 = arith.constant 0.000000e+00 : f32
    %50 = vector.shape_cast %49 : vector<1x128xi1> to vector<1x128xi1>
    %51 = vector.broadcast %50 : vector<1x128xi1> to vector<128x128xi1>
    %52 = vector.broadcast %cst_20 : f32 to vector<128x128xf32>
    %53 = arith.select %51, %43, %52 : vector<128x128xi1>, vector<128x128xf32>
    %54 = arith.mulf %53, %53 : vector<128x128xf32>
    %cst_21 = arith.constant dense<0.000000e+00> : vector<128xf32>
    %55 = vector.multi_reduction <add>, %54, %cst_21 [1] : vector<128x128xf32> to vector<128xf32>
    %56 = vector.shape_cast %55 : vector<128xf32> to vector<128x1xf32>
    %cst_22 = arith.constant 1.000000e-24 : f32
    %57 = vector.broadcast %cst_22 : f32 to vector<128x1xf32>
    %58 = arith.maximumf %56, %57 : vector<128x1xf32>
    %59 = math.rsqrt %58 : vector<128x1xf32>
    %60 = vector.broadcast %59 : vector<128x1xf32> to vector<128x128xf32>
    %61 = arith.mulf %53, %60 : vector<128x128xf32>
    %c32_i32_23 = arith.constant 32 : i32
    %62 = vector.broadcast %c32_i32_23 : i32 to vector<1x128xi32>
    %63 = arith.cmpi slt, %44, %62 : vector<1x128xi32>
    %cst_24 = arith.constant 0.000000e+00 : f32
    %64 = vector.shape_cast %63 : vector<1x128xi1> to vector<1x128xi1>
    %65 = vector.broadcast %64 : vector<1x128xi1> to vector<128x128xi1>
    %66 = vector.broadcast %cst_24 : f32 to vector<128x128xf32>
    %67 = arith.select %65, %0, %66 : vector<128x128xi1>, vector<128x128xf32>
    %68 = arith.addf %61, %67 : vector<128x128xf32>
    %69 = arith.truncf %68 : vector<128x128xf32> to vector<128x128xbf16>
    %c0_25 = arith.constant 0 : index
    %c0_26 = arith.constant 0 : index
    %70 = vector.load %arg8[%c0_25, %c0_26] : memref<128x128xbf16, #tpu.memory_space<vmem>>, vector<128x128xbf16>
    tpu.vector_store %arg8[%c0_25, %c0_26], %69 {strides = array<i32>} : memref<128x128xbf16, #tpu.memory_space<vmem>>, vector<128x128xbf16>,
    return
  }
  func.func @transform_0(%arg0: i32) -> (i32, i32) {
    %c0_i32 = arith.constant 0 : i32
    %c0_i32_0 = arith.constant 0 : i32
    return %arg0, %c0_i32 : i32, i32
  }
  func.func @transform_1(%arg0: i32) -> (i32, i32) {
    %c0_i32 = arith.constant 0 : i32
    %c0_i32_0 = arith.constant 0 : i32
    return %arg0, %c0_i32 : i32, i32
  }
  func.func @transform_2(%arg0: i32) -> (i32, i32) {
    %c0_i32 = arith.constant 0 : i32
    %c0_i32_0 = arith.constant 0 : i32
    %c0_i32_1 = arith.constant 0 : i32
    return %c0_i32, %c0_i32_0 : i32, i32
  }
  func.func @transform_3(%arg0: i32) -> (i32, i32) {
    %c0_i32 = arith.constant 0 : i32
    %c0_i32_0 = arith.constant 0 : i32
    %c0_i32_1 = arith.constant 0 : i32
    return %c0_i32, %c0_i32_0 : i32, i32
  }
  func.func @transform_4(%arg0: i32) -> (i32, i32) {
    %c0_i32 = arith.constant 0 : i32
    %c0_i32_0 = arith.constant 0 : i32
    %c0_i32_1 = arith.constant 0 : i32
    return %c0_i32, %c0_i32_0 : i32, i32
  }
  func.func @transform_5(%arg0: i32) -> (i32, i32) {
    %c0_i32 = arith.constant 0 : i32
    %c0_i32_0 = arith.constant 0 : i32
    %c0_i32_1 = arith.constant 0 : i32
    return %c0_i32, %c0_i32_0 : i32, i32
  }
  func.func @transform_6(%arg0: i32) -> (i32, i32) {
    %c0_i32 = arith.constant 0 : i32
    %c0_i32_0 = arith.constant 0 : i32
    %c0_i32_1 = arith.constant 0 : i32
    return %c0_i32, %c0_i32_0 : i32, i32
  }
  func.func @transform_7(%arg0: i32) -> (i32, i32) {
    %c0_i32 = arith.constant 0 : i32
    %c0_i32_0 = arith.constant 0 : i32
    return %arg0, %c0_i32 : i32, i32
  }
}

</mosaic_0001>

<bundles_post_ra>
// kernel: tpu_custom_call.1
= control target key start
LH: loop header
LB: loop body
LE: loop exit
PB: predicated region body
PF: predicated region fallthrough
CT: control target
= control target key end

     0   :  { %12 = vsyncpa [#allocation3], 0  ;;  %s4288_s0 = inlined_call_operand.hbm [shape: f32[128,128], index: 0, kind: input, shape index: {}]   ;;  %s4289_s1 = inlined_call_operand.hbm [shape: f32[128,128], index: 1, kind: input, shape index: {}]   ;;  %s4290_s2 = inlined_call_operand.hbm [shape: f32[128,512], index: 2, kind: input, shape index: {}]   ;;  %s4291_s3 = inlined_call_operand.hbm [shape: f32[128,512], index: 3, kind: input, shape index: {}]   ;;  %s4292_s4 = inlined_call_operand.hbm [shape: f32[1,512], index: 4, kind: input, shape index: {}]   ;;  %s4293_s5 = inlined_call_operand.hbm [shape: f32[128,128], index: 5, kind: input, shape index: {}]   ;;  %s4294_s6 = inlined_call_operand.vmem [shape: f32[1,128], index: 6, kind: input, shape index: {}]   ;;  %s4295_s7 = inlined_call_operand.hbm [shape: bf16[128,128], index: 7, kind: output, shape index: {}]  }
   0x1   :  { %13 = vsyncpa [#allocation6], 0 }
   0x2   :  { %14 = vsyncpa [#allocation9], 0 }
   0x3   :  { %15 = vsyncpa [#allocation12], 0 }
   0x4   :  { %16 = vsyncpa [#allocation4], 0  ;;  %s34_s26 = sshll.u32 %s4289_s1, 4  ;;  %s2662_s27 = smov [#allocation5]   ;;  %s35_s26 = int_to_ptr.hbm [resolvable:$true] %s34_s26 }
   0x5   :  { %s36_s28 = sshll.u32 %s2662_s27, 4  ;;  %s2663_s29 = smov 128   ;;  %s37_s28 = int_to_ptr.vmem [resolvable:$true] %s36_s28 }
   0x6   :  { %s2664_s30 = smov 8   ;;  %s60_s10 = sshll.u32 %s4291_s3, 4  ;;  %s61_s10 = int_to_ptr.hbm [resolvable:$true] %s60_s10 }
   0x7   :  { %42 = dma.hbm_to_vmem [thread:$0]  %s35_s26, 2048, %s37_s28, [#allocation6], %s2663_s29, %s2663_s29, %s2664_s30  }
   0x8   :  { %s2665_s11 = smov [#allocation8]   ;;  %s21_s1 = sshll.u32 %s4288_s0, 4  ;;  %s22_s1 = int_to_ptr.hbm [resolvable:$true] %s21_s1 }
   0x9   :  { %s62_s12 = sshll.u32 %s2665_s11, 4  ;;  %s2666_s15 = smov 512   ;;  %s63_s12 = int_to_ptr.vmem [resolvable:$true] %s62_s12 }
   0xa   :  { %s2667_s16 = smov 32   ;;  %s47_s19 = sshll.u32 %s4290_s2, 4  ;;  %s48_s19 = int_to_ptr.hbm [resolvable:$true] %s47_s19 }
   0xb   :  { %68 = dma.hbm_to_vmem [thread:$0]  %s61_s10, 8192, %s63_s12, [#allocation9], %s2666_s15, %s2666_s15, %s2667_s16  }
   0xc   :  { %s2668_s20 = smov [#allocation2]   ;;  %s2669_s3 = smov [#allocation7]  }
   0xd   :  { %s23_s21 = sshll.u32 %s2668_s20, 4  ;;  %s49_s22 = sshll.u32 %s2669_s3, 4  ;;  %s24_s21 = int_to_ptr.vmem [resolvable:$true] %s23_s21  ;;  %s50_s22 = int_to_ptr.vmem [resolvable:$true] %s49_s22 }
   0xe   :  { %29 = dma.hbm_to_vmem [thread:$0]  %s22_s1, 2048, %s24_s21, [#allocation3], %s2663_s29, %s2663_s29, %s2664_s30  }
   0xf   :  { %s74_s24 = sshll.u32 %s4292_s4, 4  ;;  %s84_s2 = sshll.u32 %s4293_s5, 4  ;;  %s75_s24 = int_to_ptr.hbm [resolvable:$true] %s74_s24  ;;  %s85_s2 = int_to_ptr.hbm [resolvable:$true] %s84_s2 }
  0x10   :  { %55 = dma.hbm_to_vmem [thread:$0]  %s48_s19, 8192, %s50_s22, [#allocation6], %s2666_s15, %s2666_s15, %s2667_s16  }
  0x11   :  { %s2670_s27 = smov [#allocation10]   ;;  %s2671_s8 = smov [#allocation11]  }
  0x12   :  { %s76_s28 = sshll.u32 %s2670_s27, 4  ;;  %s86_s9 = sshll.u32 %s2671_s8, 4  ;;  %s77_s28 = int_to_ptr.vmem [resolvable:$true] %s76_s28  ;;  %s87_s9 = int_to_ptr.vmem [resolvable:$true] %s86_s9 }
  0x13   :  { %79 = dma.hbm_to_vmem [thread:$0]  %s75_s24, 64, %s77_s28, [#allocation9]  }
  0x14   :  { %92 = dma.hbm_to_vmem [thread:$0]  %s85_s2, 2048, %s87_s9, [#allocation12], %s2663_s29, %s2663_s29, %s2664_s30  }
  0x15   :  { %2652 = dma.done.wait [#allocation3], 2048  }
  0x16   :  { %2653 = vsyncadd [#allocation3], 4294965248 }
  0x17   :  { %2654 = dma.done.wait [#allocation6], 10240  }
  0x18   :  { %2655 = vsyncadd [#allocation6], 4294957056 }
  0x19   :  { %2656 = dma.done.wait [#allocation9], 8256  }
  0x1a   :  { %2657 = vsyncadd [#allocation9], 4294959040 }
  0x1b   :  { %2658 = dma.done.wait [#allocation12], 2048  }
  0x1c   :  { %2659 = vsyncadd [#allocation12], 4294965248  ;;  %v275_v0 = vld [vmem:[#allocation8 + $0x1e0] sm:$0xff]  ;;  %v276_v20 = vld [vmem:[#allocation8 + $0x1e8] sm:$0xff]  ;;  %s2094_s11 = sshll.u32 %s4295_s7, 4  ;;  %s2673_s12 = smov 64   ;;  %s2095_s11 = int_to_ptr.hbm [resolvable:$true] %s2094_s11 }
  0x1d   :  { %v271_v1 = vld [vmem:[#allocation8 + $0x1c0] sm:$0xff]  ;;  %279 = vmatpush.msra.mxu0 %v275_v0  ;;  %2189 = vmatpush.msra.mxu1 %v275_v0  ;;  %v277_v21 = vld [vmem:[#allocation8 + $0x1f0] sm:$0xff]  ;;  %v278_v22 = vld [vmem:[#allocation8 + $0x1f8] sm:$0xff]  ;;  %s2674_s13 = smov 4  }
  0x1e   :  { %2190 = vmatpush.msra.mxu2 %v275_v0  ;;  %2191 = vmatpush.msra.mxu3 %v275_v0  ;;  %v267_v2 = vld [vmem:[#allocation8 + $0x1a0] sm:$0xff]  ;;  %v272_v24 = vld [vmem:[#allocation8 + $0x1c8] sm:$0xff]  ;;  %v273_v25 = vld [vmem:[#allocation8 + $0x1d0] sm:$0xff] }
  0x1f   :  { %280 = vmatpush.msra.mxu0 %v271_v1  ;;  %2192 = vmatpush.msra.mxu1 %v271_v1  ;;  %v263_v3 = vld [vmem:[#allocation8 + $0x180] sm:$0xff]  ;;  %v274_v26 = vld [vmem:[#allocation8 + $0x1d8] sm:$0xff]  ;;  %v268_v28 = vld [vmem:[#allocation8 + $0x1a8] sm:$0xff] }
  0x20   :  { %2193 = vmatpush.msra.mxu2 %v271_v1  ;;  %2194 = vmatpush.msra.mxu3 %v271_v1  ;;  %v259_v4 = vld [vmem:[#allocation8 + $0x160] sm:$0xff]  ;;  %v269_v29 = vld [vmem:[#allocation8 + $0x1b0] sm:$0xff]  ;;  %v270_v30 = vld [vmem:[#allocation8 + $0x1b8] sm:$0xff] }
  0x21   :  { %281 = vmatpush.msra.mxu0 %v267_v2  ;;  %2195 = vmatpush.msra.mxu1 %v267_v2  ;;  %v255_v5 = vld [vmem:[#allocation8 + $0x140] sm:$0xff]  ;;  %v264_v32 = vld [vmem:[#allocation8 + $0x188] sm:$0xff]  ;;  %v265_v33 = vld [vmem:[#allocation8 + $0x190] sm:$0xff] }
  0x22   :  { %2196 = vmatpush.msra.mxu2 %v267_v2  ;;  %2197 = vmatpush.msra.mxu3 %v267_v2  ;;  %v251_v6 = vld [vmem:[#allocation8 + $0x120] sm:$0xff]  ;;  %v266_v34 = vld [vmem:[#allocation8 + $0x198] sm:$0xff]  ;;  %v2754_v36 = vld [vmem:[#allocation5 + $0x8] sm:$0xff] }
  0x23   :  { %282 = vmatpush.msra.mxu0 %v263_v3  ;;  %2198 = vmatpush.msra.mxu1 %v263_v3  ;;  %v247_v7 = vld [vmem:[#allocation8 + $0x100] sm:$0xff]  ;;  %v2756_v37 = vld [vmem:[#allocation5 + $0x28] sm:$0xff]  ;;  %v261_v41 = vld [vmem:[#allocation8 + $0x170] sm:$0xff] }
  0x24   :  { %2199 = vmatpush.msra.mxu2 %v263_v3  ;;  %2200 = vmatpush.msra.mxu3 %v263_v3  ;;  %v243_v8 = vld [vmem:[#allocation8 + $0xe0] sm:$0xff]  ;;  %v2758_v38 = vld [vmem:[#allocation5 + $0x48] sm:$0xff]  ;;  %v262_v42 = vld [vmem:[#allocation8 + $0x178] sm:$0xff] }
  0x25   :  { %283 = vmatpush.msra.mxu0 %v259_v4  ;;  %2201 = vmatpush.msra.mxu1 %v259_v4  ;;  %v239_v9 = vld [vmem:[#allocation8 + $0xc0] sm:$0xff]  ;;  %v2760_v39 = vld [vmem:[#allocation5 + $0x68] sm:$0xff]  ;;  %v257_v45 = vld [vmem:[#allocation8 + $0x150] sm:$0xff] }
  0x26   :  { %2202 = vmatpush.msra.mxu2 %v259_v4  ;;  %2203 = vmatpush.msra.mxu3 %v259_v4  ;;  %v235_v10 = vld [vmem:[#allocation8 + $0xa0] sm:$0xff]  ;;  %v260_v40 = vld [vmem:[#allocation8 + $0x168] sm:$0xff]  ;;  %v258_v46 = vld [vmem:[#allocation8 + $0x158] sm:$0xff] }
  0x27   :  { %284 = vmatpush.msra.mxu0 %v255_v5  ;;  %2204 = vmatpush.msra.mxu1 %v255_v5  ;;  %v231_v11 = vld [vmem:[#allocation8 + $0x80] sm:$0xff]  ;;  %v256_v44 = vld [vmem:[#allocation8 + $0x148] sm:$0xff]  ;;  %v253_v49 = vld [vmem:[#allocation8 + $0x130] sm:$0xff] }
  0x28   :  { %2205 = vmatpush.msra.mxu2 %v255_v5  ;;  %2206 = vmatpush.msra.mxu3 %v255_v5  ;;  %v227_v12 = vld [vmem:[#allocation8 + $0x60] sm:$0xff]  ;;  %v252_v48 = vld [vmem:[#allocation8 + $0x128] sm:$0xff]  ;;  %v254_v50 = vld [vmem:[#allocation8 + $0x138] sm:$0xff] }
  0x29   :  { %285 = vmatpush.msra.mxu0 %v251_v6  ;;  %2207 = vmatpush.msra.mxu1 %v251_v6  ;;  %v223_v13 = vld [vmem:[#allocation8 + $0x40] sm:$0xff]  ;;  %v248_v52 = vld [vmem:[#allocation8 + $0x108] sm:$0xff]  ;;  %v249_v53 = vld [vmem:[#allocation8 + $0x110] sm:$0xff] }
  0x2a   :  { %2208 = vmatpush.msra.mxu2 %v251_v6  ;;  %2209 = vmatpush.msra.mxu3 %v251_v6  ;;  %v219_v14 = vld [vmem:[#allocation8 + $0x20] sm:$0xff]  ;;  %v250_v54 = vld [vmem:[#allocation8 + $0x118] sm:$0xff]  ;;  %v2766_v56 = vld [vmem:[#allocation5 + $0x10] sm:$0xff] }
  0x2b   :  { %286 = vmatpush.msra.mxu0 %v247_v7  ;;  %2210 = vmatpush.msra.mxu1 %v247_v7  ;;  %v215_v15 = vld [vmem:[#allocation8] sm:$0xff]  ;;  %v2768_v57 = vld [vmem:[#allocation5 + $0x30] sm:$0xff]  ;;  %v244_v60 = vld [vmem:[#allocation8 + $0xe8] sm:$0xff] }
  0x2c   :  { %2211 = vmatpush.msra.mxu2 %v247_v7  ;;  %2212 = vmatpush.msra.mxu3 %v247_v7  ;;  %v2742_v16 = vld [vmem:[#allocation5] sm:$0xff]  ;;  %v2770_v58 = vld [vmem:[#allocation5 + $0x50] sm:$0xff]  ;;  %v246_v62 = vld [vmem:[#allocation8 + $0xf8] sm:$0xff] }
  0x2d   :  { %287 = vmatpush.msra.mxu0 %v243_v8  ;;  %2213 = vmatpush.msra.mxu1 %v243_v8  ;;  %v2744_v17 = vld [vmem:[#allocation5 + $0x20] sm:$0xff]  ;;  %v2772_v59 = vld [vmem:[#allocation5 + $0x70] sm:$0xff]  ;;  %v240_v0 = vld [vmem:[#allocation8 + $0xc8] sm:$0xff] }
  0x2e   :  { %2214 = vmatpush.msra.mxu2 %v243_v8  ;;  %2215 = vmatpush.msra.mxu3 %v243_v8  ;;  %v2746_v18 = vld [vmem:[#allocation5 + $0x40] sm:$0xff]  ;;  %v245_v61 = vld [vmem:[#allocation8 + $0xf0] sm:$0xff]  ;;  %v242_v2 = vld [vmem:[#allocation8 + $0xd8] sm:$0xff] }
  0x2f   :  { %288 = vmatpush.msra.mxu0 %v239_v9  ;;  %2216 = vmatpush.msra.mxu1 %v239_v9  ;;  %v2748_v19 = vld [vmem:[#allocation5 + $0x60] sm:$0xff]  ;;  %v241_v1 = vld [vmem:[#allocation8 + $0xd0] sm:$0xff]  ;;  %v236_v4 = vld [vmem:[#allocation8 + $0xa8] sm:$0xff] }
  0x30   :  { %2217 = vmatpush.msra.mxu2 %v239_v9  ;;  %2218 = vmatpush.msra.mxu3 %v239_v9  ;;  %v211_v23 = vld [vmem:[#allocation7 + $0x1e0] sm:$0xff]  ;;  %v237_v5 = vld [vmem:[#allocation8 + $0xb0] sm:$0xff]  ;;  %v238_v6 = vld [vmem:[#allocation8 + $0xb8] sm:$0xff] }
  0x31   :  { %289 = vmatpush.msra.mxu0 %v235_v10  ;;  %2219 = vmatpush.msra.mxu1 %v235_v10  ;;  %v207_v27 = vld [vmem:[#allocation7 + $0x1c0] sm:$0xff]  ;;  %v232_v8 = vld [vmem:[#allocation8 + $0x88] sm:$0xff]  ;;  %v233_v9 = vld [vmem:[#allocation8 + $0x90] sm:$0xff] }
  0x32   :  { %2220 = vmatpush.msra.mxu2 %v235_v10  ;;  %2221 = vmatpush.msra.mxu3 %v235_v10  ;;  %v203_v31 = vld [vmem:[#allocation7 + $0x1a0] sm:$0xff]  ;;  %v234_v10 = vld [vmem:[#allocation8 + $0x98] sm:$0xff] }
  0x33   :  { %290 = vmatpush.msra.mxu0 %v231_v11  ;;  %2222 = vmatpush.msra.mxu1 %v231_v11  ;;  %v199_v35 = vld [vmem:[#allocation7 + $0x180] sm:$0xff] }
  0x34   :  { %2223 = vmatpush.msra.mxu2 %v231_v11  ;;  %2224 = vmatpush.msra.mxu3 %v231_v11  ;;  %v195_v43 = vld [vmem:[#allocation7 + $0x160] sm:$0xff] }
  0x35   :  { %291 = vmatpush.msra.mxu0 %v227_v12  ;;  %2225 = vmatpush.msra.mxu1 %v227_v12  ;;  %v191_v47 = vld [vmem:[#allocation7 + $0x140] sm:$0xff] }
  0x36   :  { %2226 = vmatpush.msra.mxu2 %v227_v12  ;;  %2227 = vmatpush.msra.mxu3 %v227_v12  ;;  %v187_v51 = vld [vmem:[#allocation7 + $0x120] sm:$0xff]  ;;  %v2778_v12 = vld [vmem:[#allocation5 + $0x18] sm:$0xff] }
  0x37   :  { %292 = vmatpush.msra.mxu0 %v223_v13  ;;  %2228 = vmatpush.msra.mxu1 %v223_v13  ;;  %v183_v55 = vld [vmem:[#allocation7 + $0x100] sm:$0xff] }
  0x38   :  { %2229 = vmatpush.msra.mxu2 %v223_v13  ;;  %2230 = vmatpush.msra.mxu3 %v223_v13  ;;  %v179_v63 = vld [vmem:[#allocation7 + $0xe0] sm:$0xff]  ;;  %v2780_v13 = vld [vmem:[#allocation5 + $0x38] sm:$0xff] }
  0x39   :  { %293 = vmatpush.msra.mxu0 %v219_v14  ;;  %2231 = vmatpush.msra.mxu1 %v219_v14  ;;  %v175_v3 = vld [vmem:[#allocation7 + $0xc0] sm:$0xff] }
  0x3a   :  { %2232 = vmatpush.msra.mxu2 %v219_v14  ;;  %2233 = vmatpush.msra.mxu3 %v219_v14  ;;  %v171_v7 = vld [vmem:[#allocation7 + $0xa0] sm:$0xff]  ;;  %v2782_v14 = vld [vmem:[#allocation5 + $0x58] sm:$0xff] }
  0x3b   :  { %294 = vmatpush.msra.mxu0 %v215_v15  ;;  %2234 = vmatpush.msra.mxu1 %v215_v15  ;;  %v167_v11 = vld [vmem:[#allocation7 + $0x80] sm:$0xff] }
  0x3c   :  { %2235 = vmatpush.msra.mxu2 %v215_v15  ;;  %2236 = vmatpush.msra.mxu3 %v215_v15  ;;  %v2784_v15 = vld [vmem:[#allocation5 + $0x78] sm:$0xff] }
  0x3d   :  { %295 = vmatmul.f32.vlgmr.msra.gmra.mxu0 %v2742_v16  ;;  %307 = vmatmul.f32.vlgmr.msra.gmra.mxu1 %v2744_v17 }
  0x3e   :  { %319 = vmatmul.f32.vlgmr.msra.gmra.mxu2 %v2746_v18  ;;  %331 = vmatmul.f32.vlgmr.msra.gmra.mxu3 %v2748_v19 }
  0x3f   :  { %344 = vmatpush.msrb.mxu1 %v276_v20  ;;  %409 = vmatpush.msrb.mxu2 %v277_v21  ;;  %v228_v20 = vld [vmem:[#allocation8 + $0x68] sm:$0xff]  ;;  %v229_v21 = vld [vmem:[#allocation8 + $0x70] sm:$0xff] }
  0x40   :  { %474 = vmatpush.msrb.mxu3 %v278_v22  ;;  %539 = vmatpush.msrb.mxu0 %v211_v23  ;;  %v230_v22 = vld [vmem:[#allocation8 + $0x78] sm:$0xff]  ;;  %v163_v23 = vld [vmem:[#allocation7 + $0x60] sm:$0xff] }
  0x41   :  { %345 = vmatpush.msrb.mxu1 %v272_v24  ;;  %410 = vmatpush.msrb.mxu2 %v273_v25  ;;  %v224_v24 = vld [vmem:[#allocation8 + $0x48] sm:$0xff]  ;;  %v225_v25 = vld [vmem:[#allocation8 + $0x50] sm:$0xff] }
  0x42   :  { %475 = vmatpush.msrb.mxu3 %v274_v26  ;;  %540 = vmatpush.msrb.mxu0 %v207_v27  ;;  %v226_v26 = vld [vmem:[#allocation8 + $0x58] sm:$0xff]  ;;  %v159_v27 = vld [vmem:[#allocation7 + $0x40] sm:$0xff] }
  0x43   :  { %346 = vmatpush.msrb.mxu1 %v268_v28  ;;  %411 = vmatpush.msrb.mxu2 %v269_v29  ;;  %v220_v28 = vld [vmem:[#allocation8 + $0x28] sm:$0xff]  ;;  %v221_v29 = vld [vmem:[#allocation8 + $0x30] sm:$0xff] }
  0x44   :  { %476 = vmatpush.msrb.mxu3 %v270_v30  ;;  %541 = vmatpush.msrb.mxu0 %v203_v31  ;;  %v222_v30 = vld [vmem:[#allocation8 + $0x38] sm:$0xff]  ;;  %v155_v31 = vld [vmem:[#allocation7 + $0x20] sm:$0xff] }
  0x45   :  { %347 = vmatpush.msrb.mxu1 %v264_v32  ;;  %412 = vmatpush.msrb.mxu2 %v265_v33  ;;  %v216_v32 = vld [vmem:[#allocation8 + $0x8] sm:$0xff]  ;;  %v217_v33 = vld [vmem:[#allocation8 + $0x10] sm:$0xff] }
  0x46   :  { %477 = vmatpush.msrb.mxu3 %v266_v34  ;;  %542 = vmatpush.msrb.mxu0 %v199_v35  ;;  %v218_v34 = vld [vmem:[#allocation8 + $0x18] sm:$0xff]  ;;  %v151_v35 = vld [vmem:[#allocation7] sm:$0xff] }
  0x47   :  { %298 = vmatmul.f32.gmra.mxu0 %v2754_v36  ;;  %310 = vmatmul.f32.gmra.mxu1 %v2756_v37 }
  0x48   :  { %322 = vmatmul.f32.gmra.mxu2 %v2758_v38  ;;  %334 = vmatmul.f32.gmra.mxu3 %v2760_v39 }
  0x49   :  { %348 = vmatpush.msrb.mxu1 %v260_v40  ;;  %413 = vmatpush.msrb.mxu2 %v261_v41  ;;  %v2790_v40 = vld [vmem:[#allocation2] sm:$0xff]  ;;  %v212_v41 = vld [vmem:[#allocation7 + $0x1e8] sm:$0xff] }
  0x4a   :  { %478 = vmatpush.msrb.mxu3 %v262_v42  ;;  %543 = vmatpush.msrb.mxu0 %v195_v43  ;;  %v214_v42 = vld [vmem:[#allocation7 + $0x1f8] sm:$0xff]  ;;  %v213_v43 = vld [vmem:[#allocation7 + $0x1f0] sm:$0xff] }
  0x4b   :  { %349 = vmatpush.msrb.mxu1 %v256_v44  ;;  %414 = vmatpush.msrb.mxu2 %v257_v45  ;;  %v208_v44 = vld [vmem:[#allocation7 + $0x1c8] sm:$0xff]  ;;  %v210_v45 = vld [vmem:[#allocation7 + $0x1d8] sm:$0xff] }
  0x4c   :  { %479 = vmatpush.msrb.mxu3 %v258_v46  ;;  %544 = vmatpush.msrb.mxu0 %v191_v47  ;;  %v209_v46 = vld [vmem:[#allocation7 + $0x1d0] sm:$0xff]  ;;  %v204_v47 = vld [vmem:[#allocation7 + $0x1a8] sm:$0xff] }
  0x4d   :  { %350 = vmatpush.msrb.mxu1 %v252_v48  ;;  %415 = vmatpush.msrb.mxu2 %v253_v49  ;;  %v206_v48 = vld [vmem:[#allocation7 + $0x1b8] sm:$0xff]  ;;  %v205_v49 = vld [vmem:[#allocation7 + $0x1b0] sm:$0xff] }
  0x4e   :  { %480 = vmatpush.msrb.mxu3 %v254_v50  ;;  %545 = vmatpush.msrb.mxu0 %v187_v51  ;;  %v2796_v50 = vld [vmem:[#allocation2 + $0x8] sm:$0xff] }
  0x4f   :  { %351 = vmatpush.msrb.mxu1 %v248_v52  ;;  %416 = vmatpush.msrb.mxu2 %v249_v53  ;;  %v200_v51 = vld [vmem:[#allocation7 + $0x188] sm:$0xff]  ;;  %v201_v52 = vld [vmem:[#allocation7 + $0x190] sm:$0xff] }
  0x50   :  { %481 = vmatpush.msrb.mxu3 %v250_v54  ;;  %546 = vmatpush.msrb.mxu0 %v183_v55  ;;  %v196_v53 = vld [vmem:[#allocation7 + $0x168] sm:$0xff]  ;;  %v198_v54 = vld [vmem:[#allocation7 + $0x178] sm:$0xff]  ;;  %v197_v55 = vld [vmem:[#allocation7 + $0x170] sm:$0xff] }
  0x51   :  { %301 = vmatmul.f32.gmra.mxu0 %v2766_v56  ;;  %313 = vmatmul.f32.gmra.mxu1 %v2768_v57 }
  0x52   :  { %325 = vmatmul.f32.gmra.mxu2 %v2770_v58  ;;  %337 = vmatmul.f32.gmra.mxu3 %v2772_v59 }
  0x53   :  { %352 = vmatpush.msrb.mxu1 %v244_v60  ;;  %417 = vmatpush.msrb.mxu2 %v245_v61  ;;  %v192_v60 = vld [vmem:[#allocation7 + $0x148] sm:$0xff]  ;;  %v2802_v61 = vld [vmem:[#allocation2 + $0x10] sm:$0xff] }
  0x54   :  { %482 = vmatpush.msrb.mxu3 %v246_v62  ;;  %547 = vmatpush.msrb.mxu0 %v179_v63  ;;  %v194_v62 = vld [vmem:[#allocation7 + $0x158] sm:$0xff]  ;;  %v193_v63 = vld [vmem:[#allocation7 + $0x150] sm:$0xff] }
  0x55   :  { %353 = vmatpush.msrb.mxu1 %v240_v0  ;;  %418 = vmatpush.msrb.mxu2 %v241_v1  ;;  %v2808_v0 = vld [vmem:[#allocation2 + $0x18] sm:$0xff]  ;;  %v184_v1 = vld [vmem:[#allocation7 + $0x108] sm:$0xff] }
  0x56   :  { %483 = vmatpush.msrb.mxu3 %v242_v2  ;;  %548 = vmatpush.msrb.mxu0 %v175_v3  ;;  %v189_v2 = vld [vmem:[#allocation7 + $0x130] sm:$0xff]  ;;  %v2814_v3 = vld [vmem:[#allocation2 + $0x20] sm:$0xff] }
  0x57   :  { %354 = vmatpush.msrb.mxu1 %v236_v4  ;;  %419 = vmatpush.msrb.mxu2 %v237_v5  ;;  %v180_v4 = vld [vmem:[#allocation7 + $0xe8] sm:$0xff]  ;;  %v186_v5 = vld [vmem:[#allocation7 + $0x118] sm:$0xff] }
  0x58   :  { %484 = vmatpush.msrb.mxu3 %v238_v6  ;;  %549 = vmatpush.msrb.mxu0 %v171_v7  ;;  %v185_v6 = vld [vmem:[#allocation7 + $0x110] sm:$0xff]  ;;  %v2820_v7 = vld [vmem:[#allocation2 + $0x28] sm:$0xff] }
  0x59   :  { %355 = vmatpush.msrb.mxu1 %v232_v8  ;;  %420 = vmatpush.msrb.mxu2 %v233_v9  ;;  %v176_v8 = vld [vmem:[#allocation7 + $0xc8] sm:$0xff]  ;;  %v181_v9 = vld [vmem:[#allocation7 + $0xf0] sm:$0xff] }
  0x5a   :  { %485 = vmatpush.msrb.mxu3 %v234_v10  ;;  %550 = vmatpush.msrb.mxu0 %v167_v11  ;;  %v2826_v10 = vld [vmem:[#allocation2 + $0x30] sm:$0xff]  ;;  %v172_v11 = vld [vmem:[#allocation7 + $0xa8] sm:$0xff] }
  0x5b   :  { %304 = vmatmul.f32.gmra.mxu0 %v2778_v12  ;;  %316 = vmatmul.f32.gmra.mxu1 %v2780_v13 }
  0x5c   :  { %328 = vmatmul.f32.gmra.mxu2 %v2782_v14  ;;  %340 = vmatmul.f32.gmra.mxu3 %v2784_v15 }
  0x5d   :  { %356 = vmatpush.msrb.mxu1 %v228_v20  ;;  %421 = vmatpush.msrb.mxu2 %v229_v21  ;;  %v2832_v20 = vld [vmem:[#allocation2 + $0x38] sm:$0xff]  ;;  %v168_v21 = vld [vmem:[#allocation7 + $0x88] sm:$0xff] }
  0x5e   :  { %486 = vmatpush.msrb.mxu3 %v230_v22  ;;  %551 = vmatpush.msrb.mxu0 %v163_v23  ;;  %v173_v22 = vld [vmem:[#allocation7 + $0xb0] sm:$0xff]  ;;  %v2838_v23 = vld [vmem:[#allocation2 + $0x40] sm:$0xff] }
  0x5f   :  { %357 = vmatpush.msrb.mxu1 %v224_v24  ;;  %422 = vmatpush.msrb.mxu2 %v225_v25  ;;  %v164_v24 = vld [vmem:[#allocation7 + $0x68] sm:$0xff]  ;;  %v169_v25 = vld [vmem:[#allocation7 + $0x90] sm:$0xff] }
  0x60   :  { %487 = vmatpush.msrb.mxu3 %v226_v26  ;;  %552 = vmatpush.msrb.mxu0 %v159_v27  ;;  %v2844_v26 = vld [vmem:[#allocation2 + $0x48] sm:$0xff] }
  0x61   :  { %358 = vmatpush.msrb.mxu1 %v220_v28  ;;  %423 = vmatpush.msrb.mxu2 %v221_v29  ;;  %v160_v27 = vld [vmem:[#allocation7 + $0x48] sm:$0xff]  ;;  %v165_v28 = vld [vmem:[#allocation7 + $0x70] sm:$0xff] }
  0x62   :  { %488 = vmatpush.msrb.mxu3 %v222_v30  ;;  %553 = vmatpush.msrb.mxu0 %v155_v31  ;;  %v2850_v29 = vld [vmem:[#allocation2 + $0x50] sm:$0xff]  ;;  %v156_v30 = vld [vmem:[#allocation7 + $0x28] sm:$0xff] }
  0x63   :  { %359 = vmatpush.msrb.mxu1 %v216_v32  ;;  %424 = vmatpush.msrb.mxu2 %v217_v33  ;;  %v161_v31 = vld [vmem:[#allocation7 + $0x50] sm:$0xff]  ;;  %v2858_v33 = vld [vmem:[#allocation2 + $0x58] sm:$0xff] }
  0x64   :  { %489 = vmatpush.msrb.mxu3 %v218_v34  ;;  %554 = vmatpush.msrb.mxu0 %v151_v35 }
  0x65   :  { %360 = vmatmul.f32.vlgmr.msrb.gmra.mxu1 %v2742_v16  ;;  %425 = vmatmul.f32.vlgmr.msrb.gmra.mxu2 %v2742_v16 }
  0x66   :  { %490 = vmatmul.f32.vlgmr.msrb.gmra.mxu3 %v2742_v16  ;;  %555 = vmatmul.f32.vlgmr.msrb.gmra.mxu0 %v2790_v40  ;;  %v202_v16 = vld [vmem:[#allocation7 + $0x198] sm:$0xff] }
  0x67   :  { %604 = vmatpush.msra.mxu1 %v212_v41  ;;  %734 = vmatpush.msra.mxu3 %v214_v42  ;;  %v157_v42 = vld [vmem:[#allocation7 + $0x30] sm:$0xff] }
  0x68   :  { %669 = vmatpush.msra.mxu2 %v213_v43  ;;  %v158_v43 = vld [vmem:[#allocation7 + $0x38] sm:$0xff] }
  0x69   :  { %605 = vmatpush.msra.mxu1 %v208_v44  ;;  %735 = vmatpush.msra.mxu3 %v210_v45  ;;  %v2870_v44 = vld [vmem:[#allocation2 + $0x60] sm:$0xff] }
  0x6a   :  { %670 = vmatpush.msra.mxu2 %v209_v46  ;;  %v153_v46 = vld [vmem:[#allocation7 + $0x10] sm:$0xff] }
  0x6b   :  { %606 = vmatpush.msra.mxu1 %v204_v47  ;;  %736 = vmatpush.msra.mxu3 %v206_v48  ;;  %v154_v47 = vld [vmem:[#allocation7 + $0x18] sm:$0xff]  ;;  %v2880_v48 = vld [vmem:[#allocation2 + $0x68] sm:$0xff] }
  0x6c   :  { %671 = vmatpush.msra.mxu2 %v205_v49 }
  0x6d   :  { %363 = vmatmul.f32.gmra.mxu1 %v2754_v36  ;;  %428 = vmatmul.f32.gmra.mxu2 %v2754_v36 }
  0x6e   :  { %493 = vmatmul.f32.gmra.mxu3 %v2754_v36  ;;  %558 = vmatmul.f32.gmra.mxu0 %v2796_v50  ;;  %v188_v36 = vld [vmem:[#allocation7 + $0x128] sm:$0xff] }
  0x6f   :  { %607 = vmatpush.msra.mxu1 %v200_v51  ;;  %737 = vmatpush.msra.mxu3 %v202_v16 }
  0x70   :  { %672 = vmatpush.msra.mxu2 %v201_v52  ;;  %v2894_v52 = vld [vmem:[#allocation2 + $0x70] sm:$0xff] }
  0x71   :  { %608 = vmatpush.msra.mxu1 %v196_v53  ;;  %738 = vmatpush.msra.mxu3 %v198_v54 }
  0x72   :  { %673 = vmatpush.msra.mxu2 %v197_v55 }
  0x73   :  { %609 = vmatpush.msra.mxu1 %v192_v60  ;;  %739 = vmatpush.msra.mxu3 %v194_v62  ;;  %v2908_v60 = vld [vmem:[#allocation2 + $0x78] sm:$0xff] }
  0x74   :  { %674 = vmatpush.msra.mxu2 %v193_v63 }
  0x75   :  { %366 = vmatmul.f32.gmra.mxu1 %v2766_v56  ;;  %431 = vmatmul.f32.gmra.mxu2 %v2766_v56 }
  0x76   :  { %496 = vmatmul.f32.gmra.mxu3 %v2766_v56  ;;  %561 = vmatmul.f32.gmra.mxu0 %v2802_v61  ;;  %v190_v56 = vld [vmem:[#allocation7 + $0x138] sm:$0xff] }
  0x77   :  { %610 = vmatpush.msra.mxu1 %v188_v36  ;;  %740 = vmatpush.msra.mxu3 %v190_v56 }
  0x78   :  { %675 = vmatpush.msra.mxu2 %v189_v2 }
  0x79   :  { %611 = vmatpush.msra.mxu1 %v184_v1  ;;  %741 = vmatpush.msra.mxu3 %v186_v5 }
  0x7a   :  { %676 = vmatpush.msra.mxu2 %v185_v6 }
  0x7b   :  { %612 = vmatpush.msra.mxu1 %v180_v4 }
  0x7c   :  { %677 = vmatpush.msra.mxu2 %v181_v9 }
  0x7d   :  { %369 = vmatmul.f32.gmra.mxu1 %v2778_v12  ;;  %434 = vmatmul.f32.gmra.mxu2 %v2778_v12 }
  0x7e   :  { %499 = vmatmul.f32.gmra.mxu3 %v2778_v12  ;;  %564 = vmatmul.f32.gmra.mxu0 %v2808_v0  ;;  %v177_v12 = vld [vmem:[#allocation7 + $0xd0] sm:$0xff] }
  0x7f   :  { %613 = vmatpush.msra.mxu1 %v176_v8  ;;  %678 = vmatpush.msra.mxu2 %v177_v12 }
  0x81   :  { %614 = vmatpush.msra.mxu1 %v172_v11  ;;  %679 = vmatpush.msra.mxu2 %v173_v22  ;;  %v1624_v11 = vld [vmem:[#allocation11 + $0x78] sm:$0xff] }
  0x82   :  { %1629 = vmatpush.msra.mxu0 %v1624_v11 }
  0x83   :  { %615 = vmatpush.msra.mxu1 %v168_v21  ;;  %680 = vmatpush.msra.mxu2 %v169_v25  ;;  %v1622_v25 = vld [vmem:[#allocation11 + $0x68] sm:$0xff] }
  0x85   :  { %372 = vmatmul.f32.gmra.mxu1 %v2744_v17  ;;  %437 = vmatmul.f32.gmra.mxu2 %v2744_v17 }
  0x86   :  { %502 = vmatmul.f32.gmra.mxu3 %v2744_v17  ;;  %567 = vmatmul.f32.gmra.mxu0 %v2814_v3  ;;  %v182_v17 = vld [vmem:[#allocation7 + $0xf8] sm:$0xff] }
  0x87   :  { %742 = vmatpush.msra.mxu3 %v182_v17  ;;  %616 = vmatpush.msra.mxu1 %v164_v24 }
  0x88   :  { %681 = vmatpush.msra.mxu2 %v165_v28 }
  0x89   :  { %617 = vmatpush.msra.mxu1 %v160_v27 }
  0x8a   :  { %682 = vmatpush.msra.mxu2 %v161_v31 }
  0x8b   :  { %618 = vmatpush.msra.mxu1 %v156_v30  ;;  %v1621_v30 = vld [vmem:[#allocation11 + $0x60] sm:$0xff] }
  0x8c   :  { %683 = vmatpush.msra.mxu2 %v157_v42 }
  0x8d   :  { %375 = vmatmul.f32.gmra.mxu1 %v2756_v37  ;;  %440 = vmatmul.f32.gmra.mxu2 %v2756_v37 }
  0x8e   :  { %505 = vmatmul.f32.gmra.mxu3 %v2756_v37  ;;  %570 = vmatmul.f32.gmra.mxu0 %v2820_v7  ;;  %v178_v37 = vld [vmem:[#allocation7 + $0xd8] sm:$0xff] }
  0x8f   :  { %743 = vmatpush.msra.mxu3 %v178_v37  ;;  %684 = vmatpush.msra.mxu2 %v153_v46 }
  0x95   :  { %378 = vmatmul.f32.gmra.mxu1 %v2768_v57  ;;  %443 = vmatmul.f32.gmra.mxu2 %v2768_v57 }
  0x96   :  { %508 = vmatmul.f32.gmra.mxu3 %v2768_v57  ;;  %573 = vmatmul.f32.gmra.mxu0 %v2826_v10  ;;  %v174_v57 = vld [vmem:[#allocation7 + $0xb8] sm:$0xff] }
  0x97   :  { %744 = vmatpush.msra.mxu3 %v174_v57  ;;  %v1623_v57 = vld [vmem:[#allocation11 + $0x70] sm:$0xff] }
  0x98   :  { %1630 = vmatpush.msra.mxu0 %v1623_v57 }
  0x9a   :  { %1631 = vmatpush.msra.mxu0 %v1622_v25 }
  0x9c   :  { %1632 = vmatpush.msra.mxu0 %v1621_v30 }
  0x9d   :  { %381 = vmatmul.f32.gmra.mxu1 %v2780_v13  ;;  %446 = vmatmul.f32.gmra.mxu2 %v2780_v13 }
  0x9e   :  { %511 = vmatmul.f32.gmra.mxu3 %v2780_v13  ;;  %576 = vmatmul.f32.gmra.mxu0 %v2832_v20  ;;  %v170_v13 = vld [vmem:[#allocation7 + $0x98] sm:$0xff] }
  0x9f   :  { %745 = vmatpush.msra.mxu3 %v170_v13 }
  0xa5   :  { %384 = vmatmul.f32.gmra.mxu1 %v2746_v18  ;;  %449 = vmatmul.f32.gmra.mxu2 %v2746_v18 }
  0xa6   :  { %514 = vmatmul.f32.gmra.mxu3 %v2746_v18  ;;  %579 = vmatmul.f32.gmra.mxu0 %v2838_v23  ;;  %v166_v18 = vld [vmem:[#allocation7 + $0x78] sm:$0xff] }
  0xa7   :  { %746 = vmatpush.msra.mxu3 %v166_v18 }
  0xad   :  { %387 = vmatmul.f32.gmra.mxu1 %v2758_v38  ;;  %452 = vmatmul.f32.gmra.mxu2 %v2758_v38 }
  0xae   :  { %517 = vmatmul.f32.gmra.mxu3 %v2758_v38  ;;  %582 = vmatmul.f32.gmra.mxu0 %v2844_v26  ;;  %v162_v38 = vld [vmem:[#allocation7 + $0x58] sm:$0xff] }
  0xaf   :  { %747 = vmatpush.msra.mxu3 %v162_v38  ;;  %v2985_v38 = vld [vmem:[#allocation10] sm:$0xf] }
  0xb0   :  { %v2994_v42 = vperm.slane %v2985_v38, 0 }
  0xb1   :  { %748 = vmatpush.msra.mxu3 %v158_v43 }
  0xb3   :  { %749 = vmatpush.msra.mxu3 %v154_v47  ;;  %v1620_v47 = vld [vmem:[#allocation11 + $0x58] sm:$0xff] }
  0xb4   :  { %1633 = vmatpush.msra.mxu0 %v1620_v47  ;;  %v1619_v47 = vld [vmem:[#allocation11 + $0x50] sm:$0xff] }
  0xb5   :  { %390 = vmatmul.f32.gmra.mxu1 %v2770_v58  ;;  %455 = vmatmul.f32.gmra.mxu2 %v2770_v58 }
  0xb6   :  { %520 = vmatmul.f32.gmra.mxu3 %v2770_v58  ;;  %585 = vmatmul.f32.gmra.mxu0 %v2850_v29  ;;  %v152_v58 = vld [vmem:[#allocation7 + $0x8] sm:$0xff] }
  0xb7   :  { %619 = vmatpush.msra.mxu1 %v152_v58  ;;  %1634 = vmatpush.msra.mxu0 %v1619_v47  ;;  %v1618_v47 = vld [vmem:[#allocation11 + $0x48] sm:$0xff] }
  0xb9   :  { %1635 = vmatpush.msra.mxu0 %v1618_v47 }
  0xba   :  { %v2856_v32 = vpop.f32.mrf.mxu1  ;;  %v2860_v34 = vpop.f32.mrf.mxu0 }
  0xbd   :  { %393 = vmatmul.f32.gmra.mxu1 %v2782_v14  ;;  %458 = vmatmul.f32.gmra.mxu2 %v2782_v14 }
  0xbe   :  { %523 = vmatmul.f32.gmra.mxu3 %v2782_v14  ;;  %588 = vmatmul.f32.gmra.mxu0 %v2858_v33 }
  0xc1   :  { %v2866_v35 = vpop.f32.mrf.mxu2  ;;  %v2868_v41 = vpop.f32.mrf.mxu3 }
  0xc4   :  { %v2872_v45 = vpop.f32.mrf.mxu1  ;;  %v2876_v14 = vpop.f32.mrf.mxu0 }
  0xc5   :  { %396 = vmatmul.f32.gmra.mxu1 %v2748_v19  ;;  %461 = vmatmul.f32.gmra.mxu2 %v2748_v19 }
  0xc6   :  { %526 = vmatmul.f32.gmra.mxu3 %v2748_v19  ;;  %591 = vmatmul.f32.gmra.mxu0 %v2870_v44 }
  0xcb   :  { %v2882_v49 = vpop.f32.mrf.mxu2  ;;  %v2884_v51 = vpop.f32.mrf.mxu3 }
  0xcd   :  { %399 = vmatmul.f32.gmra.mxu1 %v2760_v39  ;;  %464 = vmatmul.f32.gmra.mxu2 %v2760_v39 }
  0xce   :  { %529 = vmatmul.f32.gmra.mxu3 %v2760_v39  ;;  %594 = vmatmul.f32.gmra.mxu0 %v2880_v48  ;;  %v2890_v16 = vpop.f32.mrf.mxu1  ;;  %v2892_v19 = vpop.f32.mrf.mxu0 }
  0xd5   :  { %402 = vmatmul.f32.gmra.mxu1 %v2772_v59  ;;  %467 = vmatmul.f32.gmra.mxu2 %v2772_v59  ;;  %v2898_v53 = vpop.f32.mrf.mxu2  ;;  %v2900_v54 = vpop.f32.mrf.mxu3 }
  0xd6   :  { %532 = vmatmul.f32.gmra.mxu3 %v2772_v59  ;;  %597 = vmatmul.f32.gmra.mxu0 %v2894_v52 }
  0xd8   :  { %v2904_v39 = vpop.f32.mrf.mxu1  ;;  %v2906_v55 = vpop.f32.mrf.mxu0 }
  0xdd   :  { %405 = vmatmul.f32.gmra.mxu1 %v2784_v15  ;;  %470 = vmatmul.f32.gmra.mxu2 %v2784_v15 }
  0xde   :  { %535 = vmatmul.f32.gmra.mxu3 %v2784_v15  ;;  %600 = vmatmul.f32.gmra.mxu0 %v2908_v60 }
  0xdf   :  { %v2914_v36 = vpop.f32.mrf.mxu2  ;;  %v2916_v62 = vpop.f32.mrf.mxu3 }
  0xe2   :  { %v2918_v59 = vpop.f32.mrf.mxu1 }
  0xe3   :  { %v2920_v63 = vpop.f32.mrf.mxu0 }
  0xe4   :  { %v557_v11 = vadd.f32 %v2920_v63, %v2860_v34 }
  0xe5   :  { %620 = vmatmul.f32.vlgmr.msra.gmra.mxu1 %v2790_v40  ;;  %685 = vmatmul.f32.vlgmr.msra.gmra.mxu2 %v2790_v40 }
  0xe6   :  { %750 = vmatmul.f32.vlgmr.msra.gmra.mxu3 %v2790_v40 }
  0xe8   :  { %v2925_v1 = vpop.f32.mrf.mxu2 }
  0xe9   :  { %v2927_v56 = vpop.f32.mrf.mxu3 }
  0xea   :  { %v2929_v15 = vpop.f32.mrf.mxu1 }
  0xeb   :  { %v2931_v2 = vpop.f32.mrf.mxu0 }
  0xec   :  { %v560_v34 = vadd.f32 %v2931_v2, %v2876_v14 }
  0xed   :  { %623 = vmatmul.f32.gmra.mxu1 %v2796_v50  ;;  %688 = vmatmul.f32.gmra.mxu2 %v2796_v50 }
  0xee   :  { %753 = vmatmul.f32.gmra.mxu3 %v2796_v50 }
  0xf0   :  { %v2936_v4 = vpop.f32.mrf.mxu2 }
  0xf1   :  { %v2938_v5 = vpop.f32.mrf.mxu3 }
  0xf2   :  { %v2940_v6 = vpop.f32.mrf.mxu1 }
  0xf3   :  { %v2942_v40 = vpop.f32.mrf.mxu0 }
  0xf5   :  { %626 = vmatmul.f32.gmra.mxu1 %v2802_v61  ;;  %691 = vmatmul.f32.gmra.mxu2 %v2802_v61 }
  0xf6   :  { %756 = vmatmul.f32.gmra.mxu3 %v2802_v61 }
  0xf8   :  { %v2947_v8 = vpop.f32.mrf.mxu2 }
  0xf9   :  { %v2949_v17 = vpop.f32.mrf.mxu3 }
  0xfa   :  { %v2951_v9 = vpop.f32.mrf.mxu1 }
  0xfb   :  { %v2953_v50 = vpop.f32.mrf.mxu0 }
  0xfd   :  { %629 = vmatmul.f32.gmra.mxu1 %v2808_v0  ;;  %694 = vmatmul.f32.gmra.mxu2 %v2808_v0 }
  0xfe   :  { %759 = vmatmul.f32.gmra.mxu3 %v2808_v0 }
 0x100   :  { %v2958_v37 = vpop.f32.mrf.mxu2 }
 0x101   :  { %v2960_v12 = vpop.f32.mrf.mxu3 }
 0x102   :  { %v2962_v61 = vpop.f32.mrf.mxu1 }
 0x103   :  { %v568_v21 = vpop.f32.mrf.mxu0 }
 0x104   :  { %v569_v43 = vadd.f32 %v568_v21, %v2856_v32 }
 0x105   :  { %632 = vmatmul.f32.gmra.mxu1 %v2814_v3  ;;  %697 = vmatmul.f32.gmra.mxu2 %v2814_v3 }
 0x106   :  { %762 = vmatmul.f32.gmra.mxu3 %v2814_v3 }
 0x108   :  { %v2967_v22 = vpop.f32.mrf.mxu2 }
 0x109   :  { %v2969_v24 = vpop.f32.mrf.mxu3 }
 0x10a   :  { %v2971_v0 = vpop.f32.mrf.mxu1 }
 0x10b   :  { %v571_v13 = vpop.f32.mrf.mxu0 }
 0x10c   :  { %v572_v25 = vadd.f32 %v571_v13, %v2872_v45 }
 0x10d   :  { %635 = vmatmul.f32.gmra.mxu1 %v2820_v7  ;;  %700 = vmatmul.f32.gmra.mxu2 %v2820_v7 }
 0x10e   :  { %765 = vmatmul.f32.gmra.mxu3 %v2820_v7 }
 0x110   :  { %v2976_v27 = vpop.f32.mrf.mxu2 }
 0x111   :  { %4296 = vst [vmem:[#allocation19_spill] sm:$0xff] %v2976_v27  ;;  %v2978_v18 = vpop.f32.mrf.mxu3 }
 0x112   :  { %v2980_v3 = vpop.f32.mrf.mxu1 }
 0x113   :  { %v574_v28 = vpop.f32.mrf.mxu0 }
 0x115   :  { %638 = vmatmul.f32.gmra.mxu1 %v2826_v10  ;;  %703 = vmatmul.f32.gmra.mxu2 %v2826_v10 }
 0x116   :  { %768 = vmatmul.f32.gmra.mxu3 %v2826_v10  ;;  %v825_v10 = vadd.f32 %v2994_v42, %v569_v43  ;;  %v575_v43 = vadd.f32 %v574_v28, %v2890_v16 }
 0x118   :  { %v2987_v31 = vpop.f32.mrf.mxu2  ;;  %v2114_v21 = vmul.f32 -1.442695, %v825_v10  ;;  %v833_v14 = vadd.f32 %v2994_v42, %v575_v43 }
 0x119   :  { %4297 = vst [vmem:[#allocation20_spill] sm:$0xff] %v2987_v31  ;;  %v2989_v7 = vpop.f32.mrf.mxu3  ;;  %v809_v31 = vadd.f32 %v2994_v42, %v557_v11 }
 0x11a   :  { %4298 = vst [vmem:[#allocation21_spill] sm:$0xff] %v2989_v7  ;;  %v2991_v58 = vpop.f32.mrf.mxu1  ;;  %2251 = vpow2.f32 %v2114_v21 }
 0x11b   :  { %4299 = vst [vmem:[#allocation22_spill] sm:$0xff] %v2991_v58  ;;  %v577_v46 = vpop.f32.mrf.mxu0  ;;  %v2110_v45 = vmul.f32 -1.442695, %v809_v31  ;;  %v563_v31 = vadd.f32 %v2942_v40, %v2892_v19 }
 0x11c   :  { %v578_v28 = vadd.f32 %v577_v46, %v2904_v39  ;;  %v1617_v46 = vld [vmem:[#allocation11 + $0x40] sm:$0xff] }
 0x11d   :  { %641 = vmatmul.f32.gmra.mxu1 %v2832_v20  ;;  %706 = vmatmul.f32.gmra.mxu2 %v2832_v20  ;;  %2253 = vpow2.f32 %v2110_v45  ;;  %v2116_v45 = vmul.f32 -1.442695, %v833_v14  ;;  %v817_v19 = vadd.f32 %v2994_v42, %v563_v31 }
 0x11e   :  { %771 = vmatmul.f32.gmra.mxu3 %v2832_v20  ;;  %v829_v20 = vadd.f32 %v2994_v42, %v572_v25  ;;  %v813_v25 = vadd.f32 %v2994_v42, %v560_v34  ;;  %v566_v34 = vadd.f32 %v2953_v50, %v2906_v55  ;;  %v837_v39 = vadd.f32 %v2994_v42, %v578_v28 }
 0x11f   :  { %1636 = vmatpush.msra.mxu0 %v1617_v46  ;;  %v2112_v14 = vmul.f32 -1.442695, %v817_v19 }
 0x120   :  { %v3003_v57 = vpop.f32.mrf.mxu2  ;;  %v2115_v13 = vmul.f32 -1.442695, %v829_v20  ;;  %v2111_v16 = vmul.f32 -1.442695, %v813_v25  ;;  %v821_v55 = vadd.f32 %v2994_v42, %v566_v34  ;;  %v2117_v25 = vmul.f32 -1.442695, %v837_v39 }
 0x121   :  { %4300 = vst [vmem:[#allocation23_spill] sm:$0xff] %v3003_v57  ;;  %v3006_v30 = vpop.f32.mrf.mxu3 }
 0x122   :  { %4301 = vst [vmem:[#allocation24_spill] sm:$0xff] %v3006_v30  ;;  %v3008_v32 = vpop.f32.mrf.mxu1  ;;  %2255 = vpow2.f32 %v2115_v13  ;;  %v2113_v34 = vmul.f32 -1.442695, %v821_v55 }
 0x123   :  { %4302 = vst [vmem:[#allocation25_spill] sm:$0xff] %v3008_v32  ;;  %v580_v7 = vpop.f32.mrf.mxu0  ;;  %2257 = vpow2.f32 %v2111_v16 }
 0x125   :  { %644 = vmatmul.f32.gmra.mxu1 %v2838_v23  ;;  %709 = vmatmul.f32.gmra.mxu2 %v2838_v23 }
 0x126   :  { %774 = vmatmul.f32.gmra.mxu3 %v2838_v23  ;;  %v2252_v23 = vpop.eup %2251 }
 0x127   :  { %v3032_v21 = vadd.f32 1.0, %v2252_v23  ;;  %v2254_v43 = vpop.eup %2253  ;;  %v581_v23 = vadd.f32 %v580_v7, %v2866_v35  ;;  %v1616_v7 = vld [vmem:[#allocation11 + $0x38] sm:$0xff] }
 0x128   :  { %v3017_v63 = vpop.f32.mrf.mxu2  ;;  %v3045_v40 = vadd.f32 1.0, %v2254_v43  ;;  %1637 = vmatpush.msra.mxu0 %v1616_v7 }
 0x129   :  { %4303 = vst [vmem:[#allocation26_spill] sm:$0xff] %v3017_v63  ;;  %v3020_v10 = vpop.f32.mrf.mxu3  ;;  %2259 = vrcp.f32 %v3032_v21  ;;  %v841_v35 = vadd.f32 %v2994_v42, %v581_v23  ;;  %vm1002_vm1 = vweird.f32 %v3032_v21 }
 0x12a   :  { %4304 = vst [vmem:[#allocation27_spill] sm:$0xff] %v3020_v10  ;;  %v3022_v11 = vpop.f32.mrf.mxu1  ;;  %2261 = vpow2.f32 %v2116_v45  ;;  %vm942_vm7 = vweird.f32 %v3045_v40 }
 0x12b   :  { %4305 = vst [vmem:[#allocation28_spill] sm:$0xff] %v3022_v11  ;;  %v583_v2 = vpop.f32.mrf.mxu0  ;;  %2263 = vrcp.f32 %v3045_v40 }
 0x12c   :  { %v584_v23 = vadd.f32 %v583_v2, %v2882_v49  ;;  %v1615_v2 = vld [vmem:[#allocation11 + $0x30] sm:$0xff] }
 0x12d   :  { %647 = vmatmul.f32.gmra.mxu1 %v2844_v26  ;;  %712 = vmatmul.f32.gmra.mxu2 %v2844_v26 }
 0x12e   :  { %777 = vmatmul.f32.gmra.mxu3 %v2844_v26  ;;  %v2256_v26 = vpop.eup %2255  ;;  %v845_v49 = vadd.f32 %v2994_v42, %v584_v23  ;;  %1638 = vmatpush.msra.mxu0 %v1615_v2 }
 0x12f   :  { %v3050_v50 = vadd.f32 1.0, %v2256_v26  ;;  %v2258_v31 = vpop.eup %2257 }
 0x130   :  { %v3034_v20 = vpop.f32.mrf.mxu2  ;;  %v3059_v43 = vpop.eup %2259  ;;  %v3065_v39 = vadd.f32 1.0, %v2258_v31 }
 0x131   :  { %4306 = vst [vmem:[#allocation29_spill] sm:$0xff] %v3034_v20  ;;  %v3038_v13 = vpop.f32.mrf.mxu3  ;;  %2265 = vrcp.f32 %v3050_v50  ;;  %v998_v19 = vmul.f32 %v3059_v43, %v3032_v21  ;;  %vm1003_vm0 = vweird.f32 %v3059_v43  ;;  %vm1017_vm4 = vweird.f32 %v3050_v50 }
 0x132   :  { %4307 = vst [vmem:[#allocation30_spill] sm:$0xff] %v3038_v13  ;;  %v3040_v47 = vpop.f32.mrf.mxu1  ;;  %2267 = vpow2.f32 %v2117_v25  ;;  %v2118_v25 = vmul.f32 -1.442695, %v841_v35  ;;  %vm3141_vm3 = vmor %vm1002_vm1, %vm1003_vm0  ;;  %vm957_vm13 = vweird.f32 %v3065_v39 }
 0x133   :  { %4308 = vst [vmem:[#allocation31_spill] sm:$0xff] %v3040_v47  ;;  %v586_v16 = vpop.f32.mrf.mxu0  ;;  %2269 = vpow2.f32 %v2112_v14  ;;  %v999_v35 = vsub.f32 1.0, %v998_v19 }
 0x134   :  { %2271 = vpow2.f32 %v2113_v34  ;;  %v587_v31 = vadd.f32 %v586_v16, %v2898_v53 }
 0x135   :  { %650 = vmatmul.f32.gmra.mxu1 %v2850_v29  ;;  %715 = vmatmul.f32.gmra.mxu2 %v2850_v29  ;;  %2273 = vrcp.f32 %v3065_v39  ;;  %v1000_v23 = vmul.f32 %v3059_v43, %v999_v35 }
 0x136   :  { %780 = vmatmul.f32.gmra.mxu3 %v2850_v29  ;;  %v2262_v29 = vpop.eup %2261 }
 0x137   :  { %v3069_v46 = vadd.f32 1.0, %v2262_v29  ;;  %v3074_v55 = vpop.eup %2263  ;;  %v1001_v63 = vadd.f32 %v3059_v43, %v1000_v23 }
 0x138   :  { %v3054_v28 = vpop.f32.mrf.mxu2  ;;  %v3077_v14 = vpop.eup %2265  ;;  %v938_v19 = vmul.f32 %v3074_v55, %v3045_v40  ;;  %vm943_vm8 = vweird.f32 %v3074_v55 }
 0x139   :  { %4309 = vst [vmem:[#allocation32_spill] sm:$0xff] %v3054_v28  ;;  %v3057_v45 = vpop.f32.mrf.mxu3  ;;  %v2268_v7 = vpop.eup %2267  ;;  %2275 = vrcp.f32 %v3069_v46  ;;  %v1013_v53 = vmul.f32 %v3077_v14, %v3050_v50  ;;  %vm1018_vm5 = vweird.f32 %v3077_v14  ;;  %v1038_v47 = vand.u32 2147483648, %v3069_v46  ;;  %vm3190_vm10 = vmor %vm942_vm7, %vm943_vm8 }
 0x13a   :  { %4310 = vst [vmem:[#allocation33_spill] sm:$0xff] %v3057_v45  ;;  %v3062_v26 = vpop.f32.mrf.mxu1  ;;  %2277 = vpow2.f32 %v2118_v25  ;;  %v3091_v16 = vadd.f32 1.0, %v2268_v7  ;;  %v939_v35 = vsub.f32 1.0, %v938_v19  ;;  %vm3178_vm9 = vmor %vm1017_vm4, %vm1018_vm5  ;;  %vm1032_vm11 = vweird.f32 %v3069_v46 }
 0x13b   :  { %4311 = vst [vmem:[#allocation34_spill] sm:$0xff] %v3062_v26  ;;  %v589_v28 = vpop.f32.mrf.mxu0  ;;  %v1014_v2 = vsub.f32 1.0, %v1013_v53  ;;  %v3206_v27 = vor.u32 1.1754944e-38, %v1038_v47 }
 0x13c   :  { %v590_v26 = vadd.f32 %v589_v28, %v2914_v36  ;;  %2279 = vrcp.f32 %v3091_v16 }
 0x13d   :  { %653 = vmatmul.f32.gmra.mxu1 %v2858_v33  ;;  %718 = vmatmul.f32.gmra.mxu2 %v2858_v33  ;;  %v1015_v19 = vmul.f32 %v3077_v14, %v1014_v2 }
 0x13e   :  { %783 = vmatmul.f32.gmra.mxu3 %v2858_v33  ;;  %v2270_v33 = vpop.eup %2269 }
 0x13f   :  { %v2272_v20 = vpop.eup %2271 }
 0x140   :  { %v3080_v34 = vpop.f32.mrf.mxu2  ;;  %v3101_v25 = vadd.f32 1.0, %v2272_v20  ;;  %v3105_v7 = vpop.eup %2273 }
 0x141   :  { %4312 = vst [vmem:[#allocation35_spill] sm:$0xff] %v3080_v34  ;;  %v3083_v29 = vpop.f32.mrf.mxu3  ;;  %v849_v34 = vadd.f32 %v2994_v42, %v587_v31  ;;  %v2119_v31 = vmul.f32 -1.442695, %v845_v49  ;;  %v3108_v36 = vpop.eup %2275  ;;  %v1008_v49 = vand.u32 2147483648, %v3032_v21  ;;  %v953_v23 = vmul.f32 %v3105_v7, %v3065_v39 }
 0x142   :  { %4313 = vst [vmem:[#allocation36_spill] sm:$0xff] %v3083_v29  ;;  %v3086_v45 = vpop.f32.mrf.mxu1  ;;  %v3094_v29 = vadd.f32 1.0, %v2270_v33  ;;  %v1006_v33 = vand.u32 2147483647, %v3032_v21  ;;  %v2278_v13 = vpop.eup %2277  ;;  %v940_v21 = vmul.f32 %v3074_v55, %v939_v35  ;;  %v1023_v35 = vand.u32 2147483648, %v3050_v50 }
 0x143   :  { %4314 = vst [vmem:[#allocation37_spill] sm:$0xff] %v3086_v45  ;;  %v2120_v28 = vmul.f32 -1.442695, %v849_v34  ;;  %v1021_v34 = vand.u32 2147483647, %v3050_v50  ;;  %v592_v2 = vpop.f32.mrf.mxu0  ;;  %vm958_vm14 = vweird.f32 %v3105_v7  ;;  %vm1033_vm0 = vweird.f32 %v3108_v36 }
 0x144   :  { %2281 = vrcp.f32 %v3094_v29  ;;  %vm3125_vm2 = vcmp.eq.f32.partialorder %v1006_v33, 8.507059e+37  ;;  %v3146_v33 = vpop.eup %2279  ;;  %v593_v57 = vadd.f32 %v592_v2, %v2868_v41  ;;  %v946_v50 = vand.u32 2147483647, %v3045_v40  ;;  %vm3253_vm1 = vmor %vm957_vm13, %vm958_vm14 }
 0x145   :  { %656 = vmatmul.f32.gmra.mxu1 %v2870_v44  ;;  %721 = vmatmul.f32.gmra.mxu2 %v2870_v44  ;;  %2283 = vrcp.f32 %v3101_v25  ;;  %vm3153_vm6 = vcmp.eq.f32.partialorder %v1021_v34, 8.507059e+37  ;;  %v954_v34 = vsub.f32 1.0, %v953_v23  ;;  %v1043_v23 = vmul.f32 %v3146_v33, %v3091_v16 }
 0x146   :  { %786 = vmatmul.f32.gmra.mxu3 %v2870_v44  ;;  %v853_v44 = vadd.f32 %v2994_v42, %v590_v26  ;;  %2285 = vpow2.f32 %v2119_v31  ;;  %v1036_v2 = vand.u32 2147483647, %v3069_v46  ;;  %vm3223_vm12 = vcmp.eq.f32.partialorder %v946_v50, 8.507059e+37 }
 0x147   :  { %2287 = vpow2.f32 %v2120_v28  ;;  %v1005_v28 = vsel %vm3141_vm3, %v3059_v43, %v1001_v63  ;;  %v948_v43 = vand.u32 2147483648, %v3045_v40  ;;  %v955_v26 = vmul.f32 %v3105_v7, %v954_v34  ;;  %vm3276_vm3 = vmor %vm1032_vm11, %vm1033_vm0 }
 0x148   :  { %v3111_v45 = vpop.f32.mrf.mxu2  ;;  %v2121_v31 = vmul.f32 -1.442695, %v853_v44  ;;  %v1044_v47 = vsub.f32 1.0, %v1043_v23  ;;  %vm3233_vm15 = vcmp.eq.f32.partialorder %v1036_v2, 8.507059e+37  ;;  %vm972_vm7 = vweird.f32 %v3094_v29 }
 0x149   :  { %4315 = vst [vmem:[#allocation38_spill] sm:$0xff] %v3111_v45  ;;  %v3115_v20 = vpop.f32.mrf.mxu3  ;;  %v1614_v45 = vld [vmem:[#allocation11 + $0x28] sm:$0xff]  ;;  %v949_v40 = vor.u32 1.1754944e-38, %v948_v43  ;;  %v1051_v43 = vand.u32 2147483647, %v3091_v16  ;;  %v956_v44 = vadd.f32 %v3105_v7, %v955_v26  ;;  %vm987_vm14 = vweird.f32 %v3101_v25 }
 0x14a   :  { %4316 = vst [vmem:[#allocation39_spill] sm:$0xff] %v3115_v20  ;;  %v3119_v53 = vpop.f32.mrf.mxu1  ;;  %v3130_v20 = vadd.f32 1.0, %v2278_v13  ;;  %1639 = vmatpush.msra.mxu0 %v1614_v45  ;;  %v1009_v45 = vor.u32 1.1754944e-38, %v1008_v49  ;;  %v3158_v49 = vpop.eup %2281  ;;  %v1045_v41 = vmul.f32 %v3146_v33, %v1044_v47 }
 0x14b   :  { %4317 = vst [vmem:[#allocation40_spill] sm:$0xff] %v3119_v53  ;;  %v1028_v53 = vmul.f32 %v3108_v36, %v3069_v46  ;;  %v3164_v13 = vpop.eup %2283  ;;  %vm3280_vm4 = vcmp.eq.f32.partialorder %v1051_v43, 8.507059e+37  ;;  %v1612_v43 = vld [vmem:[#allocation11 + $0x18] sm:$0xff]  ;;  %vm973_vm8 = vweird.f32 %v3158_v49 }
 0x14c   :  { %2289 = vrcp.f32 %v3130_v20  ;;  %v2286_v11 = vpop.eup %2285  ;;  %v983_v26 = vmul.f32 %v3164_v13, %v3101_v25  ;;  %vm1062_vm11 = vweird.f32 %v3130_v20 }
 0x14d   :  { %659 = vmatmul.f32.gmra.mxu1 %v2880_v48  ;;  %724 = vmatmul.f32.gmra.mxu2 %v2880_v48  ;;  %v1029_v10 = vsub.f32 1.0, %v1028_v53  ;;  %2291 = vpow2.f32 %v2121_v31  ;;  %v2288_v53 = vpop.eup %2287  ;;  %v3197_v31 = vsel %vm3125_vm2, %v1009_v45, %v1005_v28  ;;  %v3208_v58 = vadd.f32 1.0, %v2286_v11 }
 0x14e   :  { %789 = vmatmul.f32.gmra.mxu3 %v2880_v48  ;;  %v1016_v48 = vadd.f32 %v3077_v14, %v1015_v19  ;;  %v941_v19 = vadd.f32 %v3074_v55, %v940_v21  ;;  %v1024_v21 = vor.u32 1.1754944e-38, %v1023_v35  ;;  %v3212_v28 = vadd.f32 1.0, %v2288_v53 }
 0x14f   :  { %v1030_v45 = vmul.f32 %v3108_v36, %v1029_v10  ;;  %v857_v35 = vadd.f32 %v2994_v42, %v593_v57  ;;  %2293 = vrcp.f32 %v3208_v58  ;;  %vm1047_vm2 = vweird.f32 %v3091_v16 }
 0x150   :  { %v3167_v63 = vpop.f32.mrf.mxu2  ;;  %v945_v32 = vsel %vm3190_vm10, %v3074_v55, %v941_v19  ;;  %2295 = vrcp.f32 %v3212_v28  ;;  %vm3333_vm10 = vmor %vm972_vm7, %vm973_vm8  ;;  %v1066_v10 = vand.u32 2147483647, %v3130_v20  ;;  %vm1092_vm7 = vweird.f32 %v3212_v28 }
 0x151   :  { %4324 = vst [vmem:[#allocation41_spill] sm:$0xff] %v3167_v63  ;;  %v3171_v30 = vpop.f32.mrf.mxu3  ;;  %v1031_v19 = vadd.f32 %v3108_v36, %v1030_v45  ;;  %v2122_v23 = vmul.f32 -1.442695, %v857_v35  ;;  %v3265_v2 = vsel %vm3223_vm12, %v949_v40, %v945_v32  ;;  %v595_v45 = vpop.f32.mrf.mxu0  ;;  %v1053_v32 = vand.u32 2147483648, %v3091_v16 }
 0x152   :  { %4325 = vst [vmem:[#allocation42_spill] sm:$0xff] %v3171_v30  ;;  %v3184_v63 = vpop.f32.mrf.mxu1  ;;  %v968_v30 = vmul.f32 %v3158_v49, %v3094_v29  ;;  %v3220_v11 = vpop.eup %2289  ;;  %v976_v16 = vand.u32 2147483647, %v3094_v29  ;;  %vm3373_vm0 = vcmp.eq.f32.partialorder %v1066_v10, 8.507059e+37  ;;  %v1081_v10 = vand.u32 2147483647, %v3208_v58 }
 0x153   :  { %4328 = vst [vmem:[#allocation43_spill] sm:$0xff] %v3184_v63  ;;  %v1020_v63 = vsel %vm3178_vm9, %v3077_v14, %v1016_v48  ;;  %v2292_v55 = vpop.eup %2291  ;;  %v963_v48 = vand.u32 2147483648, %v3065_v39  ;;  %v960_v14 = vsel %vm3253_vm1, %v3105_v7, %v956_v44  ;;  %v1035_v46 = vsel %vm3276_vm3, %v3108_v36, %v1031_v19 }
 0x154   :  { %v3231_v57 = vsel %vm3153_vm6, %v1024_v21, %v1020_v63  ;;  %v961_v63 = vand.u32 2147483647, %v3065_v39  ;;  %v3259_v50 = vadd.f32 1.0, %v2292_v55  ;;  %v1058_v39 = vmul.f32 %v3220_v11, %v3130_v20 }
 0x155   :  { %662 = vmatmul.f32.gmra.mxu1 %v2894_v52  ;;  %727 = vmatmul.f32.gmra.mxu2 %v2894_v52  ;;  %v964_v35 = vor.u32 1.1754944e-38, %v963_v48  ;;  %vm1048_vm6 = vweird.f32 %v3146_v33  ;;  %2297 = vpow2.f32 %v2122_v23  ;;  %v1046_v7 = vadd.f32 %v3146_v33, %v1045_v41  ;;  %v3301_v44 = vpop.eup %2293 }
 0x156   :  { %792 = vmatmul.f32.gmra.mxu3 %v2894_v52  ;;  %v969_v52 = vsub.f32 1.0, %v968_v30  ;;  %vm3288_vm5 = vcmp.eq.f32.partialorder %v961_v63, 8.507059e+37  ;;  %2299 = vrcp.f32 %v3259_v50  ;;  %v596_v36 = vadd.f32 %v595_v45, %v2884_v51  ;;  %v3306_v23 = vpop.eup %2295  ;;  %vm3319_vm9 = vmor %vm1047_vm2, %vm1048_vm6 }
 0x157   :  { %v984_v63 = vsub.f32 1.0, %v983_v26  ;;  %v1059_v19 = vsub.f32 1.0, %v1058_v39  ;;  %v978_v55 = vand.u32 2147483648, %v3094_v29  ;;  %v3313_v41 = vsel %vm3233_vm15, %v3206_v27, %v1035_v46  ;;  %v1611_v46 = vld [vmem:[#allocation11 + $0x10] sm:$0xff] }
 0x158   :  { %v3241_v34 = vpop.f32.mrf.mxu2  ;;  %v970_v47 = vmul.f32 %v3158_v49, %v969_v52  ;;  %v1613_v52 = vld [vmem:[#allocation11 + $0x20] sm:$0xff]  ;;  %v3327_v39 = vsel %vm3288_vm5, %v964_v35, %v960_v14  ;;  %v1050_v35 = vsel %vm3319_vm9, %v3146_v33, %v1046_v7  ;;  %v1073_v14 = vmul.f32 %v3301_v44, %v3208_v58 }
 0x159   :  { %4335 = vst [vmem:[#allocation44_spill] sm:$0xff] %v3241_v34  ;;  %v3247_v53 = vpop.f32.mrf.mxu3  ;;  %1640 = vmatpush.msra.mxu0 %v1613_v52  ;;  %v861_v29 = vadd.f32 %v2994_v42, %v596_v36  ;;  %v985_v52 = vmul.f32 %v3164_v13, %v984_v63  ;;  %v979_v7 = vor.u32 1.1754944e-38, %v978_v55  ;;  %vm1063_vm12 = vweird.f32 %v3220_v11 }
 0x15a   :  { %4336 = vst [vmem:[#allocation45_spill] sm:$0xff] %v3247_v53  ;;  %v3261_v21 = vpop.f32.mrf.mxu1  ;;  %v971_v30 = vadd.f32 %v3158_v49, %v970_v47  ;;  %v3343_v47 = vperm.slane %v2985_v38, 1  ;;  %vm3363_vm13 = vcmp.eq.f32.partialorder %v976_v16, 8.507059e+37  ;;  %vm988_vm15 = vweird.f32 %v3164_v13  ;;  %vm3403_vm3 = vmor %vm1062_vm11, %vm1063_vm12 }
 0x15b   :  { %1641 = vmatpush.msra.mxu0 %v1612_v43  ;;  %v1060_v43 = vmul.f32 %v3220_v11, %v1059_v19  ;;  %v1074_v27 = vsub.f32 1.0, %v1073_v14  ;;  %v2123_v16 = vmul.f32 -1.442695, %v861_v29  ;;  %vm3383_vm1 = vmor %vm987_vm14, %vm988_vm15  ;;  %vm1077_vm2 = vweird.f32 %v3208_v58 }
 0x15c   :  { %v975_v33 = vsel %vm3333_vm10, %v3158_v49, %v971_v30  ;;  %v993_v30 = vand.u32 2147483648, %v3101_v25  ;;  %vm3419_vm5 = vcmp.eq.f32.partialorder %v1081_v10, 8.507059e+37  ;;  %v3438_v10 = vperm.slane %v2985_v38, 3 }
 0x15d   :  { %665 = vmatmul.f32.gmra.mxu1 %v2908_v60  ;;  %730 = vmatmul.f32.gmra.mxu2 %v2908_v60  ;;  %v3394_v29 = vsel %vm3363_vm13, %v979_v7, %v975_v33  ;;  %v1075_v33 = vmul.f32 %v3301_v44, %v1074_v27  ;;  %vm1093_vm8 = vweird.f32 %v3306_v23  ;;  %vm1107_vm12 = vweird.f32 %v3259_v50 }
 0x15e   :  { %795 = vmatmul.f32.gmra.mxu3 %v2908_v60  ;;  %v1054_v60 = vor.u32 1.1754944e-38, %v1053_v32  ;;  %v1068_v32 = vand.u32 2147483648, %v3130_v20  ;;  %1642 = vmatpush.msra.mxu0 %v1611_v46  ;;  %v1061_v46 = vadd.f32 %v3220_v11, %v1060_v43  ;;  %v1610_v43 = vld [vmem:[#allocation11 + $0x8] sm:$0xff]  ;;  %vm3474_vm11 = vmor %vm1092_vm7, %vm1093_vm8 }
 0x160   :  { %v3323_v26 = vpop.f32.mrf.mxu2  ;;  %v1069_v55 = vor.u32 1.1754944e-38, %v1068_v32  ;;  %v598_v32 = vpop.f32.mrf.mxu0  ;;  %1643 = vmatpush.msra.mxu0 %v1610_v43  ;;  %v1065_v63 = vsel %vm3403_vm3, %v3220_v11, %v1061_v46  ;;  %v1076_v46 = vadd.f32 %v3301_v44, %v1075_v33 }
 0x161   :  { %4347 = vst [vmem:[#allocation46_spill] sm:$0xff] %v3323_v26  ;;  %v3340_v45 = vpop.f32.mrf.mxu3  ;;  %v1088_v26 = vmul.f32 %v3306_v23, %v3212_v28 }
 0x162   :  { %4350 = vst [vmem:[#allocation47_spill] sm:$0xff] %v3340_v45  ;;  %v621_v48 = vpop.f32.mrf.mxu1  ;;  %v2298_v45 = vpop.eup %2297 }
 0x163   :  { %v622_v51 = vadd.f32 %v621_v48, %v2918_v59  ;;  %v3361_v36 = vpop.eup %2299  ;;  %v3371_v59 = vsel %vm3280_vm4, %v1054_v60, %v1050_v35  ;;  %v986_v48 = vadd.f32 %v3164_v13, %v985_v52  ;;  %v1089_v34 = vsub.f32 1.0, %v1088_v26 }
 0x164   :  { %v3381_v53 = vadd.f32 1.0, %v2298_v45  ;;  %v1103_v35 = vmul.f32 %v3361_v36, %v3259_v50  ;;  %v991_v26 = vand.u32 2147483647, %v3101_v25  ;;  %v1083_v45 = vand.u32 2147483648, %v3208_v58 }
 0x165   :  { %v810_v49 = vadd.f32 %v3343_v47, %v622_v51  ;;  %v994_v51 = vor.u32 1.1754944e-38, %v993_v30  ;;  %vm1078_vm4 = vweird.f32 %v3301_v44  ;;  %v990_v7 = vsel %vm3383_vm1, %v3164_v13, %v986_v48 }
 0x166   :  { %v1090_v20 = vmul.f32 %v3306_v23, %v1089_v34  ;;  %v599_v30 = vadd.f32 %v598_v32, %v2900_v54  ;;  %v1104_v43 = vsub.f32 1.0, %v1103_v35  ;;  %vm3423_vm6 = vcmp.eq.f32.partialorder %v991_v26, 8.507059e+37  ;;  %vm3457_vm9 = vmor %vm1077_vm2, %vm1078_vm4 }
 0x167   :  { %v2126_v40 = vmul.f32 -1.442695, %v810_v49  ;;  %v1084_v11 = vor.u32 1.1754944e-38, %v1083_v45  ;;  %v1096_v34 = vand.u32 2147483647, %v3212_v28  ;;  %v1098_v48 = vand.u32 2147483648, %v3212_v28 }
 0x168   :  { %v3390_v14 = vpop.f32.mrf.mxu2  ;;  %v1091_v35 = vadd.f32 %v3306_v23, %v1090_v20  ;;  %v865_v26 = vadd.f32 %v2994_v42, %v599_v30  ;;  %v3445_v19 = vsel %vm3423_vm6, %v994_v51, %v990_v7  ;;  %v1111_v30 = vand.u32 2147483647, %v3259_v50  ;;  %v601_v13 = vpop.f32.mrf.mxu0 }
 0x169   :  { %2301 = vpow2.f32 %v2126_v40  ;;  %v751_v52 = vpop.f32.mrf.mxu3  ;;  %v1609_v40 = vld [vmem:[#allocation11] sm:$0xff]  ;;  %vm3461_vm10 = vcmp.eq.f32.partialorder %v1096_v34, 8.507059e+37  ;;  %v1099_v7 = vor.u32 1.1754944e-38, %v1098_v48  ;;  %vm1108_vm13 = vweird.f32 %v3361_v36 }
 0x16a   :  { %2303 = vpow2.f32 %v2123_v16  ;;  %v624_v25 = vpop.f32.mrf.mxu1  ;;  %1644 = vmatpush.msra.mxu0 %v1609_v40  ;;  %v752_v60 = vadd.f32 %v751_v52, %v2927_v56  ;;  %v3451_v56 = vperm.slane %v2985_v38, 2  ;;  %v1080_v38 = vsel %vm3457_vm9, %v3301_v44, %v1076_v46  ;;  %vm3513_vm15 = vmor %vm1107_vm12, %vm1108_vm13 }
 0x16b   :  { %2305 = vrcp.f32 %v3381_v53  ;;  %v625_v27 = vadd.f32 %v624_v25, %v2929_v15  ;;  %v3432_v15 = vsel %vm3373_vm0, %v1069_v55, %v1065_v63  ;;  %v1105_v55 = vmul.f32 %v3361_v36, %v1104_v43 }
 0x16c   :  { %v812_v40 = vadd.f32 %v3438_v10, %v752_v60  ;;  %v1095_v44 = vsel %vm3474_vm11, %v3306_v23, %v1091_v35  ;;  %v2124_v28 = vmul.f32 -1.442695, %v865_v26  ;;  %v687_v46 = vadd.f32 %v3390_v14, %v2925_v1 }
 0x16d   :  { %v814_v54 = vadd.f32 %v3343_v47, %v625_v27  ;;  %v1113_v27 = vand.u32 2147483648, %v3259_v50  ;;  %v1106_v48 = vadd.f32 %v3361_v36, %v1105_v55  ;;  %v3495_v60 = vsel %vm3419_vm5, %v1084_v11, %v1080_v38 }
 0x16e   :  { %vm3500_vm14 = vcmp.eq.f32.partialorder %v1111_v30, 8.507059e+37  ;;  %v1128_v26 = vand.u32 2147483648, %v3381_v53  ;;  %v1481_v1 = vmul.f32 %v3265_v2, %v812_v40  ;;  %v3509_v14 = vsel %vm3461_vm10, %v1099_v7, %v1095_v44 }
 0x16f   :  { %v2302_v32 = vpop.eup %2301  ;;  %v2127_v45 = vmul.f32 -1.442695, %v814_v54  ;;  %v1126_v11 = vand.u32 2147483647, %v3381_v53  ;;  %v811_v50 = vadd.f32 %v3451_v56, %v687_v46  ;;  %vm1122_vm1 = vweird.f32 %v3381_v53 }
 0x170   :  { %v2304_v49 = vpop.eup %2303  ;;  %v3448_v33 = vadd.f32 1.0, %v2302_v32  ;;  %v689_v52 = vpop.f32.mrf.mxu2  ;;  %v1114_v32 = vor.u32 1.1754944e-38, %v1113_v27 }
 0x171   :  { %v3465_v63 = vpop.eup %2305  ;;  %2307 = vpow2.f32 %v2127_v45  ;;  %v754_v20 = vpop.f32.mrf.mxu3  ;;  %v3489_v54 = vadd.f32 1.0, %v2304_v49  ;;  %v602_v45 = vadd.f32 %v601_v13, %v2916_v62  ;;  %v1110_v62 = vsel %vm3513_vm15, %v3361_v36, %v1106_v48 }
 0x172   :  { %2309 = vrcp.f32 %v3448_v33  ;;  %v627_v43 = vpop.f32.mrf.mxu1  ;;  %v1118_v23 = vmul.f32 %v3465_v63, %v3381_v53  ;;  %v755_v49 = vadd.f32 %v754_v20, %v2938_v5  ;;  %vm1123_vm0 = vweird.f32 %v3465_v63 }
 0x173   :  { %v628_v34 = vadd.f32 %v627_v43, %v2940_v6  ;;  %2311 = vpow2.f32 %v2124_v28  ;;  %v3528_v5 = vor.u32 1.1754944e-38, %v1128_v26  ;;  %v869_v20 = vadd.f32 %v2994_v42, %v602_v45  ;;  %vm3573_vm6 = vmor %vm1122_vm1, %vm1123_vm0 }
 0x174   :  { %2313 = vrcp.f32 %v3489_v54  ;;  %v1119_v38 = vsub.f32 1.0, %v1118_v23  ;;  %v1497_v36 = vadd.f32 %v1481_v1, %v811_v50  ;;  %v1143_v40 = vand.u32 2147483648, %v3489_v54 }
 0x175   :  { %v818_v35 = vadd.f32 %v3343_v47, %v628_v34  ;;  %v816_v44 = vadd.f32 %v3438_v10, %v755_v49  ;;  %v3538_v13 = vsel %vm3500_vm14, %v1114_v32, %v1110_v62  ;;  %v690_v34 = vadd.f32 %v689_v52, %v2936_v4 }
 0x176   :  { %v1252_v42 = vand.u32 2147483648, %v3448_v33  ;;  %v1120_v48 = vmul.f32 %v3465_v63, %v1119_v38  ;;  %v1141_v46 = vand.u32 2147483647, %v3489_v54  ;;  %v1250_v45 = vand.u32 2147483647, %v3448_v33 }
 0x177   :  { %v2308_v55 = vpop.eup %2307  ;;  %v2128_v25 = vmul.f32 -1.442695, %v818_v35  ;;  %v2125_v6 = vmul.f32 -1.442695, %v869_v20  ;;  %v3549_v4 = vor.u32 1.1754944e-38, %v1143_v40  ;;  %vm1246_vm3 = vweird.f32 %v3448_v33 }
 0x178   :  { %v2310_v2 = vpop.eup %2309  ;;  %v3524_v51 = vadd.f32 1.0, %v2308_v55  ;;  %v692_v7 = vpop.f32.mrf.mxu2  ;;  %v1482_v1 = vmul.f32 %v3327_v39, %v816_v44  ;;  %v1253_v38 = vor.u32 1.1754944e-38, %v1252_v42  ;;  %vm1251_vm5 = vcmp.eq.f32.partialorder %v1250_v45, 8.507059e+37 }
 0x179   :  { %v1242_v58 = vmul.f32 %v2310_v2, %v3448_v33  ;;  %2315 = vpow2.f32 %v2128_v25  ;;  %v757_v30 = vpop.f32.mrf.mxu3  ;;  %v2312_v23 = vpop.eup %2311  ;;  %vm1247_vm2 = vweird.f32 %v2310_v2  ;;  %v815_v25 = vadd.f32 %v3451_v56, %v690_v34 }
 0x17a   :  { %2317 = vrcp.f32 %v3524_v51  ;;  %v630_v27 = vpop.f32.mrf.mxu1  ;;  %v758_v32 = vadd.f32 %v757_v30, %v2949_v17  ;;  %vm1248_vm4 = vmor %vm1246_vm3, %vm1247_vm2  ;;  %v3560_v17 = vadd.f32 %v3465_v63, %v1120_v48  ;;  %v3564_v30 = vadd.f32 1.0, %v2312_v23 }
 0x17b   :  { %v1243_v43 = vsub.f32 1.0, %v1242_v58  ;;  %v631_v28 = vadd.f32 %v630_v27, %v2951_v9  ;;  %v3546_v9 = vpop.eup %2313  ;;  %2319 = vtanh.f32 %v1497_v36  ;;  %v1498_v40 = vadd.f32 %v1482_v1, %v815_v25 }
 0x17c   :  { %v820_v20 = vadd.f32 %v3438_v10, %v758_v32  ;;  %vm3579_vm7 = vcmp.eq.f32.partialorder %v1126_v11, 8.507059e+37  ;;  %v693_v42 = vadd.f32 %v692_v7, %v2947_v8  ;;  %v3590_v23 = vmul.f32 %v3546_v9, %v3489_v54  ;;  %v2443_v11 = vld [vmem:[#allocation5] sm:$0xff] }
 0x17d   :  { %v1244_v35 = vmul.f32 %v2310_v2, %v1243_v43  ;;  %v822_v26 = vadd.f32 %v3343_v47, %v631_v28  ;;  %v1267_v45 = vand.u32 2147483648, %v3524_v51  ;;  %v1265_v7 = vand.u32 2147483647, %v3524_v51 }
 0x17e   :  { %vm1261_vm9 = vweird.f32 %v3524_v51 }
 0x17f   :  { %v2316_v52 = vpop.eup %2315  ;;  %v2129_v16 = vmul.f32 -1.442695, %v822_v26  ;;  %v1245_v55 = vadd.f32 %v2310_v2, %v1244_v35  ;;  %vm1266_vm11 = vcmp.eq.f32.partialorder %v1265_v7, 8.507059e+37 }
 0x180   :  { %v3553_v49 = vpop.eup %2317  ;;  %v3556_v62 = vadd.f32 1.0, %v2316_v52  ;;  %v695_v50 = vpop.f32.mrf.mxu2 }
 0x181   :  { %2321 = vpow2.f32 %v2129_v16  ;;  %v760_v58 = vpop.f32.mrf.mxu3  ;;  %v1249_v33 = vsel %vm1248_vm4, %v2310_v2, %v1245_v55  ;;  %v1257_v39 = vmul.f32 %v3553_v49, %v3524_v51  ;;  %v2320_v34 = vpop.eup %2319  ;;  %vm1262_vm8 = vweird.f32 %v3553_v49 }
 0x182   :  { %2323 = vrcp.f32 %v3556_v62  ;;  %v633_v36 = vpop.f32.mrf.mxu1  ;;  %v1254_v27 = vsel %vm1251_vm5, %v1253_v38, %v1249_v33  ;;  %v761_v32 = vadd.f32 %v760_v58, %v2960_v12  ;;  %v819_v55 = vadd.f32 %v3451_v56, %v693_v42  ;;  %vm1263_vm10 = vmor %vm1261_vm9, %vm1262_vm8 }
 0x183   :  { %2325 = vpow2.f32 %v2125_v6  ;;  %v634_v43 = vadd.f32 %v633_v36, %v2962_v61  ;;  %v1529_v44 = vsub.f32 1.0, %v1254_v27  ;;  %v1258_v48 = vsub.f32 1.0, %v1257_v39  ;;  %v2444_v39 = vld [vmem:[#allocation2] sm:$0xff] }
 0x184   :  { %v1125_v61 = vsel %vm3573_vm6, %v3465_v63, %v3560_v17  ;;  %v1561_v26 = vmul.f32 %v2443_v11, %v1254_v27  ;;  %v1483_v6 = vmul.f32 %v3394_v29, %v820_v20  ;;  %2327 = vtanh.f32 %v1498_v40  ;;  %v2445_v11 = vld [vmem:[#allocation5 + $0x8] sm:$0xff] }
 0x185   :  { %v826_v35 = vadd.f32 %v3343_v47, %v634_v43  ;;  %v1545_v53 = vmul.f32 %v2320_v34, %v1529_v44  ;;  %v1259_v8 = vmul.f32 %v3553_v49, %v1258_v48  ;;  %v1268_v12 = vor.u32 1.1754944e-38, %v1267_v45 }
 0x186   :  { %v1499_v36 = vadd.f32 %v1483_v6, %v819_v55  ;;  %v696_v51 = vadd.f32 %v695_v50, %v2958_v37  ;;  %v824_v43 = vadd.f32 %v3438_v10, %v761_v32  ;;  %v3621_v48 = vsel %vm3579_vm7, %v3528_v5, %v1125_v61 }
 0x187   :  { %v2322_v63 = vpop.eup %2321  ;;  %v2130_v52 = vmul.f32 -1.442695, %v826_v35  ;;  %v1577_v1 = vadd.f32 %v1561_v26, %v1545_v53  ;;  %v1260_v29 = vadd.f32 %v3553_v49, %v1259_v8  ;;  %v1280_v50 = vand.u32 2147483647, %v3556_v62 }
 0x188   :  { %v3599_v16 = vpop.eup %2323  ;;  %v3602_v25 = vadd.f32 1.0, %v2322_v63  ;;  %v698_v38 = vpop.f32.mrf.mxu2  ;;  %v823_v5 = vadd.f32 %v3451_v56, %v696_v51  ;;  %v1484_v28 = vmul.f32 %v3445_v19, %v824_v43  ;;  %vm1276_vm13 = vweird.f32 %v3556_v62 }
 0x189   :  { %v3606_v17 = vpop.eup %2325  ;;  %2329 = vpow2.f32 %v2130_v52  ;;  %v763_v33 = vpop.f32.mrf.mxu3  ;;  %v1593_v20 = vmul.f32 %v2444_v39, %v1577_v1  ;;  %v1272_v58 = vmul.f32 %v3599_v16, %v3556_v62  ;;  %v1264_v40 = vsel %vm1263_vm10, %v3553_v49, %v1260_v29  ;;  %v2446_v39 = vld [vmem:[#allocation2 + $0x8] sm:$0xff] }
 0x18a   :  { %2331 = vrcp.f32 %v3602_v25  ;;  %v636_v27 = vpop.f32.mrf.mxu1  ;;  %v1269_v2 = vsel %vm1266_vm11, %v1268_v12, %v1264_v40  ;;  %v2328_v35 = vpop.eup %2327  ;;  %v764_v49 = vadd.f32 %v763_v33, %v2969_v24  ;;  %vm1277_vm12 = vweird.f32 %v3599_v16 }
 0x18b   :  { %v637_v44 = vadd.f32 %v636_v27, %v2971_v0  ;;  %1645 = vmatmul.f32.vlgmr.msra.gmra.mxu0 %v1593_v20  ;;  %2333 = vrcp.f32 %v3564_v30  ;;  %v1530_v34 = vsub.f32 1.0, %v1269_v2  ;;  %v1273_v42 = vsub.f32 1.0, %v1272_v58  ;;  %vm1278_vm14 = vmor %vm1276_vm13, %vm1277_vm12 }
 0x18c   :  { %v1282_v0 = vand.u32 2147483648, %v3556_v62  ;;  %v1562_v26 = vmul.f32 %v2445_v11, %v1269_v2  ;;  %2335 = vtanh.f32 %v1499_v36  ;;  %v828_v52 = vadd.f32 %v3438_v10, %v764_v49 }
 0x18d   :  { %v830_v37 = vadd.f32 %v3343_v47, %v637_v44  ;;  %v1546_v53 = vmul.f32 %v2328_v35, %v1530_v34  ;;  %v1274_v45 = vmul.f32 %v3599_v16, %v1273_v42  ;;  %vm1281_vm15 = vcmp.eq.f32.partialorder %v1280_v50, 8.507059e+37 }
 0x18e   :  { %v1283_v19 = vor.u32 1.1754944e-38, %v1282_v0  ;;  %v1500_v12 = vadd.f32 %v1484_v28, %v823_v5  ;;  %v699_v58 = vadd.f32 %v698_v38, %v2967_v22  ;;  %v1134_v43 = vsub.f32 1.0, %v3590_v23  ;;  %v2447_v38 = vld [vmem:[#allocation5 + $0x10] sm:$0xff] }
 0x18f   :  { %v2330_v6 = vpop.eup %2329  ;;  %v2131_v24 = vmul.f32 -1.442695, %v830_v37  ;;  %v1578_v63 = vadd.f32 %v1562_v26, %v1546_v53  ;;  %v1275_v32 = vadd.f32 %v3599_v16, %v1274_v45  ;;  %v1158_v44 = vand.u32 2147483648, %v3564_v30 }
 0x190   :  { %v3631_v61 = vpop.eup %2331  ;;  %v3633_v8 = vadd.f32 1.0, %v2330_v6  ;;  %v3635_v7 = vpop.f32.mrf.mxu2  ;;  %v1485_v34 = vmul.f32 %v3197_v31, %v828_v52  ;;  %v827_v23 = vadd.f32 %v3451_v56, %v699_v58  ;;  %v1295_v31 = vand.u32 2147483647, %v3602_v25 }
 0x191   :  { %2337 = vpow2.f32 %v2131_v24  ;;  %v766_v1 = vpop.f32.mrf.mxu3  ;;  %v1287_v55 = vmul.f32 %v3631_v61, %v3602_v25  ;;  %v3644_v29 = vpop.eup %2333  ;;  %v1594_v20 = vmul.f32 %v2446_v39, %v1578_v63  ;;  %v1279_v62 = vsel %vm1278_vm14, %v3599_v16, %v1275_v32  ;;  %v3674_v32 = vld [vmem:[#allocation2 + $0x10] sm:$0xff]  ;;  %v4378_v39 = vld [vmem:[#allocation19_spill] sm:$0xff] }
 0x192   :  { %2339 = vrcp.f32 %v3633_v8  ;;  %v639_v33 = vpop.f32.mrf.mxu1  ;;  %v1284_v27 = vsel %vm1281_vm15, %v1283_v19, %v1279_v62  ;;  %v2336_v2 = vpop.eup %2335  ;;  %vm1292_vm0 = vweird.f32 %v3631_v61  ;;  %v1297_v16 = vand.u32 2147483648, %v3602_v25  ;;  %v4377_v19 = vld [vmem:[#allocation22_spill] sm:$0xff] }
 0x193   :  { %v640_v36 = vadd.f32 %v639_v33, %v2980_v3  ;;  %1648 = vmatmul.f32.gmra.mxu0 %v1594_v20  ;;  %v1531_v40 = vsub.f32 1.0, %v1284_v27  ;;  %v1288_v51 = vsub.f32 1.0, %v1287_v55  ;;  %v767_v22 = vadd.f32 %v766_v1, %v2978_v18 }
 0x194   :  { %v1563_v35 = vmul.f32 %v2447_v38, %v1284_v27  ;;  %2341 = vtanh.f32 %v1500_v12  ;;  %vm1291_vm1 = vweird.f32 %v3602_v25  ;;  %v1501_v6 = vadd.f32 %v1485_v34, %v827_v23 }
 0x195   :  { %v834_v42 = vadd.f32 %v3343_v47, %v640_v36  ;;  %v1547_v3 = vmul.f32 %v2336_v2, %v1531_v40  ;;  %v1289_v49 = vmul.f32 %v3631_v61, %v1288_v51  ;;  %vm1293_vm2 = vmor %vm1291_vm1, %vm1292_vm0  ;;  %v1298_v28 = vor.u32 1.1754944e-38, %v1297_v16 }
 0x196   :  { %v832_v24 = vadd.f32 %v3438_v10, %v767_v22  ;;  %vm1296_vm3 = vcmp.eq.f32.partialorder %v1295_v31, 8.507059e+37  ;;  %v1156_v33 = vand.u32 2147483647, %v3564_v30  ;;  %v702_v20 = vadd.f32 %v3635_v7, %v4378_v39  ;;  %v3723_v39 = vld [vmem:[#allocation2 + $0x18] sm:$0xff] }
 0x197   :  { %v2338_v37 = vpop.eup %2337  ;;  %v2132_v50 = vmul.f32 -1.442695, %v834_v42  ;;  %v1579_v26 = vadd.f32 %v1563_v35, %v1547_v3  ;;  %v1290_v18 = vadd.f32 %v3631_v61, %v1289_v49  ;;  %v1135_v12 = vmul.f32 %v3546_v9, %v1134_v43  ;;  %v4379_v35 = vld [vmem:[#allocation21_spill] sm:$0xff] }
 0x198   :  { %v3660_v0 = vpop.eup %2339  ;;  %v3662_v53 = vadd.f32 1.0, %v2338_v37  ;;  %v3664_v11 = vpop.f32.mrf.mxu2  ;;  %v3683_v58 = vor.u32 1.1754944e-38, %v1158_v44  ;;  %v1486_v51 = vmul.f32 %v3231_v57, %v832_v24  ;;  %v1310_v2 = vand.u32 2147483647, %v3633_v8  ;;  %v2449_v44 = vld [vmem:[#allocation5 + $0x18] sm:$0xff] }
 0x199   :  { %v1302_v45 = vmul.f32 %v3660_v0, %v3633_v8  ;;  %2343 = vpow2.f32 %v2132_v50  ;;  %v769_v5 = vpop.f32.mrf.mxu3  ;;  %v1595_v52 = vmul.f32 %v3674_v32, %v1579_v26  ;;  %v1294_v25 = vsel %vm1293_vm2, %v3631_v61, %v1290_v18  ;;  %v4394_v26 = vld [vmem:[#allocation31_spill] sm:$0xff] }
 0x19a   :  { %2345 = vrcp.f32 %v3662_v53  ;;  %v642_v63 = vpop.f32.mrf.mxu1  ;;  %v1299_v62 = vsel %vm1296_vm3, %v1298_v28, %v1294_v25  ;;  %v2342_v36 = vpop.eup %2341  ;;  %vm1307_vm4 = vweird.f32 %v3660_v0  ;;  %v1312_v7 = vand.u32 2147483648, %v3633_v8 }
 0x19b   :  { %v1303_v1 = vsub.f32 1.0, %v1302_v45  ;;  %v643_v55 = vadd.f32 %v642_v63, %v4377_v19  ;;  %1651 = vmatmul.f32.gmra.mxu0 %v1595_v52  ;;  %2347 = vtanh.f32 %v1501_v6  ;;  %v1532_v61 = vsub.f32 1.0, %v1299_v62  ;;  %v4382_v52 = vld [vmem:[#allocation25_spill] sm:$0xff] }
 0x19c   :  { %v1564_v16 = vmul.f32 %v2449_v44, %v1299_v62  ;;  %vm1138_vm5 = vweird.f32 %v3546_v9  ;;  %v831_v38 = vadd.f32 %v3451_v56, %v702_v20  ;;  %v770_v49 = vadd.f32 %v769_v5, %v4379_v35 }
 0x19d   :  { %v838_v27 = vadd.f32 %v3343_v47, %v643_v55  ;;  %v1304_v40 = vmul.f32 %v3660_v0, %v1303_v1  ;;  %v1548_v43 = vmul.f32 %v2342_v36, %v1532_v61  ;;  %vm1306_vm6 = vweird.f32 %v3633_v8  ;;  %v4383_v1 = vld [vmem:[#allocation20_spill] sm:$0xff] }
 0x19e   :  { %vm3704_vm7 = vmor %vm1306_vm6, %vm1307_vm4  ;;  %v3709_v18 = vadd.f32 %v3546_v9, %v1135_v12  ;;  %vm1137_vm8 = vweird.f32 %v3489_v54  ;;  %v1502_v45 = vadd.f32 %v1486_v51, %v831_v38  ;;  %v1313_v5 = vor.u32 1.1754944e-38, %v1312_v7  ;;  %v2451_v7 = vld [vmem:[#allocation5 + $0x20] sm:$0xff] }
 0x19f   :  { %v2344_v34 = vpop.eup %2343  ;;  %v2133_v42 = vmul.f32 -1.442695, %v838_v27  ;;  %v1305_v22 = vadd.f32 %v3660_v0, %v1304_v40  ;;  %v1580_v31 = vadd.f32 %v1564_v16, %v1548_v43  ;;  %v3717_v24 = vadd.f32 1.0, %v3606_v17  ;;  %vm3758_vm13 = vmor %vm1137_vm8, %vm1138_vm5 }
 0x1a0   :  { %v3693_v3 = vpop.eup %2345  ;;  %v3696_v57 = vadd.f32 1.0, %v2344_v34  ;;  %v707_v37 = vpop.f32.mrf.mxu2  ;;  %vm1311_vm9 = vcmp.eq.f32.partialorder %v1310_v2, 8.507059e+37  ;;  %v705_v19 = vadd.f32 %v3664_v11, %v4383_v1  ;;  %v836_v55 = vadd.f32 %v3438_v10, %v770_v49 }
 0x1a1   :  { %v1317_v23 = vmul.f32 %v3693_v3, %v3662_v53  ;;  %2349 = vpow2.f32 %v2133_v42  ;;  %v772_v50 = vpop.f32.mrf.mxu3  ;;  %v1309_v6 = vsel %vm3704_vm7, %v3660_v0, %v1305_v22  ;;  %v2348_v28 = vpop.eup %2347  ;;  %v1596_v20 = vmul.f32 %v3723_v39, %v1580_v31  ;;  %v4384_v0 = vld [vmem:[#allocation24_spill] sm:$0xff]  ;;  %v4385_v22 = vld [vmem:[#allocation23_spill] sm:$0xff] }
 0x1a2   :  { %2351 = vrcp.f32 %v3696_v57  ;;  %v645_v8 = vpop.f32.mrf.mxu1  ;;  %v1314_v62 = vsel %vm1311_vm9, %v1313_v5, %v1309_v6  ;;  %v773_v12 = vadd.f32 %v772_v50, %v4384_v0  ;;  %vm1322_vm10 = vweird.f32 %v3693_v3  ;;  %v4390_v5 = vld [vmem:[#allocation28_spill] sm:$0xff] }
 0x1a3   :  { %v1318_v63 = vsub.f32 1.0, %v1317_v23  ;;  %v646_v25 = vadd.f32 %v645_v8, %v4382_v52  ;;  %v1533_v17 = vsub.f32 1.0, %v1314_v62  ;;  %2353 = vtanh.f32 %v1502_v45  ;;  %1654 = vmatmul.f32.gmra.mxu0 %v1596_v20 }
 0x1a4   :  { %v1325_v11 = vand.u32 2147483647, %v3662_v53  ;;  %v1327_v61 = vand.u32 2147483648, %v3662_v53  ;;  %v1565_v34 = vmul.f32 %v2451_v7, %v1314_v62  ;;  %v1487_v44 = vmul.f32 %v3313_v41, %v836_v55 }
 0x1a5   :  { %v842_v36 = vadd.f32 %v3343_v47, %v646_v25  ;;  %v1319_v27 = vmul.f32 %v3693_v3, %v1318_v63  ;;  %v1549_v2 = vmul.f32 %v2348_v28, %v1533_v17  ;;  %v708_v38 = vadd.f32 %v707_v37, %v4385_v22 }
 0x1a6   :  { %vm1321_vm11 = vweird.f32 %v3662_v53  ;;  %v840_v23 = vadd.f32 %v3438_v10, %v773_v12  ;;  %v835_v41 = vadd.f32 %v3451_v56, %v705_v19  ;;  %v1328_v45 = vor.u32 1.1754944e-38, %v1327_v61  ;;  %v3774_v19 = vld [vmem:[#allocation2 + $0x20] sm:$0xff]  ;;  %v2453_v61 = vld [vmem:[#allocation5 + $0x28] sm:$0xff] }
 0x1a7   :  { %v2350_v40 = vpop.eup %2349  ;;  %v2134_v51 = vmul.f32 -1.442695, %v842_v36  ;;  %v1320_v42 = vadd.f32 %v3693_v3, %v1319_v27  ;;  %v1581_v31 = vadd.f32 %v1565_v34, %v1549_v2  ;;  %vm3745_vm12 = vmor %vm1321_vm11, %vm1322_vm10  ;;  %vm1326_vm14 = vcmp.eq.f32.partialorder %v1325_v11, 8.507059e+37 }
 0x1a8   :  { %v3733_v43 = vpop.eup %2351  ;;  %v3736_v16 = vadd.f32 1.0, %v2350_v40  ;;  %v710_v35 = vpop.f32.mrf.mxu2  ;;  %v1140_v63 = vsel %vm3758_vm13, %v3546_v9, %v3709_v18  ;;  %vm3769_vm15 = vcmp.eq.f32.partialorder %v1141_v46, 8.507059e+37  ;;  %v1503_v25 = vadd.f32 %v1487_v44, %v835_v41  ;;  %v4393_v46 = vld [vmem:[#allocation27_spill] sm:$0xff] }
 0x1a9   :  { %v1332_v49 = vmul.f32 %v3733_v43, %v3696_v57  ;;  %2355 = vpow2.f32 %v2134_v51  ;;  %v775_v50 = vpop.f32.mrf.mxu3  ;;  %v1324_v53 = vsel %vm3745_vm12, %v3693_v3, %v1320_v42  ;;  %v2354_v52 = vpop.eup %2353  ;;  %v839_v1 = vadd.f32 %v3451_v56, %v708_v38 }
 0x1aa   :  { %2357 = vrcp.f32 %v3736_v16  ;;  %v648_v37 = vpop.f32.mrf.mxu1  ;;  %v1597_v55 = vmul.f32 %v3774_v19, %v1581_v31  ;;  %v1329_v20 = vsel %vm1326_vm14, %v1328_v45, %v1324_v53  ;;  %v1488_v62 = vmul.f32 %v3371_v59, %v840_v23  ;;  %v3804_v45 = vld [vmem:[#allocation2 + $0x28] sm:$0xff] }
 0x1ab   :  { %v1333_v6 = vsub.f32 1.0, %v1332_v49  ;;  %v649_v28 = vadd.f32 %v648_v37, %v4390_v5  ;;  %v1534_v9 = vsub.f32 1.0, %v1329_v20  ;;  %v776_v18 = vadd.f32 %v775_v50, %v4393_v46  ;;  %v4395_v37 = vld [vmem:[#allocation26_spill] sm:$0xff] }
 0x1ac   :  { %1657 = vmatmul.f32.gmra.mxu0 %v1597_v55  ;;  %vm1337_vm0 = vweird.f32 %v3733_v43  ;;  %v1340_v12 = vand.u32 2147483647, %v3696_v57  ;;  %v1342_v36 = vand.u32 2147483648, %v3696_v57  ;;  %v1566_v40 = vmul.f32 %v2453_v61, %v1329_v20 }
 0x1ad   :  { %v846_v0 = vadd.f32 %v3343_v47, %v649_v28  ;;  %v1334_v54 = vmul.f32 %v3733_v43, %v1333_v6  ;;  %v1550_v11 = vmul.f32 %v2354_v52, %v1534_v9  ;;  %2359 = vtanh.f32 %v1503_v25 }
 0x1ae   :  { %vm1336_vm1 = vweird.f32 %v3696_v57  ;;  %v3792_v34 = vmul.f32 %v3644_v29, %v3564_v30  ;;  %v1504_v44 = vadd.f32 %v1488_v62, %v839_v1  ;;  %v844_v49 = vadd.f32 %v3438_v10, %v776_v18 }
 0x1af   :  { %v2356_v17 = vpop.eup %2355  ;;  %v2135_v27 = vmul.f32 -1.442695, %v846_v0  ;;  %v1335_v59 = vadd.f32 %v3733_v43, %v1334_v54  ;;  %v1582_v38 = vadd.f32 %v1566_v40, %v1550_v11  ;;  %vm1338_vm2 = vmor %vm1336_vm1, %vm1337_vm0  ;;  %v1343_v50 = vor.u32 1.1754944e-38, %v1342_v36 }
 0x1b0   :  { %v3785_v51 = vpop.eup %2357  ;;  %v3787_v2 = vadd.f32 1.0, %v2356_v17  ;;  %v713_v7 = vpop.f32.mrf.mxu2  ;;  %vm1341_vm3 = vcmp.eq.f32.partialorder %v1340_v12, 8.507059e+37  ;;  %v711_v53 = vadd.f32 %v710_v35, %v4395_v37  ;;  %v3810_v5 = vsel %vm3769_vm15, %v3549_v4, %v1140_v63  ;;  %v2455_v63 = vld [vmem:[#allocation5 + $0x30] sm:$0xff] }
 0x1b1   :  { %v1347_v42 = vmul.f32 %v3785_v51, %v3736_v16  ;;  %2361 = vpow2.f32 %v2135_v27  ;;  %v778_v22 = vpop.f32.mrf.mxu3  ;;  %v1339_v57 = vsel %vm1338_vm2, %v3733_v43, %v1335_v59  ;;  %v1598_v8 = vmul.f32 %v3804_v45, %v1582_v38 }
 0x1b2   :  { %2363 = vrcp.f32 %v3787_v2  ;;  %v651_v23 = vpop.f32.mrf.mxu1  ;;  %v1344_v6 = vsel %vm1341_vm3, %v1343_v50, %v1339_v57  ;;  %v1489_v1 = vmul.f32 %v3432_v15, %v844_v49  ;;  %vm1352_vm4 = vweird.f32 %v3785_v51  ;;  %v4396_v15 = vld [vmem:[#allocation30_spill] sm:$0xff]  ;;  %v4400_v50 = vld [vmem:[#allocation29_spill] sm:$0xff] }
 0x1b3   :  { %2365 = vrcp.f32 %v3717_v24  ;;  %v1348_v31 = vsub.f32 1.0, %v1347_v42  ;;  %v652_v41 = vadd.f32 %v651_v23, %v4394_v26  ;;  %v1535_v28 = vsub.f32 1.0, %v1344_v6  ;;  %v2360_v25 = vpop.eup %2359  ;;  %v4399_v49 = vld [vmem:[#allocation34_spill] sm:$0xff]  ;;  %v3845_v26 = vld [vmem:[#allocation2 + $0x30] sm:$0xff] }
 0x1b4   :  { %2367 = vtanh.f32 %v1504_v44  ;;  %1660 = vmatmul.f32.gmra.mxu0 %v1598_v8  ;;  %v1355_v35 = vand.u32 2147483647, %v3736_v16  ;;  %v1357_v55 = vand.u32 2147483648, %v3736_v16  ;;  %v1567_v62 = vmul.f32 %v2455_v63, %v1344_v6 }
 0x1b5   :  { %v850_v43 = vadd.f32 %v3343_v47, %v652_v41  ;;  %v1349_v52 = vmul.f32 %v3785_v51, %v1348_v31  ;;  %v1551_v4 = vmul.f32 %v2360_v25, %v1535_v28  ;;  %v843_v54 = vadd.f32 %v3451_v56, %v711_v53  ;;  %v4401_v53 = vld [vmem:[#allocation33_spill] sm:$0xff] }
 0x1b6   :  { %v779_v18 = vadd.f32 %v778_v22, %v4396_v15  ;;  %vm1351_vm5 = vweird.f32 %v3736_v16  ;;  %v1149_v40 = vsub.f32 1.0, %v3792_v34  ;;  %v1358_v44 = vor.u32 1.1754944e-38, %v1357_v55 }
 0x1b7   :  { %v2362_v20 = vpop.eup %2361  ;;  %v2136_v3 = vmul.f32 -1.442695, %v850_v43  ;;  %v1350_v0 = vadd.f32 %v3785_v51, %v1349_v52  ;;  %v1583_v11 = vadd.f32 %v1567_v62, %v1551_v4  ;;  %vm3832_vm6 = vmor %vm1351_vm5, %vm1352_vm4  ;;  %v1505_v59 = vadd.f32 %v1489_v1, %v843_v54  ;;  %v4402_v62 = vld [vmem:[#allocation32_spill] sm:$0xff] }
 0x1b8   :  { %v3819_v9 = vpop.eup %2363  ;;  %v3822_v46 = vadd.f32 1.0, %v2362_v20  ;;  %v716_v12 = vpop.f32.mrf.mxu2  ;;  %vm1356_vm7 = vcmp.eq.f32.partialorder %v1355_v35, 8.507059e+37  ;;  %v1171_v57 = vand.u32 2147483647, %v3717_v24  ;;  %v714_v31 = vadd.f32 %v713_v7, %v4400_v50  ;;  %v2457_v35 = vld [vmem:[#allocation5 + $0x38] sm:$0xff] }
 0x1b9   :  { %v3826_v36 = vpop.eup %2365  ;;  %v1362_v17 = vmul.f32 %v3819_v9, %v3787_v2  ;;  %2369 = vpow2.f32 %v2136_v3  ;;  %v781_v27 = vpop.f32.mrf.mxu3  ;;  %v1354_v42 = vsel %vm3832_vm6, %v3785_v51, %v1350_v0  ;;  %v848_v34 = vadd.f32 %v3438_v10, %v779_v18 }
 0x1ba   :  { %2371 = vrcp.f32 %v3822_v46  ;;  %v654_v16 = vpop.f32.mrf.mxu1  ;;  %v2368_v22 = vpop.eup %2367  ;;  %v1599_v41 = vmul.f32 %v3845_v26, %v1583_v11  ;;  %v1359_v37 = vsel %vm1356_vm7, %v1358_v44, %v1354_v42  ;;  %v782_v8 = vadd.f32 %v781_v27, %v4401_v53  ;;  %v4406_v53 = vld [vmem:[#allocation36_spill] sm:$0xff] }
 0x1bb   :  { %v1363_v38 = vsub.f32 1.0, %v1362_v17  ;;  %v655_v23 = vadd.f32 %v654_v16, %v4399_v49  ;;  %v1536_v6 = vsub.f32 1.0, %v1359_v37  ;;  %2373 = vtanh.f32 %v1505_v59  ;;  %v4405_v16 = vld [vmem:[#allocation37_spill] sm:$0xff] }
 0x1bc   :  { %1663 = vmatmul.f32.gmra.mxu0 %v1599_v41  ;;  %vm1367_vm8 = vweird.f32 %v3819_v9  ;;  %v1370_v7 = vand.u32 2147483647, %v3787_v2  ;;  %v1372_v28 = vand.u32 2147483648, %v3787_v2  ;;  %v1568_v55 = vmul.f32 %v2457_v35, %v1359_v37 }
 0x1bd   :  { %v854_v51 = vadd.f32 %v3343_v47, %v655_v23  ;;  %v1364_v43 = vmul.f32 %v3819_v9, %v1363_v38  ;;  %v1552_v1 = vmul.f32 %v2368_v22, %v1536_v6  ;;  %v1490_v4 = vmul.f32 %v3495_v60, %v848_v34  ;;  %v3881_v23 = vld [vmem:[#allocation2 + $0x38] sm:$0xff] }
 0x1be   :  { %v717_v0 = vadd.f32 %v716_v12, %v4402_v62  ;;  %vm1366_vm9 = vweird.f32 %v3787_v2  ;;  %vm1153_vm10 = vweird.f32 %v3644_v29  ;;  %v852_v15 = vadd.f32 %v3438_v10, %v782_v8 }
 0x1bf   :  { %v2370_v52 = vpop.eup %2369  ;;  %v2137_v25 = vmul.f32 -1.442695, %v854_v51  ;;  %v1365_v20 = vadd.f32 %v3819_v9, %v1364_v43  ;;  %v1584_v27 = vadd.f32 %v1568_v55, %v1552_v1  ;;  %vm3868_vm11 = vmor %vm1366_vm9, %vm1367_vm8  ;;  %v847_v12 = vadd.f32 %v3451_v56, %v714_v31 }
 0x1c0   :  { %v3855_v3 = vpop.eup %2371  ;;  %v3858_v63 = vadd.f32 1.0, %v2370_v52  ;;  %v719_v18 = vpop.f32.mrf.mxu2  ;;  %v1373_v61 = vor.u32 1.1754944e-38, %v1372_v28  ;;  %vm1152_vm12 = vweird.f32 %v3564_v30  ;;  %vm1371_vm13 = vcmp.eq.f32.partialorder %v1370_v7, 8.507059e+37  ;;  %v2459_v28 = vld [vmem:[#allocation5 + $0x40] sm:$0xff] }
 0x1c1   :  { %v1377_v54 = vmul.f32 %v3855_v3, %v3822_v46  ;;  %2375 = vpow2.f32 %v2137_v25  ;;  %v784_v17 = vpop.f32.mrf.mxu3  ;;  %v1369_v11 = vsel %vm3868_vm11, %v3819_v9, %v1365_v20  ;;  %v1150_v44 = vmul.f32 %v3644_v29, %v1149_v40  ;;  %v2374_v22 = vpop.eup %2373  ;;  %vm3922_vm3 = vmor %vm1152_vm12, %vm1153_vm10 }
 0x1c2   :  { %2377 = vrcp.f32 %v3858_v63  ;;  %v657_v2 = vpop.f32.mrf.mxu1  ;;  %v1506_v38 = vadd.f32 %v1490_v4, %v847_v12  ;;  %v851_v49 = vadd.f32 %v3451_v56, %v717_v0  ;;  %v1600_v50 = vmul.f32 %v3881_v23, %v1584_v27 }
 0x1c3   :  { %v1378_v59 = vsub.f32 1.0, %v1377_v54  ;;  %v658_v42 = vadd.f32 %v657_v2, %v4405_v16  ;;  %v1374_v31 = vsel %vm1371_vm13, %v1373_v61, %v1369_v11  ;;  %v1491_v9 = vmul.f32 %v3509_v14, %v852_v15  ;;  %v4411_v2 = vld [vmem:[#allocation40_spill] sm:$0xff]  ;;  %v3928_v16 = vld [vmem:[#allocation2 + $0x40] sm:$0xff] }
 0x1c4   :  { %v1537_v41 = vsub.f32 1.0, %v1374_v31  ;;  %v785_v8 = vadd.f32 %v784_v17, %v4406_v53  ;;  %1666 = vmatmul.f32.gmra.mxu0 %v1600_v50  ;;  %vm1382_vm14 = vweird.f32 %v3855_v3  ;;  %v1385_v40 = vand.u32 2147483647, %v3822_v46 }
 0x1c5   :  { %v858_v34 = vadd.f32 %v3343_v47, %v658_v42  ;;  %v1379_v37 = vmul.f32 %v3855_v3, %v1378_v59  ;;  %v1387_v51 = vand.u32 2147483648, %v3822_v46  ;;  %v1569_v52 = vmul.f32 %v2459_v28, %v1374_v31  ;;  %v4414_v59 = vld [vmem:[#allocation35_spill] sm:$0xff] }
 0x1c6   :  { %v1553_v7 = vmul.f32 %v2374_v22, %v1537_v41  ;;  %2379 = vtanh.f32 %v1506_v38  ;;  %vm1381_vm15 = vweird.f32 %v3822_v46  ;;  %v1151_v35 = vadd.f32 %v3644_v29, %v1150_v44 }
 0x1c7   :  { %v2376_v6 = vpop.eup %2375  ;;  %v2138_v43 = vmul.f32 -1.442695, %v858_v34  ;;  %v1380_v14 = vadd.f32 %v3855_v3, %v1379_v37  ;;  %v1507_v20 = vadd.f32 %v1491_v9, %v851_v49  ;;  %vm3902_vm0 = vmor %vm1381_vm15, %vm1382_vm14  ;;  %v856_v54 = vadd.f32 %v3438_v10, %v785_v8 }
 0x1c8   :  { %v3892_v25 = vpop.eup %2377  ;;  %v3894_v1 = vadd.f32 1.0, %v2376_v6  ;;  %v1585_v62 = vadd.f32 %v1569_v52, %v1553_v7  ;;  %v1388_v17 = vor.u32 1.1754944e-38, %v1387_v51  ;;  %vm3913_vm1 = vcmp.eq.f32.partialorder %v1156_v33, 8.507059e+37  ;;  %v722_v12 = vpop.f32.mrf.mxu2 }
 0x1c9   :  { %v1392_v55 = vmul.f32 %v3892_v25, %v3858_v63  ;;  %2381 = vpow2.f32 %v2138_v43  ;;  %v787_v4 = vpop.f32.mrf.mxu3  ;;  %v1384_v15 = vsel %vm3902_vm0, %v3855_v3, %v1380_v14  ;;  %vm1386_vm2 = vcmp.eq.f32.partialorder %v1385_v40, 8.507059e+37 }
 0x1ca   :  { %2383 = vrcp.f32 %v3894_v1  ;;  %v660_v46 = vpop.f32.mrf.mxu1  ;;  %v1173_v3 = vand.u32 2147483648, %v3717_v24  ;;  %v720_v33 = vadd.f32 %v719_v18, %v4414_v59  ;;  %v1601_v42 = vmul.f32 %v3928_v16, %v1585_v62 }
 0x1cb   :  { %v1393_v60 = vsub.f32 1.0, %v1392_v55  ;;  %v661_v11 = vadd.f32 %v660_v46, %v4411_v2  ;;  %v1389_v44 = vsel %vm1386_vm2, %v1388_v17, %v1384_v15  ;;  %v1155_v22 = vsel %vm3922_vm3, %v3644_v29, %v1151_v35  ;;  %v2461_v29 = vld [vmem:[#allocation5 + $0x48] sm:$0xff]  ;;  %v4419_v17 = vld [vmem:[#allocation38_spill] sm:$0xff] }
 0x1cc   :  { %2385 = vtanh.f32 %v1507_v20  ;;  %v1538_v38 = vsub.f32 1.0, %v1389_v44  ;;  %v2380_v50 = vpop.eup %2379  ;;  %v1492_v31 = vmul.f32 %v3538_v13, %v856_v54  ;;  %1669 = vmatmul.f32.gmra.mxu0 %v1601_v42  ;;  %vm1397_vm4 = vweird.f32 %v3892_v25  ;;  %v4415_v13 = vld [vmem:[#allocation39_spill] sm:$0xff] }
 0x1cd   :  { %v862_v30 = vadd.f32 %v3343_v47, %v661_v11  ;;  %v1394_v49 = vmul.f32 %v3892_v25, %v1393_v60  ;;  %v1400_v18 = vand.u32 2147483647, %v3858_v63  ;;  %v1402_v9 = vand.u32 2147483648, %v3858_v63  ;;  %v4418_v54 = vld [vmem:[#allocation43_spill] sm:$0xff] }
 0x1ce   :  { %v1554_v37 = vmul.f32 %v2380_v50, %v1538_v38  ;;  %v1570_v53 = vmul.f32 %v2461_v29, %v1389_v44  ;;  %v855_v51 = vadd.f32 %v3451_v56, %v720_v33  ;;  %v788_v43 = vadd.f32 %v787_v4, %v4415_v13  ;;  %v3972_v11 = vld [vmem:[#allocation2 + $0x48] sm:$0xff]  ;;  %v4420_v33 = vld [vmem:[#allocation42_spill] sm:$0xff]  ;;  %v2463_v50 = vld [vmem:[#allocation5 + $0x50] sm:$0xff] }
 0x1cf   :  { %v2382_v34 = vpop.eup %2381  ;;  %v2139_v41 = vmul.f32 -1.442695, %v862_v30  ;;  %v1395_v8 = vadd.f32 %v3892_v25, %v1394_v49  ;;  %vm1396_vm5 = vweird.f32 %v3858_v63  ;;  %v3958_v35 = vmul.f32 %v3826_v36, %v3717_v24 }
 0x1d0   :  { %v3941_v40 = vpop.eup %2383  ;;  %v3944_v6 = vadd.f32 1.0, %v2382_v34  ;;  %v1586_v52 = vadd.f32 %v1570_v53, %v1554_v37  ;;  %vm3952_vm6 = vmor %vm1396_vm5, %vm1397_vm4  ;;  %v1508_v55 = vadd.f32 %v1492_v31, %v855_v51  ;;  %v1403_v4 = vor.u32 1.1754944e-38, %v1402_v9  ;;  %v725_v59 = vpop.f32.mrf.mxu2  ;;  %v4421_v37 = vld [vmem:[#allocation41_spill] sm:$0xff] }
 0x1d1   :  { %v1407_v7 = vmul.f32 %v3941_v40, %v3894_v1  ;;  %2387 = vpow2.f32 %v2139_v41  ;;  %v790_v28 = vpop.f32.mrf.mxu3  ;;  %v1399_v20 = vsel %vm3952_vm6, %v3892_v25, %v1395_v8  ;;  %v3968_v15 = vsel %vm3913_vm1, %v3683_v58, %v1155_v22 }
 0x1d2   :  { %2389 = vrcp.f32 %v3944_v6  ;;  %v663_v63 = vpop.f32.mrf.mxu1  ;;  %v2386_v62 = vpop.eup %2385  ;;  %vm1401_vm7 = vcmp.eq.f32.partialorder %v1400_v18, 8.507059e+37  ;;  %v723_v60 = vadd.f32 %v722_v12, %v4419_v17  ;;  %v860_v2 = vadd.f32 %v3438_v10, %v788_v43 }
 0x1d3   :  { %v1408_v0 = vsub.f32 1.0, %v1407_v7  ;;  %v664_v46 = vadd.f32 %v663_v63, %v4418_v54  ;;  %v1602_v61 = vmul.f32 %v3972_v11, %v1586_v52  ;;  %v1404_v25 = vsel %vm1401_vm7, %v1403_v4, %v1399_v20 }
 0x1d4   :  { %v791_v42 = vadd.f32 %v790_v28, %v4420_v33  ;;  %v1539_v30 = vsub.f32 1.0, %v1404_v25  ;;  %2391 = vtanh.f32 %v1508_v55  ;;  %vm1412_vm8 = vweird.f32 %v3941_v40 }
 0x1d5   :  { %v866_v44 = vadd.f32 %v3343_v47, %v664_v46  ;;  %v1409_v27 = vmul.f32 %v3941_v40, %v1408_v0  ;;  %1672 = vmatmul.f32.gmra.mxu0 %v1602_v61  ;;  %v1415_v58 = vand.u32 2147483647, %v3894_v1  ;;  %v1417_v12 = vand.u32 2147483648, %v3894_v1 }
 0x1d6   :  { %v1555_v49 = vmul.f32 %v2386_v62, %v1539_v30  ;;  %v1571_v31 = vmul.f32 %v2463_v50, %v1404_v25  ;;  %v1493_v34 = vmul.f32 %v3621_v48, %v860_v2  ;;  %v726_v29 = vadd.f32 %v725_v59, %v4421_v37  ;;  %v4006_v62 = vld [vmem:[#allocation2 + $0x50] sm:$0xff] }
 0x1d7   :  { %v2388_v22 = vpop.eup %2387  ;;  %v2140_v38 = vmul.f32 -1.442695, %v866_v44  ;;  %v1410_v18 = vadd.f32 %v3941_v40, %v1409_v27  ;;  %vm1411_vm9 = vweird.f32 %v3894_v1  ;;  %v864_v8 = vadd.f32 %v3438_v10, %v791_v42  ;;  %v2465_v42 = vld [vmem:[#allocation5 + $0x58] sm:$0xff] }
 0x1d8   :  { %v3982_v9 = vpop.eup %2389  ;;  %v3985_v41 = vadd.f32 1.0, %v2388_v22  ;;  %v1587_v13 = vadd.f32 %v1571_v31, %v1555_v49  ;;  %vm3994_vm10 = vmor %vm1411_vm9, %vm1412_vm8  ;;  %v859_v48 = vadd.f32 %v3451_v56, %v723_v60  ;;  %v1418_v28 = vor.u32 1.1754944e-38, %v1417_v12  ;;  %v728_v59 = vpop.f32.mrf.mxu2 }
 0x1d9   :  { %v1422_v53 = vmul.f32 %v3982_v9, %v3944_v6  ;;  %2393 = vpow2.f32 %v2140_v38  ;;  %v793_v51 = vpop.f32.mrf.mxu3  ;;  %v1414_v1 = vsel %vm3994_vm10, %v3941_v40, %v1410_v18  ;;  %v1164_v55 = vsub.f32 1.0, %v3958_v35 }
 0x1da   :  { %2395 = vrcp.f32 %v3985_v41  ;;  %v666_v7 = vpop.f32.mrf.mxu1  ;;  %vm1416_vm11 = vcmp.eq.f32.partialorder %v1415_v58, 8.507059e+37  ;;  %v2392_v63 = vpop.eup %2391  ;;  %v1509_v20 = vadd.f32 %v1493_v34, %v859_v48  ;;  %v863_v4 = vadd.f32 %v3451_v56, %v726_v29  ;;  %v4425_v29 = vld [vmem:[#allocation44_spill] sm:$0xff] }
 0x1db   :  { %v1423_v52 = vsub.f32 1.0, %v1422_v53  ;;  %v667_v14 = vadd.f32 %v666_v7, %v3261_v21  ;;  %v1603_v0 = vmul.f32 %v4006_v62, %v1587_v13  ;;  %v1419_v54 = vsel %vm1416_vm11, %v1418_v28, %v1414_v1  ;;  %v4424_v21 = vld [vmem:[#allocation45_spill] sm:$0xff]  ;;  %v4426_v28 = vld [vmem:[#allocation47_spill] sm:$0xff] }
 0x1dc   :  { %v1494_v46 = vmul.f32 %v3810_v5, %v864_v8  ;;  %v1540_v17 = vsub.f32 1.0, %v1419_v54  ;;  %v794_v2 = vadd.f32 %v793_v51, %v4424_v21  ;;  %vm1167_vm12 = vweird.f32 %v3717_v24 }
 0x1dd   :  { %v870_v40 = vadd.f32 %v3343_v47, %v667_v14  ;;  %v1424_v60 = vmul.f32 %v3982_v9, %v1423_v52  ;;  %1675 = vmatmul.f32.gmra.mxu0 %v1603_v0  ;;  %vm1427_vm13 = vweird.f32 %v3982_v9  ;;  %v1430_v35 = vand.u32 2147483647, %v3944_v6 }
 0x1de   :  { %v1432_v61 = vand.u32 2147483648, %v3944_v6  ;;  %v1556_v5 = vmul.f32 %v2392_v63, %v1540_v17  ;;  %v1572_v47 = vmul.f32 %v2465_v42, %v1419_v54  ;;  %2397 = vtanh.f32 %v1509_v20 }
 0x1df   :  { %v2394_v25 = vpop.eup %2393  ;;  %v2141_v33 = vmul.f32 -1.442695, %v870_v40  ;;  %v1425_v44 = vadd.f32 %v3982_v9, %v1424_v60  ;;  %v1165_v58 = vmul.f32 %v3826_v36, %v1164_v55  ;;  %vm1426_vm14 = vweird.f32 %v3944_v6  ;;  %v4029_v6 = vld [vmem:[#allocation2 + $0x58] sm:$0xff] }
 0x1e0   :  { %v2396_v30 = vpop.eup %2395  ;;  %v4018_v27 = vadd.f32 1.0, %v2394_v25  ;;  %v1510_v22 = vadd.f32 %v1494_v46, %v863_v4  ;;  %v1588_v38 = vadd.f32 %v1572_v47, %v1556_v5  ;;  %vm1428_vm15 = vmor %vm1426_vm14, %vm1427_vm13  ;;  %v868_v49 = vadd.f32 %v3438_v10, %v794_v2  ;;  %v2467_v4 = vld [vmem:[#allocation5 + $0x60] sm:$0xff]  ;;  %v731_v21 = vpop.f32.mrf.mxu2 }
 0x1e1   :  { %v1437_v12 = vmul.f32 %v2396_v30, %v3985_v41  ;;  %2399 = vpow2.f32 %v2141_v33  ;;  %v1429_v50 = vsel %vm1428_vm15, %v3982_v9, %v1425_v44  ;;  %v1433_v31 = vor.u32 1.1754944e-38, %v1432_v61  ;;  %v796_v34 = vpop.f32.mrf.mxu3  ;;  %v4429_v47 = vld [vmem:[#allocation46_spill] sm:$0xff] }
 0x1e2   :  { %2401 = vrcp.f32 %v4018_v27  ;;  %vm1168_vm0 = vweird.f32 %v3826_v36  ;;  %v1604_v37 = vmul.f32 %v4029_v6, %v1588_v38  ;;  %vm1431_vm1 = vcmp.eq.f32.partialorder %v1430_v35, 8.507059e+37 }
 0x1e3   :  { %v1438_v18 = vsub.f32 1.0, %v1437_v12  ;;  %v729_v53 = vadd.f32 %v728_v59, %v4425_v29  ;;  %v1166_v8 = vadd.f32 %v3826_v36, %v1165_v58  ;;  %v1434_v51 = vsel %vm1431_vm1, %v1433_v31, %v1429_v50  ;;  %vm4044_vm3 = vmor %vm1167_vm12, %vm1168_vm0 }
 0x1e4   :  { %v1447_v13 = vand.u32 2147483648, %v3985_v41  ;;  %v1541_v43 = vsub.f32 1.0, %v1434_v51  ;;  %vm1442_vm2 = vweird.f32 %v2396_v30  ;;  %v1445_v9 = vand.u32 2147483647, %v3985_v41  ;;  %v2398_v7 = vpop.eup %2397 }
 0x1e5   :  { %v1439_v48 = vmul.f32 %v2396_v30, %v1438_v18  ;;  %2403 = vtanh.f32 %v1510_v22  ;;  %v1495_v1 = vmul.f32 %v3968_v15, %v868_v49  ;;  %v797_v52 = vadd.f32 %v796_v34, %v4426_v28  ;;  %1678 = vmatmul.f32.gmra.mxu0 %v1604_v37 }
 0x1e6   :  { %v1174_v14 = vor.u32 1.1754944e-38, %v1173_v3  ;;  %v1557_v20 = vmul.f32 %v2398_v7, %v1541_v43  ;;  %v1573_v0 = vmul.f32 %v2467_v4, %v1434_v51  ;;  %vm1441_vm4 = vweird.f32 %v3985_v41  ;;  %v4076_v4 = vld [vmem:[#allocation2 + $0x70] sm:$0xff] }
 0x1e7   :  { %v2400_v55 = vpop.eup %2399  ;;  %v1440_v54 = vadd.f32 %v2396_v30, %v1439_v48  ;;  %v867_v46 = vadd.f32 %v3451_v56, %v729_v53  ;;  %v1170_v40 = vsel %vm4044_vm3, %v3826_v36, %v1166_v8  ;;  %vm1443_vm5 = vmor %vm1441_vm4, %vm1442_vm2  ;;  %v1448_v17 = vor.u32 1.1754944e-38, %v1447_v13  ;;  %v4061_v36 = vld [vmem:[#allocation2 + $0x60] sm:$0xff]  ;;  %v4070_v8 = vld [vmem:[#allocation2 + $0x68] sm:$0xff] }
 0x1e8   :  { %v2402_v15 = vpop.eup %2401  ;;  %v4050_v3 = vadd.f32 1.0, %v2400_v55  ;;  %v1589_v2 = vadd.f32 %v1573_v0, %v1557_v20  ;;  %vm1446_vm6 = vcmp.eq.f32.partialorder %v1445_v9, 8.507059e+37  ;;  %v872_v41 = vadd.f32 %v3438_v10, %v797_v52  ;;  %v2469_v10 = vld [vmem:[#allocation5 + $0x68] sm:$0xff] }
 0x1e9   :  { %v1452_v60 = vmul.f32 %v2402_v15, %v4018_v27  ;;  %v1444_v35 = vsel %vm1443_vm5, %v2396_v30, %v1440_v54  ;;  %v1511_v61 = vadd.f32 %v1495_v1, %v867_v46  ;;  %vm1172_vm7 = vcmp.eq.f32.partialorder %v1171_v57, 8.507059e+37  ;;  %v2471_v1 = vld [vmem:[#allocation5 + $0x70] sm:$0xff] }
 0x1ea   :  { %2405 = vrcp.f32 %v4050_v3  ;;  %v1449_v25 = vsel %vm1446_vm6, %v1448_v17, %v1444_v35  ;;  %v1605_v33 = vmul.f32 %v4061_v36, %v1589_v2  ;;  %v732_v44 = vadd.f32 %v731_v21, %v4429_v47  ;;  %v2473_v17 = vld [vmem:[#allocation5 + $0x78] sm:$0xff] }
 0x1eb   :  { %v1453_v59 = vsub.f32 1.0, %v1452_v60  ;;  %v1542_v5 = vsub.f32 1.0, %v1449_v25  ;;  %v2404_v42 = vpop.eup %2403  ;;  %v1175_v30 = vsel %vm1172_vm7, %v1174_v14, %v1170_v40  ;;  %v1460_v58 = vand.u32 2147483647, %v4018_v27  ;;  %v4079_v2 = vld [vmem:[#allocation2 + $0x78] sm:$0xff] }
 0x1ec   :  { %v1462_v12 = vand.u32 2147483648, %v4018_v27  ;;  %v1574_v38 = vmul.f32 %v2469_v10, %v1449_v25  ;;  %vm1457_vm8 = vweird.f32 %v2402_v15  ;;  %2407 = vtanh.f32 %v1511_v61  ;;  %v4085_v61 = vld [vmem:[%s4294_s6] ss:$0 sm:$0xff]  ;;  %v4106_v10 = vld [vmem:[#allocation2 + $0x8] sm:$0xff]  ;;  %s2672_s6 = smov [#allocation13]  }
 0x1ed   :  { %v1558_v22 = vmul.f32 %v2404_v42, %v1542_v5  ;;  %v1454_v49 = vmul.f32 %v2402_v15, %v1453_v59  ;;  %v1496_v24 = vmul.f32 %v1175_v30, %v872_v41  ;;  %1681 = vmatmul.f32.gmra.mxu0 %v1605_v33  ;;  %vm1456_vm9 = vweird.f32 %v4018_v27  ;;  %v4092_v33 = vld [vmem:[#allocation2] sm:$0xff]  ;;  %s2092_s29 = sshll.u32 %s2672_s6, 4  ;;  %s2093_s29 = int_to_ptr.vmem [resolvable:$true] %s2092_s29 }
 0x1ee   :  { %v871_v18 = vadd.f32 %v3451_v56, %v732_v44  ;;  %vm1458_vm10 = vmor %vm1456_vm9, %vm1457_vm8  ;;  %v1463_v34 = vor.u32 1.1754944e-38, %v1462_v12  ;;  %vm1461_vm11 = vcmp.eq.f32.partialorder %v1460_v58, 8.507059e+37  ;;  %v1475_v27 = vand.u32 2147483647, %v4050_v3 }
 0x1ef   :  { %v1590_v57 = vadd.f32 %v1574_v38, %v1558_v22  ;;  %v1455_v50 = vadd.f32 %v2402_v15, %v1454_v49  ;;  %v1477_v7 = vand.u32 2147483648, %v4050_v3  ;;  %vm1471_vm13 = vweird.f32 %v4050_v3 }
 0x1f0   :  { %v2406_v31 = vpop.eup %2405  ;;  %v1512_v53 = vadd.f32 %v1496_v24, %v871_v18  ;;  %vm1476_vm15 = vcmp.eq.f32.partialorder %v1475_v27, 8.507059e+37  ;;  %v1758_v35 = vlaneseq }
 0x1f1   :  { %v1467_v37 = vmul.f32 %v2406_v31, %v4050_v3  ;;  %v1459_v29 = vsel %vm1458_vm10, %v2402_v15, %v1455_v50  ;;  %v1606_v51 = vmul.f32 %v4070_v8, %v1590_v57  ;;  %vm1472_vm12 = vweird.f32 %v2406_v31 }
 0x1f2   :  { %v1464_v13 = vsel %vm1461_vm11, %v1463_v34, %v1459_v29  ;;  %v2408_v9 = vpop.eup %2407  ;;  %2409 = vtanh.f32 %v1512_v53  ;;  %vm1473_vm14 = vmor %vm1471_vm13, %vm1472_vm12  ;;  %v1478_v63 = vor.u32 1.1754944e-38, %v1477_v7  ;;  %v4087_v41 = vand.u32 127, %v1758_v35 }
 0x1f3   :  { %v1468_v43 = vsub.f32 1.0, %v1467_v37  ;;  %v1543_v48 = vsub.f32 1.0, %v1464_v13  ;;  %v1575_v28 = vmul.f32 %v2471_v1, %v1464_v13 }
 0x1f4   :  { %vm1760_vm0 = vcmp.ge.s32.totalorder %v4087_v41, 32  ;;  %vm1761_vm1 = vcmp.lt.s32.totalorder %v4087_v41, 64 }
 0x1f5   :  { %v1559_v56 = vmul.f32 %v2408_v9, %v1543_v48  ;;  %v1469_v52 = vmul.f32 %v2406_v31, %v1468_v43  ;;  %1684 = vmatmul.f32.gmra.mxu0 %v1606_v51  ;;  %vm4095_vm3 = vmand %vm1760_vm0, %vm1761_vm1 }
 0x1f7   :  { %v1591_v14 = vadd.f32 %v1575_v28, %v1559_v56  ;;  %v1470_v55 = vadd.f32 %v2406_v31, %v1469_v52 }
 0x1f8   :  { %v2410_v46 = vpop.eup %2409 }
 0x1f9   :  { %v1474_v20 = vsel %vm1473_vm14, %v2406_v31, %v1470_v55  ;;  %v1607_v0 = vmul.f32 %v4076_v4, %v1591_v14 }
 0x1fa   :  { %v1479_v54 = vsel %vm1476_vm15, %v1478_v63, %v1474_v20 }
 0x1fb   :  { %v1544_v15 = vsub.f32 1.0, %v1479_v54  ;;  %v1576_v60 = vmul.f32 %v2473_v17, %v1479_v54 }
 0x1fd   :  { %v1560_v40 = vmul.f32 %v2410_v46, %v1544_v15  ;;  %1687 = vmatmul.f32.gmra.mxu0 %v1607_v0 }
 0x1ff   :  { %v1592_v21 = vadd.f32 %v1576_v60, %v1560_v40 }
 0x201   :  { %v1608_v3 = vmul.f32 %v4079_v2, %v1592_v21 }
 0x205   :  { %1690 = vmatmul.f32.gmra.mxu0 %v1608_v3 }
 0x208   :  { %v1646_v25 = vpop.f32.mrf.mxu0 }
 0x209   :  { %v1647_v59 = vadd.f32 %v4085_v61, %v1646_v25 }
 0x20b   :  { %v1694_v5 = vadd.f32 %v4092_v33, %v1647_v59 }
 0x20d   :  { %vm1710_vm2 = vcmp.ge.f32.partialorder %v1694_v5, 0.0  ;;  %v1726_v42 = vmul.f32 0.2, %v1694_v5 }
 0x20f   :  { %v1742_v44 = vsel %vm1710_vm2, %v1694_v5, %v1726_v42 }
 0x210   :  { %v4101_v30 = vsel %vm4095_vm3, %v1742_v44, 0.0  ;;  %v1649_v58 = vpop.f32.mrf.mxu0 }
 0x211   :  { %v1781_v12 = vmul.f32 %v4101_v30, %v4101_v30  ;;  %v1650_v22 = vadd.f32 %v4085_v61, %v1649_v58 }
 0x213   :  { %1797 = vadd.xlane.f32.xlu0 %v1781_v12  ;;  %v1695_v38 = vadd.f32 %v4106_v10, %v1650_v22 }
 0x215   :  { %v1727_v49 = vmul.f32 0.2, %v1695_v38  ;;  %vm1711_vm4 = vcmp.ge.f32.partialorder %v1695_v38, 0.0 }
 0x217   :  { %v1743_v24 = vsel %vm1711_vm4, %v1695_v38, %v1727_v49 }
 0x218   :  { %v1652_v57 = vpop.f32.mrf.mxu0  ;;  %v4111_v50 = vsel %vm4095_vm3, %v1743_v24, 0.0 }
 0x219   :  { %v1653_v31 = vadd.f32 %v4085_v61, %v1652_v57  ;;  %v1782_v18 = vmul.f32 %v4111_v50, %v4111_v50 }
 0x21b   :  { %v1696_v34 = vadd.f32 %v3674_v32, %v1653_v31  ;;  %1799 = vadd.xlane.f32.xlu0 %v1782_v18 }
 0x21d   :  { %vm1712_vm5 = vcmp.ge.f32.partialorder %v1696_v34, 0.0  ;;  %v1728_v37 = vmul.f32 0.2, %v1696_v34 }
 0x21f   :  { %v1744_v29 = vsel %vm1712_vm5, %v1696_v34, %v1728_v37 }
 0x220   :  { %v4119_v53 = vsel %vm4095_vm3, %v1744_v29, 0.0  ;;  %v1655_v13 = vpop.f32.mrf.mxu0 }
 0x221   :  { %v1783_v51 = vmul.f32 %v4119_v53, %v4119_v53  ;;  %v1656_v43 = vadd.f32 %v4085_v61, %v1655_v13 }
 0x223   :  { %1801 = vadd.xlane.f32.xlu1 %v1783_v51  ;;  %v1697_v48 = vadd.f32 %v3723_v39, %v1656_v43 }
 0x225   :  { %v1729_v9 = vmul.f32 0.2, %v1697_v48  ;;  %vm1713_vm6 = vcmp.ge.f32.partialorder %v1697_v48, 0.0 }
 0x227   :  { %v1745_v32 = vsel %vm1713_vm6, %v1697_v48, %v1729_v9 }
 0x228   :  { %v4127_v7 = vsel %vm4095_vm3, %v1745_v32, 0.0 }
 0x229   :  { %v1658_v27 = vpop.f32.mrf.mxu0  ;;  %v1784_v1 = vmul.f32 %v4127_v7, %v4127_v7 }
 0x22a   :  { %v1659_v56 = vadd.f32 %v4085_v61, %v1658_v27 }
 0x22b   :  { %1803 = vadd.xlane.f32.xlu1 %v1784_v1 }
 0x22c   :  { %v1698_v28 = vadd.f32 %v3774_v19, %v1659_v56 }
 0x22e   :  { %vm1714_vm7 = vcmp.ge.f32.partialorder %v1698_v28, 0.0  ;;  %v1730_v52 = vmul.f32 0.2, %v1698_v28 }
 0x230   :  { %v1746_v14 = vsel %vm1714_vm7, %v1698_v28, %v1730_v52  ;;  %vm2021_vm7 = vcmp.lt.s32.totalorder %v4087_v41, 32 }
 0x231   :  { %v1661_v39 = vpop.f32.mrf.mxu0  ;;  %v4135_v55 = vsel %vm4095_vm3, %v1746_v14, 0.0 }
 0x232   :  { %v1662_v63 = vadd.f32 %v4085_v61, %v1661_v39  ;;  %v1785_v20 = vmul.f32 %v4135_v55, %v4135_v55 }
 0x234   :  { %v1699_v0 = vadd.f32 %v3804_v45, %v1662_v63  ;;  %1805 = vadd.xlane.f32.xlu2 %v1785_v20 }
 0x236   :  { %v1731_v54 = vmul.f32 0.2, %v1699_v0  ;;  %vm1715_vm8 = vcmp.ge.f32.partialorder %v1699_v0, 0.0 }
 0x238   :  { %v1747_v19 = vsel %vm1715_vm8, %v1699_v0, %v1731_v54 }
 0x239   :  { %v1664_v15 = vpop.f32.mrf.mxu0  ;;  %v4143_v46 = vsel %vm4095_vm3, %v1747_v19, 0.0 }
 0x23a   :  { %v1665_v40 = vadd.f32 %v4085_v61, %v1664_v15  ;;  %v1786_v17 = vmul.f32 %v4143_v46, %v4143_v46 }
 0x23c   :  { %v1700_v60 = vadd.f32 %v3845_v26, %v1665_v40  ;;  %1807 = vadd.xlane.f32.xlu2 %v1786_v17 }
 0x23e   :  { %v1732_v21 = vmul.f32 0.2, %v1700_v60  ;;  %vm1716_vm9 = vcmp.ge.f32.partialorder %v1700_v60, 0.0 }
 0x240   :  { %v1748_v45 = vsel %vm1716_vm9, %v1700_v60, %v1732_v21 }
 0x241   :  { %v1667_v3 = vpop.f32.mrf.mxu0  ;;  %v4151_v35 = vsel %vm4095_vm3, %v1748_v45, 0.0 }
 0x242   :  { %v1668_v25 = vadd.f32 %v4085_v61, %v1667_v3  ;;  %v1787_v59 = vmul.f32 %v4151_v35, %v4151_v35 }
 0x244   :  { %v1701_v5 = vadd.f32 %v3881_v23, %v1668_v25  ;;  %1809 = vadd.xlane.f32.xlu0 %v1787_v59 }
 0x246   :  { %v1733_v42 = vmul.f32 0.2, %v1701_v5  ;;  %vm1717_vm10 = vcmp.ge.f32.partialorder %v1701_v5, 0.0 }
 0x248   :  { %v1749_v26 = vsel %vm1717_vm10, %v1701_v5, %v1733_v42 }
 0x249   :  { %v1670_v44 = vpop.f32.mrf.mxu0  ;;  %v4159_v58 = vsel %vm4095_vm3, %v1749_v26, 0.0 }
 0x24a   :  { %v1671_v12 = vadd.f32 %v4085_v61, %v1670_v44  ;;  %v1788_v22 = vmul.f32 %v4159_v58, %v4159_v58 }
 0x24c   :  { %v1702_v38 = vadd.f32 %v3928_v16, %v1671_v12  ;;  %1811 = vadd.xlane.f32.xlu1 %v1788_v22 }
 0x24e   :  { %v1734_v49 = vmul.f32 0.2, %v1702_v38  ;;  %vm1718_vm11 = vcmp.ge.f32.partialorder %v1702_v38, 0.0 }
 0x250   :  { %v1750_v23 = vsel %vm1718_vm11, %v1702_v38, %v1734_v49 }
 0x251   :  { %v4167_v57 = vsel %vm4095_vm3, %v1750_v23, 0.0 }
 0x252   :  { %v1673_v24 = vpop.f32.mrf.mxu0  ;;  %v1789_v18 = vmul.f32 %v4167_v57, %v4167_v57 }
 0x253   :  { %v1674_v31 = vadd.f32 %v4085_v61, %v1673_v24 }
 0x254   :  { %1813 = vadd.xlane.f32.xlu2 %v1789_v18 }
 0x255   :  { %v1703_v34 = vadd.f32 %v3972_v11, %v1674_v31 }
 0x257   :  { %v1735_v37 = vmul.f32 0.2, %v1703_v34  ;;  %vm1719_vm12 = vcmp.ge.f32.partialorder %v1703_v34, 0.0 }
 0x259   :  { %v1751_v16 = vsel %vm1719_vm12, %v1703_v34, %v1735_v37 }
 0x25a   :  { %v1676_v29 = vpop.f32.mrf.mxu0  ;;  %v4175_v51 = vsel %vm4095_vm3, %v1751_v16, 0.0 }
 0x25b   :  { %v1677_v13 = vadd.f32 %v4085_v61, %v1676_v29  ;;  %v1790_v43 = vmul.f32 %v4175_v51, %v4175_v51 }
 0x25d   :  { %v1704_v48 = vadd.f32 %v4006_v62, %v1677_v13  ;;  %1815 = vadd.xlane.f32.xlu0 %v1790_v43 }
 0x25f   :  { %v1736_v9 = vmul.f32 0.2, %v1704_v48  ;;  %vm1720_vm13 = vcmp.ge.f32.partialorder %v1704_v48, 0.0 }
 0x261   :  { %v1752_v32 = vsel %vm1720_vm13, %v1704_v48, %v1736_v9 }
 0x262   :  { %v1679_v27 = vpop.f32.mrf.mxu0  ;;  %v4183_v56 = vsel %vm4095_vm3, %v1752_v32, 0.0 }
 0x263   :  { %v1680_v1 = vadd.f32 %v4085_v61, %v1679_v27  ;;  %v1791_v28 = vmul.f32 %v4183_v56, %v4183_v56 }
 0x265   :  { %v1705_v52 = vadd.f32 %v4029_v6, %v1680_v1  ;;  %1817 = vadd.xlane.f32.xlu1 %v1791_v28 }
 0x267   :  { %v1737_v14 = vmul.f32 0.2, %v1705_v52  ;;  %vm1721_vm14 = vcmp.ge.f32.partialorder %v1705_v52, 0.0 }
 0x269   :  { %v1753_v39 = vsel %vm1721_vm14, %v1705_v52, %v1737_v14 }
 0x26a   :  { %v1682_v63 = vpop.f32.mrf.mxu0  ;;  %v4191_v20 = vsel %vm4095_vm3, %v1753_v39, 0.0 }
 0x26b   :  { %v1683_v0 = vadd.f32 %v4085_v61, %v1682_v63  ;;  %v1792_v54 = vmul.f32 %v4191_v20, %v4191_v20 }
 0x26d   :  { %v1706_v19 = vadd.f32 %v4061_v36, %v1683_v0  ;;  %1819 = vadd.xlane.f32.xlu2 %v1792_v54 }
 0x26f   :  { %v1738_v15 = vmul.f32 0.2, %v1706_v19  ;;  %vm1722_vm15 = vcmp.ge.f32.partialorder %v1706_v19, 0.0 }
 0x271   :  { %v1754_v40 = vsel %vm1722_vm15, %v1706_v19, %v1738_v15 }
 0x272   :  { %v1685_v17 = vpop.f32.mrf.mxu0  ;;  %v4199_v60 = vsel %vm4095_vm3, %v1754_v40, 0.0 }
 0x273   :  { %v1686_v21 = vadd.f32 %v4085_v61, %v1685_v17  ;;  %v1793_v45 = vmul.f32 %v4199_v60, %v4199_v60 }
 0x275   :  { %v1707_v3 = vadd.f32 %v4070_v8, %v1686_v21  ;;  %1821 = vadd.xlane.f32.xlu0 %v1793_v45 }
 0x277   :  { %v1739_v25 = vmul.f32 0.2, %v1707_v3  ;;  %vm1723_vm0 = vcmp.ge.f32.partialorder %v1707_v3, 0.0 }
 0x279   :  { %v1755_v59 = vsel %vm1723_vm0, %v1707_v3, %v1739_v25 }
 0x27a   :  { %v1688_v5 = vpop.f32.mrf.mxu0  ;;  %v4207_v42 = vsel %vm4095_vm3, %v1755_v59, 0.0  ;;  %v2024_v59 = vsel %vm2021_vm7, %v4092_v33, 0.0 }
 0x27b   :  { %v1689_v26 = vadd.f32 %v4085_v61, %v1688_v5  ;;  %v1794_v44 = vmul.f32 %v4207_v42, %v4207_v42  ;;  %v2025_v5 = vsel %vm2021_vm7, %v4106_v10, 0.0 }
 0x27d   :  { %v1708_v12 = vadd.f32 %v4076_v4, %v1689_v26  ;;  %1823 = vadd.xlane.f32.xlu1 %v1794_v44 }
 0x27f   :  { %v1740_v22 = vmul.f32 0.2, %v1708_v12  ;;  %vm1724_vm1 = vcmp.ge.f32.partialorder %v1708_v12, 0.0 }
 0x281   :  { %v1756_v38 = vsel %vm1724_vm1, %v1708_v12, %v1740_v22 }
 0x282   :  { %v1691_v49 = vpop.f32.mrf.mxu0  ;;  %v4215_v23 = vsel %vm4095_vm3, %v1756_v38, 0.0 }
 0x283   :  { %v1692_v24 = vadd.f32 %v4085_v61, %v1691_v49  ;;  %v1795_v31 = vmul.f32 %v4215_v23, %v4215_v23 }
 0x285   :  { %v1709_v18 = vadd.f32 %v4079_v2, %v1692_v24  ;;  %1825 = vadd.xlane.f32.xlu2 %v1795_v31 }
 0x286   :  { %v1798_v34 = vpop.xlane.xlu0 %1797 }
 0x287   :  { %v1829_v37 = vmax.f32 %v1798_v34, 1e-24  ;;  %v1741_v16 = vmul.f32 0.2, %v1709_v18  ;;  %vm1725_vm2 = vcmp.ge.f32.partialorder %v1709_v18, 0.0 }
 0x289   :  { %2411 = vrsqrt.f32 %v1829_v37  ;;  %v1757_v29 = vsel %vm1725_vm2, %v1709_v18, %v1741_v16  ;;  %vm1851_vm4 = vweird.f32 %v1829_v37 }
 0x28a   :  { %v4223_v13 = vsel %vm4095_vm3, %v1757_v29, 0.0 }
 0x28b   :  { %v1796_v43 = vmul.f32 %v4223_v13, %v4223_v13 }
 0x28d   :  { %1827 = vadd.xlane.f32.xlu0 %v1796_v43 }
 0x28e   :  { %v1800_v48 = vpop.xlane.xlu0 %1799 }
 0x28f   :  { %v2412_v61 = vpop.eup %2411  ;;  %v1830_v32 = vmax.f32 %v1800_v48, 1e-24 }
 0x290   :  { %v1846_v9 = vmul.f32 %v2412_v61, %v1829_v37  ;;  %vm1852_vm3 = vweird.f32 %v2412_v61 }
 0x291   :  { %2413 = vrsqrt.f32 %v1830_v32  ;;  %vm1853_vm5 = vmor %vm1851_vm4, %vm1852_vm3  ;;  %vm1861_vm8 = vweird.f32 %v1830_v32 }
 0x292   :  { %v1847_v27 = vmul.f32 %v2412_v61, %v1846_v9 }
 0x294   :  { %v1848_v1 = vmul.f32 0.5, %v1847_v27 }
 0x296   :  { %v1849_v28 = vsub.f32 1.5, %v1848_v1  ;;  %v1802_v52 = vpop.xlane.xlu1 %1801  ;;  %v2477_v1 = vld [vmem:[#allocation2 + $0x10] sm:$0xff] }
 0x297   :  { %v2414_v14 = vpop.eup %2413  ;;  %v1831_v39 = vmax.f32 %v1802_v52, 1e-24  ;;  %v2478_v52 = vld [vmem:[#allocation2 + $0x18] sm:$0xff] }
 0x298   :  { %v1856_v63 = vmul.f32 %v2414_v14, %v1830_v32  ;;  %v1850_v47 = vmul.f32 %v2412_v61, %v1849_v28  ;;  %vm1862_vm6 = vweird.f32 %v2414_v14  ;;  %v2026_v28 = vsel %vm2021_vm7, %v2477_v1, 0.0 }
 0x299   :  { %2415 = vrsqrt.f32 %v1831_v39  ;;  %vm1863_vm9 = vmor %vm1861_vm8, %vm1862_vm6  ;;  %vm1871_vm11 = vweird.f32 %v1831_v39 }
 0x29a   :  { %v1857_v0 = vmul.f32 %v2414_v14, %v1856_v63  ;;  %v1854_v19 = vsel %vm1853_vm5, %v2412_v61, %v1850_v47 }
 0x29b   :  { %v2005_v3 = vmul.f32 %v1854_v19, %v4101_v30 }
 0x29c   :  { %v1858_v54 = vmul.f32 0.5, %v1857_v0 }
 0x29d   :  { %v2040_v38 = vadd.f32 %v2024_v59, %v2005_v3 }
 0x29e   :  { %v1859_v15 = vsub.f32 1.5, %v1858_v54  ;;  %v1804_v45 = vpop.xlane.xlu1 %1803 }
 0x29f   :  { %v2416_v40 = vpop.eup %2415  ;;  %v1832_v25 = vmax.f32 %v1804_v45, 1e-24 }
 0x2a0   :  { %v1860_v17 = vmul.f32 %v2414_v14, %v1859_v15  ;;  %v1866_v21 = vmul.f32 %v2416_v40, %v1831_v39  ;;  %vm1872_vm10 = vweird.f32 %v2416_v40 }
 0x2a1   :  { %2417 = vrsqrt.f32 %v1832_v25  ;;  %vm1873_vm12 = vmor %vm1871_vm11, %vm1872_vm10  ;;  %vm1881_vm14 = vweird.f32 %v1832_v25 }
 0x2a2   :  { %v1864_v26 = vsel %vm1863_vm9, %v2414_v14, %v1860_v17  ;;  %v1867_v44 = vmul.f32 %v2416_v40, %v1866_v21  ;;  %v2027_v14 = vsel %vm2021_vm7, %v2478_v52, 0.0 }
 0x2a3   :  { %v2006_v12 = vmul.f32 %v1864_v26, %v4111_v50 }
 0x2a4   :  { %v1868_v22 = vmul.f32 0.5, %v1867_v44 }
 0x2a5   :  { %v2041_v49 = vadd.f32 %v2025_v5, %v2006_v12 }
 0x2a6   :  { %v1869_v30 = vsub.f32 1.5, %v1868_v22 }
 0x2a7   :  { %v2145_v24 = vpack.c.bf16 %v2041_v49, %v2040_v38  ;;  %v1806_v31 = vpop.xlane.xlu2 %1805  ;;  %v2418_v18 = vpop.eup %2417 }
 0x2a8   :  { %v1833_v34 = vmax.f32 %v1806_v31, 1e-24  ;;  %v1876_v37 = vmul.f32 %v2418_v18, %v1832_v25  ;;  %v1870_v33 = vmul.f32 %v2416_v40, %v1869_v30  ;;  %vm1882_vm13 = vweird.f32 %v2418_v18  ;;  %v2480_v31 = vld [vmem:[#allocation2 + $0x28] sm:$0xff] }
 0x2a9   :  { %2146 = vst [vmem:[#allocation13] sm:$0xff] %v2145_v24   ;;  %vm1883_vm15 = vmor %vm1881_vm14, %vm1882_vm13  ;;  %v2479_v24 = vld [vmem:[#allocation2 + $0x20] sm:$0xff] }
 0x2aa   :  { %2419 = vrsqrt.f32 %v1833_v34  ;;  %v1877_v16 = vmul.f32 %v2418_v18, %v1876_v37  ;;  %v1874_v29 = vsel %vm1873_vm12, %v2416_v40, %v1870_v33  ;;  %vm1891_vm1 = vweird.f32 %v1833_v34 }
 0x2ab   :  { %v2007_v27 = vmul.f32 %v1874_v29, %v4119_v53  ;;  %v2028_v30 = vsel %vm2021_vm7, %v2479_v24, 0.0 }
 0x2ac   :  { %v1878_v10 = vmul.f32 0.5, %v1877_v16 }
 0x2ad   :  { %v2042_v54 = vadd.f32 %v2026_v28, %v2007_v27 }
 0x2ae   :  { %v1879_v50 = vsub.f32 1.5, %v1878_v10 }
 0x2af   :  { %v1808_v43 = vpop.xlane.xlu2 %1807 }
 0x2b0   :  { %v2420_v61 = vpop.eup %2419  ;;  %v1834_v48 = vmax.f32 %v1808_v43, 1e-24  ;;  %v1880_v9 = vmul.f32 %v2418_v18, %v1879_v50 }
 0x2b1   :  { %v1886_v32 = vmul.f32 %v2420_v61, %v1833_v34  ;;  %vm1892_vm0 = vweird.f32 %v2420_v61 }
 0x2b2   :  { %2421 = vrsqrt.f32 %v1834_v48  ;;  %v1884_v39 = vsel %vm1883_vm15, %v2418_v18, %v1880_v9  ;;  %vm1893_vm2 = vmor %vm1891_vm1, %vm1892_vm0  ;;  %vm1901_vm4 = vweird.f32 %v1834_v48  ;;  %v2029_v18 = vsel %vm2021_vm7, %v2480_v31, 0.0 }
 0x2b3   :  { %v1887_v63 = vmul.f32 %v2420_v61, %v1886_v32  ;;  %v2008_v47 = vmul.f32 %v1884_v39, %v4127_v7 }
 0x2b5   :  { %v1888_v0 = vmul.f32 0.5, %v1887_v63  ;;  %v2043_v19 = vadd.f32 %v2027_v14, %v2008_v47 }
 0x2b7   :  { %v1889_v15 = vsub.f32 1.5, %v1888_v0  ;;  %v1810_v40 = vpop.xlane.xlu0 %1809  ;;  %v2150_v17 = vpack.c.bf16 %v2043_v19, %v2042_v54  ;;  %v2481_v54 = vld [vmem:[#allocation2 + $0x30] sm:$0xff] }
 0x2b8   :  { %v2422_v53 = vpop.eup %2421  ;;  %v1835_v21 = vmax.f32 %v1810_v40, 1e-24  ;;  %v2030_v19 = vsel %vm2021_vm7, %v2481_v54, 0.0 }
 0x2b9   :  { %v1896_v45 = vmul.f32 %v2422_v53, %v1834_v48  ;;  %2182 = vst [vmem:[#allocation13 + $0x8] sm:$0xff] %v2150_v17   ;;  %v1890_v3 = vmul.f32 %v2420_v61, %v1889_v15  ;;  %vm1902_vm3 = vweird.f32 %v2422_v53  ;;  %v2482_v15 = vld [vmem:[#allocation2 + $0x38] sm:$0xff] }
 0x2ba   :  { %2423 = vrsqrt.f32 %v1835_v21  ;;  %vm1903_vm5 = vmor %vm1901_vm4, %vm1902_vm3  ;;  %vm1911_vm8 = vweird.f32 %v1835_v21  ;;  %v2031_v40 = vsel %vm2021_vm7, %v2482_v15, 0.0  ;;  %v2034_v15 = vsel %vm2021_vm7, %v4006_v62, 0.0 }
 0x2bb   :  { %v1897_v25 = vmul.f32 %v2422_v53, %v1896_v45  ;;  %v1894_v5 = vsel %vm1893_vm2, %v2420_v61, %v1890_v3 }
 0x2bc   :  { %v2009_v49 = vmul.f32 %v1894_v5, %v4135_v55 }
 0x2bd   :  { %v1898_v59 = vmul.f32 0.5, %v1897_v25 }
 0x2be   :  { %v2044_v10 = vadd.f32 %v2028_v30, %v2009_v49 }
 0x2bf   :  { %v1899_v26 = vsub.f32 1.5, %v1898_v59  ;;  %v1812_v7 = vpop.xlane.xlu1 %1811 }
 0x2c0   :  { %v2424_v44 = vpop.eup %2423  ;;  %v1836_v12 = vmax.f32 %v1812_v7, 1e-24 }
 0x2c1   :  { %v1900_v22 = vmul.f32 %v2422_v53, %v1899_v26  ;;  %v1906_v38 = vmul.f32 %v2424_v44, %v1835_v21  ;;  %vm1912_vm6 = vweird.f32 %v2424_v44 }
 0x2c2   :  { %2425 = vrsqrt.f32 %v1836_v12  ;;  %vm1913_vm9 = vmor %vm1911_vm8, %vm1912_vm6  ;;  %vm1921_vm11 = vweird.f32 %v1836_v12 }
 0x2c3   :  { %v1904_v34 = vsel %vm1903_vm5, %v2422_v53, %v1900_v22  ;;  %v1907_v37 = vmul.f32 %v2424_v44, %v1906_v38 }
 0x2c4   :  { %v2010_v33 = vmul.f32 %v1904_v34, %v4143_v46 }
 0x2c5   :  { %v1908_v16 = vmul.f32 0.5, %v1907_v37 }
 0x2c6   :  { %v2045_v29 = vadd.f32 %v2029_v18, %v2010_v33  ;;  %v2483_v33 = vld [vmem:[#allocation2 + $0x40] sm:$0xff] }
 0x2c7   :  { %v1909_v50 = vsub.f32 1.5, %v1908_v16  ;;  %v1814_v43 = vpop.xlane.xlu2 %1813  ;;  %v2032_v16 = vsel %vm2021_vm7, %v2483_v33, 0.0 }
 0x2c8   :  { %v2426_v55 = vpop.eup %2425  ;;  %v2155_v61 = vpack.c.bf16 %v2045_v29, %v2044_v10  ;;  %v1837_v48 = vmax.f32 %v1814_v43, 1e-24  ;;  %v2033_v10 = vsel %vm2021_vm7, %v3972_v11, 0.0 }
 0x2c9   :  { %v1916_v9 = vmul.f32 %v2426_v55, %v1836_v12  ;;  %v1910_v32 = vmul.f32 %v2424_v44, %v1909_v50  ;;  %vm1922_vm10 = vweird.f32 %v2426_v55 }
 0x2ca   :  { %2183 = vst [vmem:[#allocation13 + $0x10] sm:$0xff] %v2155_v61   ;;  %2427 = vrsqrt.f32 %v1837_v48  ;;  %vm1923_vm12 = vmor %vm1921_vm11, %vm1922_vm10  ;;  %vm1931_vm14 = vweird.f32 %v1837_v48 }
 0x2cb   :  { %v1917_v27 = vmul.f32 %v2426_v55, %v1916_v9  ;;  %v1914_v28 = vsel %vm1913_vm9, %v2424_v44, %v1910_v32 }
 0x2cc   :  { %v2011_v0 = vmul.f32 %v1914_v28, %v4151_v35 }
 0x2cd   :  { %v1918_v1 = vmul.f32 0.5, %v1917_v27 }
 0x2ce   :  { %v2046_v3 = vadd.f32 %v2030_v19, %v2011_v0 }
 0x2cf   :  { %v1919_v52 = vsub.f32 1.5, %v1918_v1 }
 0x2d0   :  { %v1816_v46 = vpop.xlane.xlu0 %1815  ;;  %v2428_v14 = vpop.eup %2427 }
 0x2d1   :  { %v1838_v39 = vmax.f32 %v1816_v46, 1e-24  ;;  %v1920_v63 = vmul.f32 %v2426_v55, %v1919_v52  ;;  %v1926_v47 = vmul.f32 %v2428_v14, %v1837_v48  ;;  %vm1932_vm13 = vweird.f32 %v2428_v14 }
 0x2d2   :  { %vm1933_vm15 = vmor %vm1931_vm14, %vm1932_vm13 }
 0x2d3   :  { %2429 = vrsqrt.f32 %v1838_v39  ;;  %v1924_v53 = vsel %vm1923_vm12, %v2426_v55, %v1920_v63  ;;  %v1927_v17 = vmul.f32 %v2428_v14, %v1926_v47  ;;  %vm1941_vm1 = vweird.f32 %v1838_v39 }
 0x2d4   :  { %v2012_v21 = vmul.f32 %v1924_v53, %v4159_v58 }
 0x2d5   :  { %v1928_v45 = vmul.f32 0.5, %v1927_v17 }
 0x2d6   :  { %v2047_v25 = vadd.f32 %v2031_v40, %v2012_v21  ;;  %v2035_v40 = vsel %vm2021_vm7, %v4029_v6, 0.0 }
 0x2d7   :  { %v1929_v59 = vsub.f32 1.5, %v1928_v45 }
 0x2d8   :  { %v1818_v5 = vpop.xlane.xlu1 %1817  ;;  %v2160_v26 = vpack.c.bf16 %v2047_v25, %v2046_v3 }
 0x2d9   :  { %v2430_v35 = vpop.eup %2429  ;;  %v1839_v7 = vmax.f32 %v1818_v5, 1e-24  ;;  %v1930_v12 = vmul.f32 %v2428_v14, %v1929_v59 }
 0x2da   :  { %v1936_v44 = vmul.f32 %v2430_v35, %v1838_v39  ;;  %2184 = vst [vmem:[#allocation13 + $0x18] sm:$0xff] %v2160_v26   ;;  %vm1942_vm0 = vweird.f32 %v2430_v35 }
 0x2db   :  { %2431 = vrsqrt.f32 %v1839_v7  ;;  %v1934_v49 = vsel %vm1933_vm15, %v2428_v14, %v1930_v12  ;;  %vm1943_vm2 = vmor %vm1941_vm1, %vm1942_vm0  ;;  %vm1951_vm4 = vweird.f32 %v1839_v7 }
 0x2dc   :  { %v1937_v22 = vmul.f32 %v2430_v35, %v1936_v44  ;;  %v2013_v37 = vmul.f32 %v1934_v49, %v4167_v57 }
 0x2de   :  { %v1938_v38 = vmul.f32 0.5, %v1937_v22  ;;  %v2048_v61 = vadd.f32 %v2032_v16, %v2013_v37 }
 0x2e0   :  { %v1939_v24 = vsub.f32 1.5, %v1938_v38  ;;  %v1820_v58 = vpop.xlane.xlu2 %1819 }
 0x2e1   :  { %v2432_v30 = vpop.eup %2431  ;;  %v1840_v31 = vmax.f32 %v1820_v58, 1e-24 }
 0x2e2   :  { %v1940_v18 = vmul.f32 %v2430_v35, %v1939_v24  ;;  %v1946_v34 = vmul.f32 %v2432_v30, %v1839_v7  ;;  %vm1952_vm3 = vweird.f32 %v2432_v30 }
 0x2e3   :  { %2433 = vrsqrt.f32 %v1840_v31  ;;  %vm1953_vm5 = vmor %vm1951_vm4, %vm1952_vm3  ;;  %vm1961_vm8 = vweird.f32 %v1840_v31 }
 0x2e4   :  { %v1944_v29 = vsel %vm1943_vm2, %v2430_v35, %v1940_v18  ;;  %v1947_v50 = vmul.f32 %v2432_v30, %v1946_v34  ;;  %v2037_v18 = vsel %vm2021_vm7, %v4070_v8, 0.0 }
 0x2e5   :  { %v2014_v43 = vmul.f32 %v1944_v29, %v4175_v51 }
 0x2e6   :  { %v1948_v55 = vmul.f32 0.5, %v1947_v50 }
 0x2e7   :  { %v2049_v48 = vadd.f32 %v2033_v10, %v2014_v43 }
 0x2e8   :  { %v1949_v9 = vsub.f32 1.5, %v1948_v55  ;;  %v1822_v32 = vpop.xlane.xlu0 %1821 }
 0x2e9   :  { %v2434_v57 = vpop.eup %2433  ;;  %v2165_v27 = vpack.c.bf16 %v2049_v48, %v2048_v61  ;;  %v1841_v1 = vmax.f32 %v1822_v32, 1e-24 }
 0x2ea   :  { %v1956_v28 = vmul.f32 %v2434_v57, %v1840_v31  ;;  %v1950_v52 = vmul.f32 %v2432_v30, %v1949_v9  ;;  %vm1962_vm6 = vweird.f32 %v2434_v57  ;;  %v2036_v31 = vsel %vm2021_vm7, %v4061_v36, 0.0 }
 0x2eb   :  { %2185 = vst [vmem:[#allocation13 + $0x20] sm:$0xff] %v2165_v27   ;;  %2435 = vrsqrt.f32 %v1841_v1  ;;  %vm1963_vm9 = vmor %vm1961_vm8, %vm1962_vm6  ;;  %vm1971_vm11 = vweird.f32 %v1841_v1  ;;  %v2039_v27 = vsel %vm2021_vm7, %v4079_v2, 0.0 }
 0x2ec   :  { %v1957_v46 = vmul.f32 %v2434_v57, %v1956_v28  ;;  %v1954_v14 = vsel %vm1953_vm5, %v2432_v30, %v1950_v52 }
 0x2ed   :  { %v2015_v19 = vmul.f32 %v1954_v14, %v4183_v56 }
 0x2ee   :  { %v1958_v11 = vmul.f32 0.5, %v1957_v46 }
 0x2ef   :  { %v2050_v3 = vadd.f32 %v2034_v15, %v2015_v19 }
 0x2f0   :  { %v1959_v39 = vsub.f32 1.5, %v1958_v11  ;;  %v1824_v51 = vpop.xlane.xlu1 %1823 }
 0x2f1   :  { %v2436_v63 = vpop.eup %2435  ;;  %v1842_v47 = vmax.f32 %v1824_v51, 1e-24 }
 0x2f2   :  { %v1960_v0 = vmul.f32 %v2434_v57, %v1959_v39  ;;  %v1966_v54 = vmul.f32 %v2436_v63, %v1841_v1  ;;  %vm1972_vm10 = vweird.f32 %v2436_v63 }
 0x2f3   :  { %2437 = vrsqrt.f32 %v1842_v47  ;;  %vm1973_vm12 = vmor %vm1971_vm11, %vm1972_vm10  ;;  %vm1981_vm14 = vweird.f32 %v1842_v47 }
 0x2f4   :  { %v1964_v53 = vsel %vm1963_vm9, %v2434_v57, %v1960_v0  ;;  %v1967_v17 = vmul.f32 %v2436_v63, %v1966_v54  ;;  %v2038_v57 = vsel %vm2021_vm7, %v4076_v4, 0.0 }
 0x2f5   :  { %v2016_v21 = vmul.f32 %v1964_v53, %v4191_v20 }
 0x2f6   :  { %v1968_v45 = vmul.f32 0.5, %v1967_v17 }
 0x2f7   :  { %v2051_v25 = vadd.f32 %v2035_v40, %v2016_v21 }
 0x2f8   :  { %v1969_v59 = vsub.f32 1.5, %v1968_v45  ;;  %v1826_v5 = vpop.xlane.xlu2 %1825 }
 0x2f9   :  { %v2438_v56 = vpop.eup %2437  ;;  %v2170_v35 = vpack.c.bf16 %v2051_v25, %v2050_v3  ;;  %v1843_v26 = vmax.f32 %v1826_v5, 1e-24 }
 0x2fa   :  { %v1976_v7 = vmul.f32 %v2438_v56, %v1842_v47  ;;  %v1970_v62 = vmul.f32 %v2436_v63, %v1969_v59  ;;  %vm1982_vm13 = vweird.f32 %v2438_v56 }
 0x2fb   :  { %2186 = vst [vmem:[#allocation13 + $0x28] sm:$0xff] %v2170_v35   ;;  %2439 = vrsqrt.f32 %v1843_v26  ;;  %vm1983_vm15 = vmor %vm1981_vm14, %vm1982_vm13  ;;  %vm1991_vm1 = vweird.f32 %v1843_v26 }
 0x2fc   :  { %v1977_v44 = vmul.f32 %v2438_v56, %v1976_v7  ;;  %v1974_v12 = vsel %vm1973_vm12, %v2436_v63, %v1970_v62 }
 0x2fd   :  { %v2017_v30 = vmul.f32 %v1974_v12, %v4199_v60 }
 0x2fe   :  { %v1978_v6 = vmul.f32 0.5, %v1977_v44 }
 0x2ff   :  { %v2052_v10 = vadd.f32 %v2036_v31, %v2017_v30 }
 0x300   :  { %v1979_v22 = vsub.f32 1.5, %v1978_v6  ;;  %v1828_v20 = vpop.xlane.xlu0 %1827 }
 0x301   :  { %v2440_v38 = vpop.eup %2439  ;;  %v1844_v49 = vmax.f32 %v1828_v20, 1e-24 }
 0x302   :  { %v1980_v24 = vmul.f32 %v2438_v56, %v1979_v22  ;;  %v1986_v58 = vmul.f32 %v2440_v38, %v1843_v26  ;;  %vm1992_vm0 = vweird.f32 %v2440_v38 }
 0x303   :  { %2441 = vrsqrt.f32 %v1844_v49  ;;  %vm1993_vm2 = vmor %vm1991_vm1, %vm1992_vm0  ;;  %vm2001_vm4 = vweird.f32 %v1844_v49 }
 0x304   :  { %v1984_v34 = vsel %vm1983_vm15, %v2438_v56, %v1980_v24  ;;  %v1987_v37 = vmul.f32 %v2440_v38, %v1986_v58 }
 0x305   :  { %v2018_v33 = vmul.f32 %v1984_v34, %v4207_v42 }
 0x306   :  { %v1988_v16 = vmul.f32 0.5, %v1987_v37 }
 0x307   :  { %v2053_v29 = vadd.f32 %v2037_v18, %v2018_v33 }
 0x308   :  { %v1989_v50 = vsub.f32 1.5, %v1988_v16 }
 0x309   :  { %v2442_v43 = vpop.eup %2441  ;;  %v2175_v60 = vpack.c.bf16 %v2053_v29, %v2052_v10 }
 0x30a   :  { %v1996_v55 = vmul.f32 %v2442_v43, %v1844_v49  ;;  %v1990_v61 = vmul.f32 %v2440_v38, %v1989_v50  ;;  %vm2002_vm3 = vweird.f32 %v2442_v43 }
 0x30b   :  { %2187 = vst [vmem:[#allocation13 + $0x30] sm:$0xff] %v2175_v60   ;;  %vm2003_vm5 = vmor %vm2001_vm4, %vm2002_vm3 }
 0x30c   :  { %v1997_v48 = vmul.f32 %v2442_v43, %v1996_v55  ;;  %v1994_v9 = vsel %vm1993_vm2, %v2440_v38, %v1990_v61 }
 0x30d   :  { %v2019_v42 = vmul.f32 %v1994_v9, %v4215_v23 }
 0x30e   :  { %v1998_v36 = vmul.f32 0.5, %v1997_v48 }
 0x30f   :  { %v2054_v52 = vadd.f32 %v2038_v57, %v2019_v42 }
 0x310   :  { %v1999_v8 = vsub.f32 1.5, %v1998_v36 }
 0x312   :  { %v2000_v32 = vmul.f32 %v2442_v43, %v1999_v8 }
 0x314   :  { %v2004_v1 = vsel %vm2003_vm5, %v2442_v43, %v2000_v32 }
 0x315   :  { %v2020_v28 = vmul.f32 %v2004_v1, %v4223_v13 }
 0x317   :  { %v2055_v23 = vadd.f32 %v2039_v27, %v2020_v28 }
 0x319   :  { %v2180_v46 = vpack.c.bf16 %v2055_v23, %v2054_v52 }
 0x31b   :  { %2188 = vst [vmem:[#allocation13 + $0x38] sm:$0xff] %v2180_v46  }
 0x31c   :  { %2100 = dma.vmem_to_hbm [thread:$0]  %s2093_s29, 1024, %s2095_s11, [#allocation4], %s2673_s12, %s2673_s12, %s2674_s13  }
 0x31d   :  { %2660 = dma.done.wait [#allocation4], 1024  }
 0x31e   :  { %2661 = vsyncadd [#allocation4], 4294966272 }
 0x31f   :  { %2105 = vsyncpa [#allocation3], 1 }
 0x320   :  { %2106 = vsyncpa [#allocation6], 1 }
 0x321   :  { %2107 = vsyncpa [#allocation9], 1 }
 0x322   :  { %2108 = vsyncpa [#allocation12], 1 }
 0x323   :  { %2109 = vsyncpa [#allocation4], 1 }

</bundles_post_ra>
